<compile_context>
chip_gen: v6e
topology: v6e:2x2x1
jax: 0.10.0
libtpu: 0.0.40
codegen_flags: <defaults>
</compile_context>

<pallas_src>
import functools

import jax
import jax.numpy as jnp
from jax.experimental import pallas as pl
from jax.experimental.pallas import tpu as pltpu

VOCAB = 257          # byte values 0..255 plus padding token 256
VOCAB_PAD = 384      # padded to a lane multiple (keep at 384 — see review)
EMB_DIM = 8
MIN_LEN = 16
MAX_LEN = 16
PAD_TOKEN = 256
BATCH_BLOCK = 128    # sequences per grid step -> 128*L tokens per step (lane multiple)


def _embedding_model_kernel(x_ref, t_ref, pool_ref, b_ref, o_ref, *, vocab_pad):
    # x_ref:    (1, TB*L)   int32   lane-dense token ids of this batch chunk (VMEM)
    # t_ref:    (1, Vp)     float32 fused per-token score table = emb @ head_w (VMEM)
    # pool_ref: (TB*L, TB)  float32 static block-diagonal mean-pool matrix (VMEM)
    # b_ref:    (1,)        float32 head bias (SMEM)
    # o_ref:    (1, TB)     float32 lane-dense logits of this chunk (VMEM)
    toks = x_ref[...]                                                 # (1, n)
    n = toks.shape[-1]

    # Lane-dense transposed one-hot: vocab along sublanes, tokens along lanes
    # (n is a multiple of 128 by construction).  Padded vocab rows (257..383)
    # never match a token id, so they contribute zero.
    v_ids = jax.lax.broadcasted_iota(jnp.int32, (vocab_pad, n), 0)    # (Vp, n)
    onehot_t = (v_ids == toks).astype(jnp.float32)                    # (Vp, n)

    # Per-token fused scores: score[i] = emb[tok_i] @ head_w, one MXU matmul.
    scores = jnp.dot(t_ref[...], onehot_t,
                     preferred_element_type=jnp.float32)              # (1, n)

    # Mean pool via the precomputed (hoisted) block-diagonal matrix + bias.
    logits = jnp.dot(scores, pool_ref[...],
                     preferred_element_type=jnp.float32) + b_ref[0]   # (1, TB)
    o_ref[...] = logits


def conform_input_size(x, min_len=MIN_LEN, max_len=MAX_LEN, padding=PAD_TOKEN):
    """Mirrors EmbeddingModel._conform_input_size (glue, plain JAX)."""
    if min_len is None and max_len is None:
        return x
    _, cur = x.shape
    if min_len is not None:
        pad_needed = max(0, min_len - cur)
        x = jnp.pad(x, ((0, 0), (0, pad_needed)), constant_values=padding)
    x = x[:, :max_len]
    return x


def embedding_model_forward(x_tokens, emb_matrix, head_w, head_b):
    x = conform_input_size(x_tokens)
    B, L = x.shape

    TB = BATCH_BLOCK
    B_pad = ((B + TB - 1) // TB) * TB        # lane-padded batch (>= 128)
    n_blk = TB * L                           # tokens per grid step (multiple of 128)

    # Pad extra batch rows with the PAD token; their logits are sliced off below.
    # NOTE: token ids >= VOCAB would silently score 0 instead of raising like
    # nn.Embedding — only matters for malformed inputs.
    if B_pad != B:
        x = jnp.pad(x, ((0, B_pad - B), (0, 0)), constant_values=PAD_TOKEN)
    x_flat = x.reshape(1, B_pad * L).astype(jnp.int32)                 # lane-dense

    # Fuse embedding lookup + linear head into one per-token score table, padded to
    # a lane-multiple vocab (mean-pool and the D-contraction commute with the lookup).
    t = (emb_matrix @ head_w).reshape(1, VOCAB).astype(jnp.float32)    # (1, V)
    t_pad = jnp.zeros((1, VOCAB_PAD), jnp.float32).at[:, :VOCAB].set(t)

    # Static block-diagonal mean-pool matrix for ONE batch chunk (identical for every
    # chunk), built in the wrapper — hoisted out of the kernel.
    rows = jnp.arange(n_blk, dtype=jnp.int32)[:, None]
    cols = jnp.arange(TB, dtype=jnp.int32)[None, :]
    pool = jnp.where(rows // L == cols,
                     jnp.float32(1.0 / L), jnp.float32(0.0))           # (n_blk, TB)

    grid = (B_pad // TB,)
    kernel = functools.partial(_embedding_model_kernel, vocab_pad=VOCAB_PAD)
    out = pl.pallas_call(
        kernel,
        out_shape=jax.ShapeDtypeStruct((1, B_pad), jnp.float32),
        grid_spec=pltpu.PrefetchScalarGridSpec(
            num_scalar_prefetch=0,
            grid=grid,
            in_specs=[
                pl.BlockSpec((1, n_blk), lambda i: (0, i)),          # tokens, per chunk
                pl.BlockSpec((1, VOCAB_PAD), lambda i: (0, 0)),      # fused table
                pl.BlockSpec((n_blk, TB), lambda i: (0, 0)),         # pool matrix
                pl.BlockSpec(memory_space=pltpu.MemorySpace.SMEM),   # bias (1,)
            ],
            out_specs=pl.BlockSpec((1, TB), lambda i: (0, i)),
        ),
        compiler_params=pltpu.CompilerParams(
            dimension_semantics=("parallel",),
        ),
        cost_estimate=pl.CostEstimate(
            flops=2 * grid[0] * (VOCAB_PAD * n_blk + n_blk * TB),
            transcendentals=0,
            bytes_accessed=4 * (B_pad * L + VOCAB_PAD + n_blk * TB + 1 + B_pad),
        ),
    )(x_flat, t_pad, pool, head_b.reshape(1,).astype(jnp.float32))

    return out[0, :B].reshape(B, 1)


if __name__ == "__main__":
    key = jax.random.PRNGKey(0)
    k_tok, k_emb, k_w, k_b = jax.random.split(key, 4)

    B, L_in = 2, 12  # shorter than min_len so padding-with-256 is exercised
    x_tokens = jax.random.randint(k_tok, (B, L_in), 0, 256, dtype=jnp.int32)

    emb_matrix = (0.02 * jax.random.normal(k_emb, (VOCAB, EMB_DIM))).astype(jnp.float32)
    head_w = jax.random.normal(k_w, (EMB_DIM, 1), dtype=jnp.float32)
    head_b = jax.random.normal(k_b, (1,), dtype=jnp.float32)

    out = embedding_model_forward(x_tokens, emb_matrix, head_w, head_b)
    out = jax.block_until_ready(out)

    # Pure-JAX reference of the same forward pass.
    x_ref = conform_input_size(x_tokens)
    emb_ref = emb_matrix[x_ref]                     # (B, L, D) embedding lookup
    ref = emb_ref.mean(axis=1) @ head_w + head_b    # (B, 1)
    assert out.shape == (B, 1) and out.dtype == jnp.float32
    assert jnp.allclose(out, ref, atol=1e-5, rtol=1e-5)

    print("KERNEL_OK")
</pallas_src>

<mosaic_0001>
module attributes {stable_mosaic.version = 11 : i64} {
  func.func @_embedding_model_kernel(%arg0: i32, %arg1: memref<1x2048xi32, #tpu.memory_space<vmem>>, %arg2: memref<1x384xf32, #tpu.memory_space<vmem>>, %arg3: memref<2048x128xf32, #tpu.memory_space<vmem>>, %arg4: memref<1xf32, #tpu.memory_space<smem>>, %arg5: memref<1x128xf32, #tpu.memory_space<vmem>>) attributes {dimension_semantics = [#tpu.dimension_semantics<parallel>], iteration_bounds = array<i64: 1>, scalar_prefetch = 0 : i64, scratch_operands = 0 : i64, tpu.core_type = #tpu.core_type<tc>, window_params = [{transform_indices = @transform_0, window_bounds = array<i64: 1, 2048>}, {pipeline_mode = #tpu.pipeline_mode<synchronous>, transform_indices = @transform_1, window_bounds = array<i64: 1, 384>}, {pipeline_mode = #tpu.pipeline_mode<synchronous>, transform_indices = @transform_2, window_bounds = array<i64: 2048, 128>}, {transform_indices = @transform_3, window_bounds = array<i64: 1>}, {transform_indices = @transform_4, window_bounds = array<i64: 1, 128>}]} {
    %c0 = arith.constant 0 : index
    %c0_0 = arith.constant 0 : index
    %0 = vector.load %arg1[%c0, %c0_0] : memref<1x2048xi32, #tpu.memory_space<vmem>>, vector<1x2048xi32>
    %1 = tpu.iota {dimensions = array<i32: 0>} : vector<384x2048xi32>
    %2 = vector.broadcast %0 : vector<1x2048xi32> to vector<384x2048xi32>
    %3 = arith.cmpi eq, %1, %2 : vector<384x2048xi32>
    %4 = arith.extui %3 : vector<384x2048xi1> to vector<384x2048xi32>
    %5 = arith.sitofp %4 : vector<384x2048xi32> to vector<384x2048xf32>
    %c0_1 = arith.constant 0 : index
    %c0_2 = arith.constant 0 : index
    %6 = vector.load %arg2[%c0_1, %c0_2] : memref<1x384xf32, #tpu.memory_space<vmem>>, vector<1x384xf32>
    %cst = arith.constant dense<0.000000e+00> : vector<1x2048xf32>
    %7 = tpu.matmul %6, %5, %cst {dimension_numbers = #tpu.dot_dimension_numbers<[1], [0], [0], [1], [0, 0, 1, 1], [], []>} : vector<1x384xf32>, vector<384x2048xf32>, vector<1x2048xf32> -> vector<1x2048xf32>
    %c0_3 = arith.constant 0 : index
    %c0_4 = arith.constant 0 : index
    %8 = vector.load %arg3[%c0_3, %c0_4] : memref<2048x128xf32, #tpu.memory_space<vmem>>, vector<2048x128xf32>
    %cst_5 = arith.constant dense<0.000000e+00> : vector<1x128xf32>
    %9 = tpu.matmul %7, %8, %cst_5 {dimension_numbers = #tpu.dot_dimension_numbers<[1], [0], [0], [1], [0, 0, 1, 1], [], []>} : vector<1x2048xf32>, vector<2048x128xf32>, vector<1x128xf32> -> vector<1x128xf32>
    %c0_6 = arith.constant 0 : index
    %10 = memref.load %arg4[%c0_6] : memref<1xf32, #tpu.memory_space<smem>>
    %11 = vector.broadcast %10 : f32 to vector<1x128xf32>
    %12 = arith.addf %9, %11 : vector<1x128xf32>
    %c0_7 = arith.constant 0 : index
    %c0_8 = arith.constant 0 : index
    %13 = vector.load %arg5[%c0_7, %c0_8] : memref<1x128xf32, #tpu.memory_space<vmem>>, vector<1x128xf32>
    tpu.vector_store %arg5[%c0_7, %c0_8], %12 {strides = array<i32>} : memref<1x128xf32, #tpu.memory_space<vmem>>, vector<1x128xf32>,
    return
  }
  func.func @transform_0(%arg0: i32) -> (i32, i32) {
    %c0_i32 = arith.constant 0 : i32
    %c0_i32_0 = arith.constant 0 : i32
    return %c0_i32, %arg0 : i32, i32
  }
  func.func @transform_1(%arg0: i32) -> (i32, i32) {
    %c0_i32 = arith.constant 0 : i32
    %c0_i32_0 = arith.constant 0 : i32
    %c0_i32_1 = arith.constant 0 : i32
    return %c0_i32, %c0_i32_0 : i32, i32
  }
  func.func @transform_2(%arg0: i32) -> (i32, i32) {
    %c0_i32 = arith.constant 0 : i32
    %c0_i32_0 = arith.constant 0 : i32
    %c0_i32_1 = arith.constant 0 : i32
    return %c0_i32, %c0_i32_0 : i32, i32
  }
  func.func @transform_3(%arg0: i32) -> i32 {
    %c0_i32 = arith.constant 0 : i32
    %c0_i32_0 = arith.constant 0 : i32
    return %c0_i32 : i32
  }
  func.func @transform_4(%arg0: i32) -> (i32, i32) {
    %c0_i32 = arith.constant 0 : i32
    %c0_i32_0 = arith.constant 0 : i32
    return %c0_i32, %arg0 : i32, i32
  }
}

</mosaic_0001>

<bundles_post_ra>
// kernel: tpu_custom_call.1
= control target key start
LH: loop header
LB: loop body
LE: loop exit
PB: predicated region body
PF: predicated region fallthrough
CT: control target
= control target key end

     0   :  { %10 = vsyncpa [#allocation4], 0  ;;  %s9001_s0 = inlined_call_operand.hbm [shape: s32[1,2048], index: 0, kind: input, shape index: {}]   ;;  %s9002_s1 = inlined_call_operand.vmem [shape: f32[1,384], index: 1, kind: input, shape index: {}]   ;;  %s9003_s2 = inlined_call_operand.hbm [shape: f32[2048,128], index: 2, kind: input, shape index: {}]   ;;  %s9004_s3 = inlined_call_operand.<no memory space> [shape: f32[1], index: 3, kind: input, shape index: {}]   ;;  %s9005_s4 = inlined_call_operand.hbm [shape: f32[1,128], index: 4, kind: output, shape index: {}]  }
   0x1   :  { %11 = vsyncpa [#allocation7], 0 }
   0x2   :  { %12 = vsyncpa [#allocation5], 0  ;;  %s6343_s15 = smov [#allocation3]   ;;  %s6344_s17 = smov [#allocation6]  }
   0x3   :  { %s19_s16 = sshll.u32 %s6343_s15, 4  ;;  %s30_s18 = sshll.u32 %s6344_s17, 4  ;;  %s20_s16 = int_to_ptr.vmem [resolvable:$true] %s19_s16  ;;  %s31_s18 = int_to_ptr.vmem [resolvable:$true] %s30_s18 }
   0x4   :  { %s6285_s19 = scalar_lea.vmem %s20_s16, 256  ;;  %p6290_p1 = scmp.lt.s32.totalorder %s20_s16, %s20_s16 }
   0x5   :  { %p6286_p0 = scmp.ne.s32.totalorder %s20_s16, %s6285_s19  ;;  %p6291_p2 = scmp.lt.s32.totalorder %s6285_s19, %s6285_s19 }
   0x7   :  { %p6292_p3 = por %p6291_p2, %p6290_p1 }
   0x9   :  { %p6293_p4 = pnand %p6292_p3, %p6286_p0 }
   0xb   :  { %6296 = shalt.err (!%p6293_p4)
}
   0xc   :  { %22 = dma.hbm_to_vmem [thread:$0]  %s9001_s0, 256, %s20_s16, [#allocation4]  }
   0xd   :  { %s6305_s22 = scalar_lea.vmem %s31_s18, 32768  ;;  %p6310_p6 = scmp.lt.s32.totalorder %s31_s18, %s31_s18 }
   0xe   :  { %p6306_p5 = scmp.ne.s32.totalorder %s31_s18, %s6305_s22  ;;  %p6311_p7 = scmp.lt.s32.totalorder %s6305_s22, %s6305_s22 }
  0x10   :  { %p6312_p8 = por %p6311_p7, %p6310_p6 }
  0x12   :  { %p6313_p9 = pnand %p6312_p8, %p6306_p5 }
  0x14   :  { %6316 = shalt.err (!%p6313_p9)
}
  0x15   :  { %s6345_s23 = smov 128   ;;  %s6346_s24 = smov 8  }
  0x16   :  { %36 = dma.hbm_to_vmem [thread:$0]  %s9003_s2, 32768, %s31_s18, [#allocation7], %s6345_s23, %s6345_s23, %s6346_s24  }
  0x17   :  { %6337 = dma.done.wait [#allocation4], 256  }
  0x18   :  { %6338 = vsyncadd [#allocation4], 4294967040 }
  0x19   :  { %6339 = dma.done.wait [#allocation7], 32768  }
  0x1a   :  { %6340 = vsyncadd [#allocation7], 4294934528  ;;  %v47_v0 = vlaneseq  ;;  %v6347_v1 = vmov 0.0   ;;  %v6396_v7 = vld [vmem:[#allocation3] sm:$0xff]  ;;  %v6348_v16 = vmov 1.0  }
  0x1b   :  { %2616 = vmatprep.mubr.f32.mxu1 %v6347_v1  ;;  %v6671_v43 = vld [vmem:[%s9002_s1] sm:$0x7] }
  0x1c   :  { %v6382_v2 = vshrl.u32 %v47_v0, 7 }
  0x1e   :  { %v6385_v3 = vsub.s32 1, %v6382_v2  ;;  %v6388_v4 = vsub.s32 0, %v6382_v2  ;;  %v6391_v5 = vadd.s32 120, %v6382_v2  ;;  %v6394_v6 = vadd.s32 376, %v6382_v2 }
  0x1f   :  { %v6399_v8 = vadd.s32 112, %v6382_v2  ;;  %v6402_v9 = vadd.s32 368, %v6382_v2  ;;  %v6413_v12 = vadd.s32 104, %v6382_v2  ;;  %v6416_v13 = vadd.s32 360, %v6382_v2 }
  0x20   :  { %v6406_v10 = vrot.slane %v6396_v7, %v6385_v3  ;;  %v6410_v11 = vrot.slane %v6396_v7, %v6388_v4  ;;  %v6419_v14 = vadd.s32 96, %v6382_v2  ;;  %v6422_v15 = vadd.s32 352, %v6382_v2 }
  0x21   :  { %v6441_v17 = vadd.s32 88, %v6382_v2  ;;  %v6452_v18 = vadd.s32 344, %v6382_v2  ;;  %v6467_v19 = vadd.s32 80, %v6382_v2  ;;  %v6470_v20 = vadd.s32 336, %v6382_v2 }
  0x22   :  { %vm401_vm0 = vcmp.eq.s32.totalorder %v6391_v5, %v6406_v10  ;;  %vm913_vm1 = vcmp.eq.s32.totalorder %v6394_v6, %v6406_v10  ;;  %vm400_vm2 = vcmp.eq.s32.totalorder %v6391_v5, %v6410_v11  ;;  %vm912_vm3 = vcmp.eq.s32.totalorder %v6394_v6, %v6410_v11 }
  0x23   :  { %5220 = vmatprep.subr.msk.mxu0 %vm401_vm0, %v6348_v16  ;;  %5284 = vmatprep.subr.msk.mxu1 %vm913_vm1, %v6348_v16  ;;  %vm385_vm4 = vcmp.eq.s32.totalorder %v6399_v8, %v6406_v10  ;;  %vm897_vm5 = vcmp.eq.s32.totalorder %v6402_v9, %v6406_v10  ;;  %vm384_vm6 = vcmp.eq.s32.totalorder %v6399_v8, %v6410_v11  ;;  %v6485_v21 = vadd.s32 72, %v6382_v2 }
  0x24   :  { %5221 = vmatpush1.msk.msra.mxu0 %vm400_vm2, %v6348_v16  ;;  %5285 = vmatpush1.msk.msra.mxu1 %vm912_vm3, %v6348_v16  ;;  %vm896_vm7 = vcmp.eq.s32.totalorder %v6402_v9, %v6410_v11  ;;  %vm369_vm8 = vcmp.eq.s32.totalorder %v6413_v12, %v6406_v10  ;;  %vm881_vm9 = vcmp.eq.s32.totalorder %v6416_v13, %v6406_v10  ;;  %v6488_v22 = vadd.s32 328, %v6382_v2 }
  0x25   :  { %5222 = vmatprep.subr.msk.mxu0 %vm385_vm4, %v6348_v16  ;;  %5286 = vmatprep.subr.msk.mxu1 %vm897_vm5, %v6348_v16  ;;  %vm368_vm10 = vcmp.eq.s32.totalorder %v6413_v12, %v6410_v11  ;;  %vm880_vm11 = vcmp.eq.s32.totalorder %v6416_v13, %v6410_v11  ;;  %vm353_vm12 = vcmp.eq.s32.totalorder %v6419_v14, %v6406_v10  ;;  %v6503_v23 = vadd.s32 64, %v6382_v2 }
  0x26   :  { %5223 = vmatpush1.msk.msra.mxu0 %vm384_vm6, %v6348_v16  ;;  %5287 = vmatpush1.msk.msra.mxu1 %vm896_vm7, %v6348_v16  ;;  %vm865_vm13 = vcmp.eq.s32.totalorder %v6422_v15, %v6406_v10  ;;  %vm352_vm14 = vcmp.eq.s32.totalorder %v6419_v14, %v6410_v11  ;;  %vm864_vm15 = vcmp.eq.s32.totalorder %v6422_v15, %v6410_v11  ;;  %v6506_v24 = vadd.s32 320, %v6382_v2 }
  0x27   :  { %5224 = vmatprep.subr.msk.mxu0 %vm369_vm8, %v6348_v16  ;;  %5288 = vmatprep.subr.msk.mxu1 %vm881_vm9, %v6348_v16  ;;  %vm337_vm0 = vcmp.eq.s32.totalorder %v6441_v17, %v6406_v10  ;;  %vm849_vm1 = vcmp.eq.s32.totalorder %v6452_v18, %v6406_v10  ;;  %vm336_vm2 = vcmp.eq.s32.totalorder %v6441_v17, %v6410_v11  ;;  %v6521_v25 = vadd.s32 56, %v6382_v2 }
  0x28   :  { %5225 = vmatpush1.msk.msra.mxu0 %vm368_vm10, %v6348_v16  ;;  %5289 = vmatpush1.msk.msra.mxu1 %vm880_vm11, %v6348_v16  ;;  %vm848_vm3 = vcmp.eq.s32.totalorder %v6452_v18, %v6410_v11  ;;  %vm321_vm4 = vcmp.eq.s32.totalorder %v6467_v19, %v6406_v10  ;;  %vm833_vm5 = vcmp.eq.s32.totalorder %v6470_v20, %v6406_v10  ;;  %v6524_v26 = vadd.s32 312, %v6382_v2 }
  0x29   :  { %5226 = vmatprep.subr.msk.mxu0 %vm353_vm12, %v6348_v16  ;;  %5290 = vmatprep.subr.msk.mxu1 %vm865_vm13, %v6348_v16  ;;  %vm320_vm6 = vcmp.eq.s32.totalorder %v6467_v19, %v6410_v11  ;;  %vm832_vm7 = vcmp.eq.s32.totalorder %v6470_v20, %v6410_v11  ;;  %vm305_vm8 = vcmp.eq.s32.totalorder %v6485_v21, %v6406_v10  ;;  %v6539_v27 = vadd.s32 48, %v6382_v2 }
  0x2a   :  { %5227 = vmatpush1.msk.msra.mxu0 %vm352_vm14, %v6348_v16  ;;  %5291 = vmatpush1.msk.msra.mxu1 %vm864_vm15, %v6348_v16  ;;  %vm817_vm9 = vcmp.eq.s32.totalorder %v6488_v22, %v6406_v10  ;;  %vm304_vm10 = vcmp.eq.s32.totalorder %v6485_v21, %v6410_v11  ;;  %vm816_vm11 = vcmp.eq.s32.totalorder %v6488_v22, %v6410_v11  ;;  %v6542_v28 = vadd.s32 304, %v6382_v2 }
  0x2b   :  { %5228 = vmatprep.subr.msk.mxu0 %vm337_vm0, %v6348_v16  ;;  %5292 = vmatprep.subr.msk.mxu1 %vm849_vm1, %v6348_v16  ;;  %vm289_vm12 = vcmp.eq.s32.totalorder %v6503_v23, %v6406_v10  ;;  %vm801_vm13 = vcmp.eq.s32.totalorder %v6506_v24, %v6406_v10  ;;  %vm288_vm14 = vcmp.eq.s32.totalorder %v6503_v23, %v6410_v11  ;;  %v6557_v29 = vadd.s32 40, %v6382_v2 }
  0x2c   :  { %5229 = vmatpush1.msk.msra.mxu0 %vm336_vm2, %v6348_v16  ;;  %5293 = vmatpush1.msk.msra.mxu1 %vm848_vm3, %v6348_v16  ;;  %vm800_vm15 = vcmp.eq.s32.totalorder %v6506_v24, %v6410_v11  ;;  %vm273_vm0 = vcmp.eq.s32.totalorder %v6521_v25, %v6406_v10  ;;  %vm785_vm1 = vcmp.eq.s32.totalorder %v6524_v26, %v6406_v10  ;;  %v6560_v30 = vadd.s32 296, %v6382_v2 }
  0x2d   :  { %5230 = vmatprep.subr.msk.mxu0 %vm321_vm4, %v6348_v16  ;;  %5294 = vmatprep.subr.msk.mxu1 %vm833_vm5, %v6348_v16  ;;  %vm272_vm2 = vcmp.eq.s32.totalorder %v6521_v25, %v6410_v11  ;;  %vm784_vm3 = vcmp.eq.s32.totalorder %v6524_v26, %v6410_v11  ;;  %vm257_vm4 = vcmp.eq.s32.totalorder %v6539_v27, %v6406_v10  ;;  %v6575_v31 = vadd.s32 32, %v6382_v2 }
  0x2e   :  { %5231 = vmatpush1.msk.msra.mxu0 %vm320_vm6, %v6348_v16  ;;  %5295 = vmatpush1.msk.msra.mxu1 %vm832_vm7, %v6348_v16  ;;  %vm769_vm5 = vcmp.eq.s32.totalorder %v6542_v28, %v6406_v10  ;;  %v6578_v32 = vadd.s32 288, %v6382_v2  ;;  %vm256_vm6 = vcmp.eq.s32.totalorder %v6539_v27, %v6410_v11  ;;  %vm768_vm7 = vcmp.eq.s32.totalorder %v6542_v28, %v6410_v11 }
  0x2f   :  { %5232 = vmatprep.subr.msk.mxu0 %vm305_vm8, %v6348_v16  ;;  %5296 = vmatprep.subr.msk.mxu1 %vm817_vm9, %v6348_v16  ;;  %vm241_vm8 = vcmp.eq.s32.totalorder %v6557_v29, %v6406_v10  ;;  %vm753_vm9 = vcmp.eq.s32.totalorder %v6560_v30, %v6406_v10  ;;  %v6593_v33 = vadd.s32 24, %v6382_v2  ;;  %v6596_v34 = vadd.s32 280, %v6382_v2 }
  0x30   :  { %5233 = vmatpush1.msk.msra.mxu0 %vm304_vm10, %v6348_v16  ;;  %5297 = vmatpush1.msk.msra.mxu1 %vm816_vm11, %v6348_v16  ;;  %vm240_vm10 = vcmp.eq.s32.totalorder %v6557_v29, %v6410_v11  ;;  %vm752_vm11 = vcmp.eq.s32.totalorder %v6560_v30, %v6410_v11  ;;  %v6611_v35 = vadd.s32 16, %v6382_v2  ;;  %v6614_v36 = vadd.s32 272, %v6382_v2 }
  0x31   :  { %5234 = vmatprep.subr.msk.mxu0 %vm289_vm12, %v6348_v16  ;;  %5298 = vmatprep.subr.msk.mxu1 %vm801_vm13, %v6348_v16  ;;  %vm225_vm12 = vcmp.eq.s32.totalorder %v6575_v31, %v6406_v10  ;;  %vm737_vm13 = vcmp.eq.s32.totalorder %v6578_v32, %v6406_v10  ;;  %v6629_v37 = vadd.s32 8, %v6382_v2  ;;  %v6632_v38 = vadd.s32 264, %v6382_v2 }
  0x32   :  { %5235 = vmatpush1.msk.msra.mxu0 %vm288_vm14, %v6348_v16  ;;  %5299 = vmatpush1.msk.msra.mxu1 %vm800_vm15, %v6348_v16  ;;  %vm224_vm14 = vcmp.eq.s32.totalorder %v6575_v31, %v6410_v11  ;;  %vm736_vm15 = vcmp.eq.s32.totalorder %v6578_v32, %v6410_v11  ;;  %v110_v39 = vsub.s32 3, %v6382_v2  ;;  %v6648_v40 = vadd.s32 256, %v6382_v2 }
  0x33   :  { %5236 = vmatprep.subr.msk.mxu0 %vm273_vm0, %v6348_v16  ;;  %5300 = vmatprep.subr.msk.mxu1 %vm785_vm1, %v6348_v16  ;;  %vm209_vm0 = vcmp.eq.s32.totalorder %v6593_v33, %v6406_v10  ;;  %vm721_vm1 = vcmp.eq.s32.totalorder %v6596_v34, %v6406_v10  ;;  %v6651_v41 = vsub.s32 2, %v6382_v2  ;;  %v6666_v42 = vadd.s32 248, %v6382_v2 }
  0x34   :  { %5237 = vmatpush1.msk.msra.mxu0 %vm272_vm2, %v6348_v16  ;;  %5301 = vmatpush1.msk.msra.mxu1 %vm784_vm3, %v6348_v16  ;;  %vm208_vm2 = vcmp.eq.s32.totalorder %v6593_v33, %v6410_v11  ;;  %vm720_vm3 = vcmp.eq.s32.totalorder %v6596_v34, %v6410_v11  ;;  %v6682_v44 = vrot.slane %v6396_v7, %v110_v39  ;;  %v6695_v46 = vadd.s32 240, %v6382_v2 }
  0x35   :  { %5238 = vmatprep.subr.msk.mxu0 %vm257_vm4, %v6348_v16  ;;  %5302 = vmatprep.subr.msk.mxu1 %vm769_vm5, %v6348_v16  ;;  %vm193_vm4 = vcmp.eq.s32.totalorder %v6611_v35, %v6406_v10  ;;  %vm705_vm5 = vcmp.eq.s32.totalorder %v6614_v36, %v6406_v10  ;;  %v6692_v45 = vrot.slane %v6396_v7, %v6651_v41  ;;  %v6712_v48 = vadd.s32 232, %v6382_v2 }
  0x36   :  { %5239 = vmatpush1.msk.msra.mxu0 %vm256_vm6, %v6348_v16  ;;  %5303 = vmatpush1.msk.msra.mxu1 %vm768_vm7, %v6348_v16  ;;  %vm192_vm6 = vcmp.eq.s32.totalorder %v6611_v35, %v6410_v11  ;;  %vm704_vm7 = vcmp.eq.s32.totalorder %v6614_v36, %v6410_v11  ;;  %v6705_v47 = vrot.slane %v6671_v43, %v6651_v41  ;;  %v6727_v49 = vadd.s32 224, %v6382_v2 }
  0x37   :  { %5240 = vmatprep.subr.msk.mxu0 %vm241_vm8, %v6348_v16  ;;  %5304 = vmatprep.subr.msk.mxu1 %vm753_vm9, %v6348_v16  ;;  %vm177_vm8 = vcmp.eq.s32.totalorder %v6629_v37, %v6406_v10  ;;  %vm689_vm9 = vcmp.eq.s32.totalorder %v6632_v38, %v6406_v10  ;;  %v6742_v50 = vadd.s32 216, %v6382_v2  ;;  %v6757_v51 = vadd.s32 208, %v6382_v2 }
  0x38   :  { %5241 = vmatpush1.msk.msra.mxu0 %vm240_vm10, %v6348_v16  ;;  %5305 = vmatpush1.msk.msra.mxu1 %vm752_vm11, %v6348_v16  ;;  %vm176_vm10 = vcmp.eq.s32.totalorder %v6629_v37, %v6410_v11  ;;  %vm688_vm11 = vcmp.eq.s32.totalorder %v6632_v38, %v6410_v11  ;;  %v6772_v52 = vadd.s32 200, %v6382_v2  ;;  %v6787_v53 = vadd.s32 192, %v6382_v2 }
  0x39   :  { %5242 = vmatprep.subr.msk.mxu0 %vm225_vm12, %v6348_v16  ;;  %5306 = vmatprep.subr.msk.mxu1 %vm737_vm13, %v6348_v16  ;;  %vm161_vm12 = vcmp.eq.s32.totalorder %v6382_v2, %v6406_v10  ;;  %vm673_vm13 = vcmp.eq.s32.totalorder %v6648_v40, %v6406_v10  ;;  %v6802_v54 = vadd.s32 184, %v6382_v2  ;;  %v6817_v55 = vadd.s32 176, %v6382_v2 }
  0x3a   :  { %5243 = vmatpush1.msk.msra.mxu0 %vm224_vm14, %v6348_v16  ;;  %5307 = vmatpush1.msk.msra.mxu1 %vm736_vm15, %v6348_v16  ;;  %vm160_vm14 = vcmp.eq.s32.totalorder %v6382_v2, %v6410_v11  ;;  %vm672_vm15 = vcmp.eq.s32.totalorder %v6648_v40, %v6410_v11  ;;  %v6832_v56 = vadd.s32 168, %v6382_v2  ;;  %v6847_v57 = vadd.s32 160, %v6382_v2 }
  0x3b   :  { %5244 = vmatprep.subr.msk.mxu0 %vm209_vm0, %v6348_v16  ;;  %5308 = vmatprep.subr.msk.mxu1 %vm721_vm1, %v6348_v16  ;;  %vm657_vm0 = vcmp.eq.s32.totalorder %v6666_v42, %v6406_v10  ;;  %vm403_vm1 = vcmp.eq.s32.totalorder %v6391_v5, %v6682_v44  ;;  %v6862_v58 = vadd.s32 152, %v6382_v2  ;;  %v6877_v59 = vadd.s32 144, %v6382_v2 }
  0x3c   :  { %5245 = vmatpush1.msk.msra.mxu0 %vm208_vm2, %v6348_v16  ;;  %5309 = vmatpush1.msk.msra.mxu1 %vm720_vm3, %v6348_v16  ;;  %vm656_vm2 = vcmp.eq.s32.totalorder %v6666_v42, %v6410_v11  ;;  %vm402_vm3 = vcmp.eq.s32.totalorder %v6391_v5, %v6692_v45  ;;  %v6892_v60 = vadd.s32 136, %v6382_v2  ;;  %v6907_v61 = vadd.s32 128, %v6382_v2 }
  0x3d   :  { %5246 = vmatprep.subr.msk.mxu0 %vm193_vm4, %v6348_v16  ;;  %5310 = vmatprep.subr.msk.mxu1 %vm705_vm5, %v6348_v16  ;;  %vm641_vm4 = vcmp.eq.s32.totalorder %v6695_v46, %v6406_v10  ;;  %vm387_vm5 = vcmp.eq.s32.totalorder %v6399_v8, %v6682_v44  ;;  %v6941_v62 = vrot.slane %v6671_v43, %v6385_v3  ;;  %v9007_v0 = vsub.s32 5, %v6382_v2 }
  0x3e   :  { %5247 = vmatpush1.msk.msra.mxu0 %vm192_vm6, %v6348_v16  ;;  %5311 = vmatpush1.msk.msra.mxu1 %vm704_vm7, %v6348_v16  ;;  %vm640_vm6 = vcmp.eq.s32.totalorder %v6695_v46, %v6410_v11  ;;  %vm386_vm7 = vcmp.eq.s32.totalorder %v6399_v8, %v6692_v45  ;;  %v6949_v63 = vrot.slane %v6671_v43, %v6388_v4 }
  0x3f   :  { %5248 = vmatprep.subr.msk.mxu0 %vm177_vm8, %v6348_v16  ;;  %5312 = vmatprep.subr.msk.mxu1 %vm689_vm9, %v6348_v16  ;;  %vm625_vm8 = vcmp.eq.s32.totalorder %v6712_v48, %v6406_v10  ;;  %vm371_vm9 = vcmp.eq.s32.totalorder %v6413_v12, %v6682_v44 }
  0x40   :  { %5249 = vmatpush1.msk.msra.mxu0 %vm176_vm10, %v6348_v16  ;;  %5313 = vmatpush1.msk.msra.mxu1 %vm688_vm11, %v6348_v16  ;;  %vm624_vm10 = vcmp.eq.s32.totalorder %v6712_v48, %v6410_v11  ;;  %vm370_vm11 = vcmp.eq.s32.totalorder %v6413_v12, %v6692_v45 }
  0x41   :  { %5250 = vmatprep.subr.msk.mxu0 %vm161_vm12, %v6348_v16  ;;  %5314 = vmatprep.subr.msk.mxu1 %vm673_vm13, %v6348_v16  ;;  %vm609_vm12 = vcmp.eq.s32.totalorder %v6727_v49, %v6406_v10  ;;  %vm355_vm13 = vcmp.eq.s32.totalorder %v6419_v14, %v6682_v44 }
  0x42   :  { %5251 = vmatpush1.msk.msra.mxu0 %vm160_vm14, %v6348_v16  ;;  %5315 = vmatpush1.msk.msra.mxu1 %vm672_vm15, %v6348_v16  ;;  %vm608_vm14 = vcmp.eq.s32.totalorder %v6727_v49, %v6410_v11  ;;  %vm354_vm15 = vcmp.eq.s32.totalorder %v6419_v14, %v6692_v45 }
  0x43   :  { %5252 = vmatprep.subr.msk.mxu0 %vm657_vm0, %v6348_v16  ;;  %2617 = vmatmul.mubr.f32.vlgmr.msra.gmra.mxu1 %v6705_v47  ;;  %vm593_vm0 = vcmp.eq.s32.totalorder %v6742_v50, %v6406_v10 }
  0x44   :  { %5316 = vmatprep.subr.msk.mxu1 %vm403_vm1, %v6348_v16  ;;  %5253 = vmatpush2.msk.msra.mxu0 %vm656_vm2, %v6348_v16  ;;  %vm339_vm1 = vcmp.eq.s32.totalorder %v6441_v17, %v6682_v44  ;;  %vm592_vm2 = vcmp.eq.s32.totalorder %v6742_v50, %v6410_v11 }
  0x45   :  { %5317 = vmatpush1.msk.msra.mxu1 %vm402_vm3, %v6348_v16  ;;  %5254 = vmatprep.subr.msk.mxu0 %vm641_vm4, %v6348_v16  ;;  %vm338_vm3 = vcmp.eq.s32.totalorder %v6441_v17, %v6692_v45  ;;  %vm577_vm4 = vcmp.eq.s32.totalorder %v6757_v51, %v6406_v10 }
  0x46   :  { %5318 = vmatprep.subr.msk.mxu1 %vm387_vm5, %v6348_v16  ;;  %5255 = vmatpush2.msk.msra.mxu0 %vm640_vm6, %v6348_v16  ;;  %vm323_vm5 = vcmp.eq.s32.totalorder %v6467_v19, %v6682_v44  ;;  %vm576_vm6 = vcmp.eq.s32.totalorder %v6757_v51, %v6410_v11 }
  0x47   :  { %5319 = vmatpush1.msk.msra.mxu1 %vm386_vm7, %v6348_v16  ;;  %5256 = vmatprep.subr.msk.mxu0 %vm625_vm8, %v6348_v16  ;;  %vm322_vm7 = vcmp.eq.s32.totalorder %v6467_v19, %v6692_v45  ;;  %vm561_vm8 = vcmp.eq.s32.totalorder %v6772_v52, %v6406_v10 }
  0x48   :  { %5320 = vmatprep.subr.msk.mxu1 %vm371_vm9, %v6348_v16  ;;  %5257 = vmatpush2.msk.msra.mxu0 %vm624_vm10, %v6348_v16  ;;  %vm307_vm9 = vcmp.eq.s32.totalorder %v6485_v21, %v6682_v44  ;;  %vm560_vm10 = vcmp.eq.s32.totalorder %v6772_v52, %v6410_v11 }
  0x49   :  { %5321 = vmatpush1.msk.msra.mxu1 %vm370_vm11, %v6348_v16  ;;  %5258 = vmatprep.subr.msk.mxu0 %vm609_vm12, %v6348_v16  ;;  %vm306_vm11 = vcmp.eq.s32.totalorder %v6485_v21, %v6692_v45  ;;  %vm545_vm12 = vcmp.eq.s32.totalorder %v6787_v53, %v6406_v10 }
  0x4a   :  { %5322 = vmatprep.subr.msk.mxu1 %vm355_vm13, %v6348_v16  ;;  %5259 = vmatpush2.msk.msra.mxu0 %vm608_vm14, %v6348_v16  ;;  %vm291_vm13 = vcmp.eq.s32.totalorder %v6503_v23, %v6682_v44  ;;  %vm544_vm14 = vcmp.eq.s32.totalorder %v6787_v53, %v6410_v11 }
  0x4b   :  { %5323 = vmatpush1.msk.msra.mxu1 %vm354_vm15, %v6348_v16  ;;  %5260 = vmatprep.subr.msk.mxu0 %vm593_vm0, %v6348_v16  ;;  %vm290_vm15 = vcmp.eq.s32.totalorder %v6503_v23, %v6692_v45  ;;  %vm529_vm0 = vcmp.eq.s32.totalorder %v6802_v54, %v6406_v10 }
  0x4c   :  { %5324 = vmatprep.subr.msk.mxu1 %vm339_vm1, %v6348_v16  ;;  %5261 = vmatpush2.msk.msra.mxu0 %vm592_vm2, %v6348_v16  ;;  %vm275_vm1 = vcmp.eq.s32.totalorder %v6521_v25, %v6682_v44  ;;  %vm528_vm2 = vcmp.eq.s32.totalorder %v6802_v54, %v6410_v11 }
  0x4d   :  { %5325 = vmatpush1.msk.msra.mxu1 %vm338_vm3, %v6348_v16  ;;  %5262 = vmatprep.subr.msk.mxu0 %vm577_vm4, %v6348_v16  ;;  %vm274_vm3 = vcmp.eq.s32.totalorder %v6521_v25, %v6692_v45  ;;  %vm513_vm4 = vcmp.eq.s32.totalorder %v6817_v55, %v6406_v10 }
  0x4e   :  { %5326 = vmatprep.subr.msk.mxu1 %vm323_vm5, %v6348_v16  ;;  %5263 = vmatpush2.msk.msra.mxu0 %vm576_vm6, %v6348_v16  ;;  %vm259_vm5 = vcmp.eq.s32.totalorder %v6539_v27, %v6682_v44  ;;  %vm512_vm6 = vcmp.eq.s32.totalorder %v6817_v55, %v6410_v11 }
  0x4f   :  { %5327 = vmatpush1.msk.msra.mxu1 %vm322_vm7, %v6348_v16  ;;  %5264 = vmatprep.subr.msk.mxu0 %vm561_vm8, %v6348_v16  ;;  %vm258_vm7 = vcmp.eq.s32.totalorder %v6539_v27, %v6692_v45  ;;  %vm497_vm8 = vcmp.eq.s32.totalorder %v6832_v56, %v6406_v10 }
  0x50   :  { %5328 = vmatprep.subr.msk.mxu1 %vm307_vm9, %v6348_v16  ;;  %5265 = vmatpush2.msk.msra.mxu0 %vm560_vm10, %v6348_v16  ;;  %vm243_vm9 = vcmp.eq.s32.totalorder %v6557_v29, %v6682_v44  ;;  %vm496_vm10 = vcmp.eq.s32.totalorder %v6832_v56, %v6410_v11 }
  0x51   :  { %5329 = vmatpush1.msk.msra.mxu1 %vm306_vm11, %v6348_v16  ;;  %5266 = vmatprep.subr.msk.mxu0 %vm545_vm12, %v6348_v16  ;;  %vm242_vm11 = vcmp.eq.s32.totalorder %v6557_v29, %v6692_v45  ;;  %vm481_vm12 = vcmp.eq.s32.totalorder %v6847_v57, %v6406_v10 }
  0x52   :  { %5330 = vmatprep.subr.msk.mxu1 %vm291_vm13, %v6348_v16  ;;  %5267 = vmatpush2.msk.msra.mxu0 %vm544_vm14, %v6348_v16  ;;  %vm227_vm13 = vcmp.eq.s32.totalorder %v6575_v31, %v6682_v44  ;;  %vm480_vm14 = vcmp.eq.s32.totalorder %v6847_v57, %v6410_v11 }
  0x53   :  { %5331 = vmatpush1.msk.msra.mxu1 %vm290_vm15, %v6348_v16  ;;  %5268 = vmatprep.subr.msk.mxu0 %vm529_vm0, %v6348_v16  ;;  %vm226_vm15 = vcmp.eq.s32.totalorder %v6575_v31, %v6692_v45  ;;  %vm465_vm0 = vcmp.eq.s32.totalorder %v6862_v58, %v6406_v10 }
  0x54   :  { %5332 = vmatprep.subr.msk.mxu1 %vm275_vm1, %v6348_v16  ;;  %5269 = vmatpush2.msk.msra.mxu0 %vm528_vm2, %v6348_v16  ;;  %vm211_vm1 = vcmp.eq.s32.totalorder %v6593_v33, %v6682_v44  ;;  %vm464_vm2 = vcmp.eq.s32.totalorder %v6862_v58, %v6410_v11 }
  0x55   :  { %5333 = vmatpush1.msk.msra.mxu1 %vm274_vm3, %v6348_v16  ;;  %5270 = vmatprep.subr.msk.mxu0 %vm513_vm4, %v6348_v16  ;;  %vm210_vm3 = vcmp.eq.s32.totalorder %v6593_v33, %v6692_v45  ;;  %vm449_vm4 = vcmp.eq.s32.totalorder %v6877_v59, %v6406_v10 }
  0x56   :  { %5334 = vmatprep.subr.msk.mxu1 %vm259_vm5, %v6348_v16  ;;  %5271 = vmatpush2.msk.msra.mxu0 %vm512_vm6, %v6348_v16  ;;  %vm195_vm5 = vcmp.eq.s32.totalorder %v6611_v35, %v6682_v44  ;;  %vm448_vm6 = vcmp.eq.s32.totalorder %v6877_v59, %v6410_v11 }
  0x57   :  { %5335 = vmatpush1.msk.msra.mxu1 %vm258_vm7, %v6348_v16  ;;  %5272 = vmatprep.subr.msk.mxu0 %vm497_vm8, %v6348_v16  ;;  %vm194_vm7 = vcmp.eq.s32.totalorder %v6611_v35, %v6692_v45  ;;  %vm433_vm8 = vcmp.eq.s32.totalorder %v6892_v60, %v6406_v10 }
  0x58   :  { %5336 = vmatprep.subr.msk.mxu1 %vm243_vm9, %v6348_v16  ;;  %5273 = vmatpush2.msk.msra.mxu0 %vm496_vm10, %v6348_v16  ;;  %vm179_vm9 = vcmp.eq.s32.totalorder %v6629_v37, %v6682_v44  ;;  %vm432_vm10 = vcmp.eq.s32.totalorder %v6892_v60, %v6410_v11 }
  0x59   :  { %5337 = vmatpush1.msk.msra.mxu1 %vm242_vm11, %v6348_v16  ;;  %5274 = vmatprep.subr.msk.mxu0 %vm481_vm12, %v6348_v16  ;;  %vm178_vm11 = vcmp.eq.s32.totalorder %v6629_v37, %v6692_v45  ;;  %vm417_vm12 = vcmp.eq.s32.totalorder %v6907_v61, %v6406_v10  ;;  %v9006_v10 = vsub.s32 4, %v6382_v2 }
  0x5a   :  { %5338 = vmatprep.subr.msk.mxu1 %vm227_vm13, %v6348_v16  ;;  %5275 = vmatpush2.msk.msra.mxu0 %vm480_vm14, %v6348_v16  ;;  %vm163_vm13 = vcmp.eq.s32.totalorder %v6382_v2, %v6682_v44  ;;  %vm416_vm14 = vcmp.eq.s32.totalorder %v6907_v61, %v6410_v11  ;;  %v7140_v11 = vrot.slane %v6396_v7, %v9007_v0 }
  0x5b   :  { %5339 = vmatpush1.msk.msra.mxu1 %vm226_vm15, %v6348_v16  ;;  %5276 = vmatprep.subr.msk.mxu0 %vm465_vm0, %v6348_v16  ;;  %vm162_vm15 = vcmp.eq.s32.totalorder %v6382_v2, %v6692_v45  ;;  %vm659_vm0 = vcmp.eq.s32.totalorder %v6666_v42, %v6682_v44  ;;  %v7151_v43 = vrot.slane %v6396_v7, %v9006_v10  ;;  %v126_v7 = vsub.s32 7, %v6382_v2 }
  0x5c   :  { %5340 = vmatprep.subr.msk.mxu1 %vm211_vm1, %v6348_v16  ;;  %5277 = vmatpush2.msk.msra.mxu0 %vm464_vm2, %v6348_v16  ;;  %vm915_vm1 = vcmp.eq.s32.totalorder %v6394_v6, %v6682_v44  ;;  %vm658_vm2 = vcmp.eq.s32.totalorder %v6666_v42, %v6692_v45 }
  0x5d   :  { %5341 = vmatpush1.msk.msra.mxu1 %vm210_vm3, %v6348_v16  ;;  %5278 = vmatprep.subr.msk.mxu0 %vm449_vm4, %v6348_v16  ;;  %vm914_vm3 = vcmp.eq.s32.totalorder %v6394_v6, %v6692_v45  ;;  %vm643_vm4 = vcmp.eq.s32.totalorder %v6695_v46, %v6682_v44 }
  0x5e   :  { %5342 = vmatprep.subr.msk.mxu1 %vm195_vm5, %v6348_v16  ;;  %5279 = vmatpush2.msk.msra.mxu0 %vm448_vm6, %v6348_v16  ;;  %vm899_vm5 = vcmp.eq.s32.totalorder %v6402_v9, %v6682_v44  ;;  %vm642_vm6 = vcmp.eq.s32.totalorder %v6695_v46, %v6692_v45 }
  0x5f   :  { %5343 = vmatpush1.msk.msra.mxu1 %vm194_vm7, %v6348_v16  ;;  %5280 = vmatprep.subr.msk.mxu0 %vm433_vm8, %v6348_v16  ;;  %vm898_vm7 = vcmp.eq.s32.totalorder %v6402_v9, %v6692_v45  ;;  %vm627_vm8 = vcmp.eq.s32.totalorder %v6712_v48, %v6682_v44 }
  0x60   :  { %5344 = vmatprep.subr.msk.mxu1 %vm179_vm9, %v6348_v16  ;;  %5281 = vmatpush2.msk.msra.mxu0 %vm432_vm10, %v6348_v16  ;;  %vm883_vm9 = vcmp.eq.s32.totalorder %v6416_v13, %v6682_v44  ;;  %vm626_vm10 = vcmp.eq.s32.totalorder %v6712_v48, %v6692_v45 }
  0x61   :  { %5345 = vmatpush1.msk.msra.mxu1 %vm178_vm11, %v6348_v16  ;;  %5282 = vmatprep.subr.msk.mxu0 %vm417_vm12, %v6348_v16  ;;  %vm882_vm11 = vcmp.eq.s32.totalorder %v6416_v13, %v6692_v45  ;;  %vm611_vm12 = vcmp.eq.s32.totalorder %v6727_v49, %v6682_v44 }
  0x62   :  { %5346 = vmatprep.subr.msk.mxu1 %vm163_vm13, %v6348_v16  ;;  %5283 = vmatpush2.msk.msra.mxu0 %vm416_vm14, %v6348_v16  ;;  %vm867_vm13 = vcmp.eq.s32.totalorder %v6422_v15, %v6682_v44  ;;  %vm610_vm14 = vcmp.eq.s32.totalorder %v6727_v49, %v6692_v45 }
  0x63   :  { %2545 = vmatprep.mubr.f32.mxu0 %v6941_v62  ;;  %5347 = vmatpush1.msk.msra.mxu1 %vm162_vm15, %v6348_v16  ;;  %vm866_vm15 = vcmp.eq.s32.totalorder %v6422_v15, %v6692_v45 }
  0x64   :  { %2546 = vmatmul.mubr.f32.vlgmr.msra.gmra.mxu0 %v6949_v63  ;;  %5348 = vmatprep.subr.msk.mxu1 %vm659_vm0, %v6348_v16  ;;  %vm595_vm0 = vcmp.eq.s32.totalorder %v6742_v50, %v6682_v44 }
  0x65   :  { %5380 = vmatprep.subr.msk.mxu0 %vm915_vm1, %v6348_v16  ;;  %5349 = vmatpush2.msk.msra.mxu1 %vm658_vm2, %v6348_v16  ;;  %vm851_vm1 = vcmp.eq.s32.totalorder %v6452_v18, %v6682_v44  ;;  %vm594_vm2 = vcmp.eq.s32.totalorder %v6742_v50, %v6692_v45 }
  0x66   :  { %5381 = vmatpush1.msk.msra.mxu0 %vm914_vm3, %v6348_v16  ;;  %5350 = vmatprep.subr.msk.mxu1 %vm643_vm4, %v6348_v16  ;;  %vm850_vm3 = vcmp.eq.s32.totalorder %v6452_v18, %v6692_v45  ;;  %vm579_vm4 = vcmp.eq.s32.totalorder %v6757_v51, %v6682_v44 }
  0x67   :  { %5382 = vmatprep.subr.msk.mxu0 %vm899_vm5, %v6348_v16  ;;  %5351 = vmatpush2.msk.msra.mxu1 %vm642_vm6, %v6348_v16  ;;  %vm835_vm5 = vcmp.eq.s32.totalorder %v6470_v20, %v6682_v44  ;;  %vm578_vm6 = vcmp.eq.s32.totalorder %v6757_v51, %v6692_v45 }
  0x68   :  { %5383 = vmatpush1.msk.msra.mxu0 %vm898_vm7, %v6348_v16  ;;  %5352 = vmatprep.subr.msk.mxu1 %vm627_vm8, %v6348_v16  ;;  %vm834_vm7 = vcmp.eq.s32.totalorder %v6470_v20, %v6692_v45  ;;  %vm563_vm8 = vcmp.eq.s32.totalorder %v6772_v52, %v6682_v44 }
  0x69   :  { %5384 = vmatprep.subr.msk.mxu0 %vm883_vm9, %v6348_v16  ;;  %5353 = vmatpush2.msk.msra.mxu1 %vm626_vm10, %v6348_v16  ;;  %vm819_vm9 = vcmp.eq.s32.totalorder %v6488_v22, %v6682_v44  ;;  %vm562_vm10 = vcmp.eq.s32.totalorder %v6772_v52, %v6692_v45 }
  0x6a   :  { %5385 = vmatpush1.msk.msra.mxu0 %vm882_vm11, %v6348_v16  ;;  %5354 = vmatprep.subr.msk.mxu1 %vm611_vm12, %v6348_v16  ;;  %vm818_vm11 = vcmp.eq.s32.totalorder %v6488_v22, %v6692_v45  ;;  %vm547_vm12 = vcmp.eq.s32.totalorder %v6787_v53, %v6682_v44 }
  0x6b   :  { %5386 = vmatprep.subr.msk.mxu0 %vm867_vm13, %v6348_v16  ;;  %5355 = vmatpush2.msk.msra.mxu1 %vm610_vm14, %v6348_v16  ;;  %vm803_vm13 = vcmp.eq.s32.totalorder %v6506_v24, %v6682_v44  ;;  %vm546_vm14 = vcmp.eq.s32.totalorder %v6787_v53, %v6692_v45 }
  0x6c   :  { %5387 = vmatpush1.msk.msra.mxu0 %vm866_vm15, %v6348_v16  ;;  %5356 = vmatprep.subr.msk.mxu1 %vm595_vm0, %v6348_v16  ;;  %vm802_vm15 = vcmp.eq.s32.totalorder %v6506_v24, %v6692_v45  ;;  %vm531_vm0 = vcmp.eq.s32.totalorder %v6802_v54, %v6682_v44 }
  0x6d   :  { %5388 = vmatprep.subr.msk.mxu0 %vm851_vm1, %v6348_v16  ;;  %5357 = vmatpush2.msk.msra.mxu1 %vm594_vm2, %v6348_v16  ;;  %vm787_vm1 = vcmp.eq.s32.totalorder %v6524_v26, %v6682_v44  ;;  %vm530_vm2 = vcmp.eq.s32.totalorder %v6802_v54, %v6692_v45 }
  0x6e   :  { %5389 = vmatpush1.msk.msra.mxu0 %vm850_vm3, %v6348_v16  ;;  %5358 = vmatprep.subr.msk.mxu1 %vm579_vm4, %v6348_v16  ;;  %vm786_vm3 = vcmp.eq.s32.totalorder %v6524_v26, %v6692_v45  ;;  %vm515_vm4 = vcmp.eq.s32.totalorder %v6817_v55, %v6682_v44 }
  0x6f   :  { %5390 = vmatprep.subr.msk.mxu0 %vm835_vm5, %v6348_v16  ;;  %5359 = vmatpush2.msk.msra.mxu1 %vm578_vm6, %v6348_v16  ;;  %vm771_vm5 = vcmp.eq.s32.totalorder %v6542_v28, %v6682_v44  ;;  %vm514_vm6 = vcmp.eq.s32.totalorder %v6817_v55, %v6692_v45 }
  0x70   :  { %5391 = vmatpush1.msk.msra.mxu0 %vm834_vm7, %v6348_v16  ;;  %5360 = vmatprep.subr.msk.mxu1 %vm563_vm8, %v6348_v16  ;;  %vm770_vm7 = vcmp.eq.s32.totalorder %v6542_v28, %v6692_v45  ;;  %vm499_vm8 = vcmp.eq.s32.totalorder %v6832_v56, %v6682_v44 }
  0x71   :  { %5392 = vmatprep.subr.msk.mxu0 %vm819_vm9, %v6348_v16  ;;  %5361 = vmatpush2.msk.msra.mxu1 %vm562_vm10, %v6348_v16  ;;  %vm755_vm9 = vcmp.eq.s32.totalorder %v6560_v30, %v6682_v44  ;;  %vm498_vm10 = vcmp.eq.s32.totalorder %v6832_v56, %v6692_v45 }
  0x72   :  { %5393 = vmatpush1.msk.msra.mxu0 %vm818_vm11, %v6348_v16  ;;  %5362 = vmatprep.subr.msk.mxu1 %vm547_vm12, %v6348_v16  ;;  %vm754_vm11 = vcmp.eq.s32.totalorder %v6560_v30, %v6692_v45  ;;  %vm483_vm12 = vcmp.eq.s32.totalorder %v6847_v57, %v6682_v44 }
  0x73   :  { %5394 = vmatprep.subr.msk.mxu0 %vm803_vm13, %v6348_v16  ;;  %5363 = vmatpush2.msk.msra.mxu1 %vm546_vm14, %v6348_v16  ;;  %vm739_vm13 = vcmp.eq.s32.totalorder %v6578_v32, %v6682_v44  ;;  %vm482_vm14 = vcmp.eq.s32.totalorder %v6847_v57, %v6692_v45 }
  0x74   :  { %5395 = vmatpush1.msk.msra.mxu0 %vm802_vm15, %v6348_v16  ;;  %5364 = vmatprep.subr.msk.mxu1 %vm531_vm0, %v6348_v16  ;;  %vm738_vm15 = vcmp.eq.s32.totalorder %v6578_v32, %v6692_v45  ;;  %vm467_vm0 = vcmp.eq.s32.totalorder %v6862_v58, %v6682_v44 }
  0x75   :  { %5396 = vmatprep.subr.msk.mxu0 %vm787_vm1, %v6348_v16  ;;  %5365 = vmatpush2.msk.msra.mxu1 %vm530_vm2, %v6348_v16  ;;  %vm723_vm1 = vcmp.eq.s32.totalorder %v6596_v34, %v6682_v44  ;;  %vm466_vm2 = vcmp.eq.s32.totalorder %v6862_v58, %v6692_v45 }
  0x76   :  { %5397 = vmatpush1.msk.msra.mxu0 %vm786_vm3, %v6348_v16  ;;  %5366 = vmatprep.subr.msk.mxu1 %vm515_vm4, %v6348_v16  ;;  %vm722_vm3 = vcmp.eq.s32.totalorder %v6596_v34, %v6692_v45  ;;  %vm451_vm4 = vcmp.eq.s32.totalorder %v6877_v59, %v6682_v44 }
  0x77   :  { %5398 = vmatprep.subr.msk.mxu0 %vm771_vm5, %v6348_v16  ;;  %5367 = vmatpush2.msk.msra.mxu1 %vm514_vm6, %v6348_v16  ;;  %vm707_vm5 = vcmp.eq.s32.totalorder %v6614_v36, %v6682_v44  ;;  %vm450_vm6 = vcmp.eq.s32.totalorder %v6877_v59, %v6692_v45 }
  0x78   :  { %5399 = vmatpush1.msk.msra.mxu0 %vm770_vm7, %v6348_v16  ;;  %5368 = vmatprep.subr.msk.mxu1 %vm499_vm8, %v6348_v16  ;;  %vm706_vm7 = vcmp.eq.s32.totalorder %v6614_v36, %v6692_v45  ;;  %vm435_vm8 = vcmp.eq.s32.totalorder %v6892_v60, %v6682_v44 }
  0x79   :  { %5400 = vmatprep.subr.msk.mxu0 %vm755_vm9, %v6348_v16  ;;  %5369 = vmatpush2.msk.msra.mxu1 %vm498_vm10, %v6348_v16  ;;  %vm691_vm9 = vcmp.eq.s32.totalorder %v6632_v38, %v6682_v44  ;;  %vm434_vm10 = vcmp.eq.s32.totalorder %v6892_v60, %v6692_v45 }
  0x7a   :  { %5401 = vmatpush1.msk.msra.mxu0 %vm754_vm11, %v6348_v16  ;;  %5370 = vmatprep.subr.msk.mxu1 %vm483_vm12, %v6348_v16  ;;  %vm690_vm11 = vcmp.eq.s32.totalorder %v6632_v38, %v6692_v45  ;;  %vm419_vm12 = vcmp.eq.s32.totalorder %v6907_v61, %v6682_v44 }
  0x7b   :  { %5402 = vmatprep.subr.msk.mxu0 %vm739_vm13, %v6348_v16  ;;  %5371 = vmatpush2.msk.msra.mxu1 %vm482_vm14, %v6348_v16  ;;  %vm675_vm13 = vcmp.eq.s32.totalorder %v6648_v40, %v6682_v44  ;;  %vm418_vm14 = vcmp.eq.s32.totalorder %v6907_v61, %v6692_v45  ;;  %v122_v44 = vsub.s32 6, %v6382_v2 }
  0x7c   :  { %5403 = vmatpush1.msk.msra.mxu0 %vm738_vm15, %v6348_v16  ;;  %5372 = vmatprep.subr.msk.mxu1 %vm467_vm0, %v6348_v16  ;;  %vm674_vm15 = vcmp.eq.s32.totalorder %v6648_v40, %v6692_v45  ;;  %vm405_vm0 = vcmp.eq.s32.totalorder %v6391_v5, %v7140_v11  ;;  %v6275_v45 = vld [vmem:[#allocation3] sm:$0xff] }
  0x7d   :  { %5404 = vmatprep.subr.msk.mxu0 %vm723_vm1, %v6348_v16  ;;  %5373 = vmatpush2.msk.msra.mxu1 %vm466_vm2, %v6348_v16  ;;  %vm917_vm1 = vcmp.eq.s32.totalorder %v6394_v6, %v7140_v11  ;;  %vm404_vm2 = vcmp.eq.s32.totalorder %v6391_v5, %v7151_v43  ;;  %v7347_v10 = vrot.slane %v6275_v45, %v126_v7 }
  0x7e   :  { %5405 = vmatpush1.msk.msra.mxu0 %vm722_vm3, %v6348_v16  ;;  %5374 = vmatprep.subr.msk.mxu1 %vm451_vm4, %v6348_v16  ;;  %vm916_vm3 = vcmp.eq.s32.totalorder %v6394_v6, %v7151_v43  ;;  %vm389_vm4 = vcmp.eq.s32.totalorder %v6399_v8, %v7140_v11  ;;  %v7357_v0 = vrot.slane %v6275_v45, %v122_v44 }
  0x7f   :  { %5406 = vmatprep.subr.msk.mxu0 %vm707_vm5, %v6348_v16  ;;  %5375 = vmatpush2.msk.msra.mxu1 %vm450_vm6, %v6348_v16  ;;  %vm901_vm5 = vcmp.eq.s32.totalorder %v6402_v9, %v7140_v11  ;;  %vm388_vm6 = vcmp.eq.s32.totalorder %v6399_v8, %v7151_v43 }
  0x80   :  { %5407 = vmatpush1.msk.msra.mxu0 %vm706_vm7, %v6348_v16  ;;  %5376 = vmatprep.subr.msk.mxu1 %vm435_vm8, %v6348_v16  ;;  %vm900_vm7 = vcmp.eq.s32.totalorder %v6402_v9, %v7151_v43  ;;  %vm373_vm8 = vcmp.eq.s32.totalorder %v6413_v12, %v7140_v11 }
  0x81   :  { %5408 = vmatprep.subr.msk.mxu0 %vm691_vm9, %v6348_v16  ;;  %5377 = vmatpush2.msk.msra.mxu1 %vm434_vm10, %v6348_v16  ;;  %vm885_vm9 = vcmp.eq.s32.totalorder %v6416_v13, %v7140_v11  ;;  %vm372_vm10 = vcmp.eq.s32.totalorder %v6413_v12, %v7151_v43 }
  0x82   :  { %5409 = vmatpush1.msk.msra.mxu0 %vm690_vm11, %v6348_v16  ;;  %5378 = vmatprep.subr.msk.mxu1 %vm419_vm12, %v6348_v16  ;;  %vm884_vm11 = vcmp.eq.s32.totalorder %v6416_v13, %v7151_v43  ;;  %vm357_vm12 = vcmp.eq.s32.totalorder %v6419_v14, %v7140_v11 }
  0x83   :  { %5410 = vmatprep.subr.msk.mxu0 %vm675_vm13, %v6348_v16  ;;  %5379 = vmatpush2.msk.msra.mxu1 %vm418_vm14, %v6348_v16  ;;  %vm869_vm13 = vcmp.eq.s32.totalorder %v6422_v15, %v7140_v11  ;;  %vm356_vm14 = vcmp.eq.s32.totalorder %v6419_v14, %v7151_v43 }
  0x84   :  { %2687 = vmatprep.mubr.f32.mxu1 %v6941_v62  ;;  %5411 = vmatpush1.msk.msra.mxu0 %vm674_vm15, %v6348_v16  ;;  %vm868_vm15 = vcmp.eq.s32.totalorder %v6422_v15, %v7151_v43 }
  0x85   :  { %2758 = vmatprep.mubr.f32.mxu0 %v6347_v1  ;;  %2688 = vmatmul.mubr.f32.vlgmr.msra.gmra.mxu1 %v6949_v63 }
  0x86   :  { %2759 = vmatmul.mubr.f32.vlgmr.msra.gmra.mxu0 %v6705_v47  ;;  %5412 = vmatprep.subr.msk.mxu0 %vm405_vm0, %v6348_v16  ;;  %vm341_vm0 = vcmp.eq.s32.totalorder %v6441_v17, %v7140_v11 }
  0x87   :  { %5476 = vmatprep.subr.msk.mxu1 %vm917_vm1, %v6348_v16  ;;  %5413 = vmatpush1.msk.msra.mxu0 %vm404_vm2, %v6348_v16  ;;  %vm853_vm1 = vcmp.eq.s32.totalorder %v6452_v18, %v7140_v11  ;;  %vm340_vm2 = vcmp.eq.s32.totalorder %v6441_v17, %v7151_v43 }
  0x88   :  { %5477 = vmatpush1.msk.msra.mxu1 %vm916_vm3, %v6348_v16  ;;  %5414 = vmatprep.subr.msk.mxu0 %vm389_vm4, %v6348_v16  ;;  %vm852_vm3 = vcmp.eq.s32.totalorder %v6452_v18, %v7151_v43  ;;  %vm325_vm4 = vcmp.eq.s32.totalorder %v6467_v19, %v7140_v11 }
  0x89   :  { %5478 = vmatprep.subr.msk.mxu1 %vm901_vm5, %v6348_v16  ;;  %5415 = vmatpush1.msk.msra.mxu0 %vm388_vm6, %v6348_v16  ;;  %vm837_vm5 = vcmp.eq.s32.totalorder %v6470_v20, %v7140_v11  ;;  %vm324_vm6 = vcmp.eq.s32.totalorder %v6467_v19, %v7151_v43 }
  0x8a   :  { %5479 = vmatpush1.msk.msra.mxu1 %vm900_vm7, %v6348_v16  ;;  %5416 = vmatprep.subr.msk.mxu0 %vm373_vm8, %v6348_v16  ;;  %vm836_vm7 = vcmp.eq.s32.totalorder %v6470_v20, %v7151_v43  ;;  %vm309_vm8 = vcmp.eq.s32.totalorder %v6485_v21, %v7140_v11 }
  0x8b   :  { %5480 = vmatprep.subr.msk.mxu1 %vm885_vm9, %v6348_v16  ;;  %5417 = vmatpush1.msk.msra.mxu0 %vm372_vm10, %v6348_v16  ;;  %vm821_vm9 = vcmp.eq.s32.totalorder %v6488_v22, %v7140_v11  ;;  %vm308_vm10 = vcmp.eq.s32.totalorder %v6485_v21, %v7151_v43 }
  0x8c   :  { %5481 = vmatpush1.msk.msra.mxu1 %vm884_vm11, %v6348_v16  ;;  %5418 = vmatprep.subr.msk.mxu0 %vm357_vm12, %v6348_v16  ;;  %vm820_vm11 = vcmp.eq.s32.totalorder %v6488_v22, %v7151_v43  ;;  %vm293_vm12 = vcmp.eq.s32.totalorder %v6503_v23, %v7140_v11 }
  0x8d   :  { %5482 = vmatprep.subr.msk.mxu1 %vm869_vm13, %v6348_v16  ;;  %5419 = vmatpush1.msk.msra.mxu0 %vm356_vm14, %v6348_v16  ;;  %vm805_vm13 = vcmp.eq.s32.totalorder %v6506_v24, %v7140_v11  ;;  %vm292_vm14 = vcmp.eq.s32.totalorder %v6503_v23, %v7151_v43 }
  0x8e   :  { %5483 = vmatpush1.msk.msra.mxu1 %vm868_vm15, %v6348_v16  ;;  %5420 = vmatprep.subr.msk.mxu0 %vm341_vm0, %v6348_v16  ;;  %vm804_vm15 = vcmp.eq.s32.totalorder %v6506_v24, %v7151_v43  ;;  %vm277_vm0 = vcmp.eq.s32.totalorder %v6521_v25, %v7140_v11 }
  0x8f   :  { %5484 = vmatprep.subr.msk.mxu1 %vm853_vm1, %v6348_v16  ;;  %5421 = vmatpush1.msk.msra.mxu0 %vm340_vm2, %v6348_v16  ;;  %vm789_vm1 = vcmp.eq.s32.totalorder %v6524_v26, %v7140_v11  ;;  %vm276_vm2 = vcmp.eq.s32.totalorder %v6521_v25, %v7151_v43 }
  0x90   :  { %5485 = vmatpush1.msk.msra.mxu1 %vm852_vm3, %v6348_v16  ;;  %5422 = vmatprep.subr.msk.mxu0 %vm325_vm4, %v6348_v16  ;;  %vm788_vm3 = vcmp.eq.s32.totalorder %v6524_v26, %v7151_v43  ;;  %vm261_vm4 = vcmp.eq.s32.totalorder %v6539_v27, %v7140_v11 }
  0x91   :  { %5486 = vmatprep.subr.msk.mxu1 %vm837_vm5, %v6348_v16  ;;  %5423 = vmatpush1.msk.msra.mxu0 %vm324_vm6, %v6348_v16  ;;  %vm773_vm5 = vcmp.eq.s32.totalorder %v6542_v28, %v7140_v11  ;;  %vm260_vm6 = vcmp.eq.s32.totalorder %v6539_v27, %v7151_v43 }
  0x92   :  { %5487 = vmatpush1.msk.msra.mxu1 %vm836_vm7, %v6348_v16  ;;  %5424 = vmatprep.subr.msk.mxu0 %vm309_vm8, %v6348_v16  ;;  %vm772_vm7 = vcmp.eq.s32.totalorder %v6542_v28, %v7151_v43  ;;  %vm245_vm8 = vcmp.eq.s32.totalorder %v6557_v29, %v7140_v11 }
  0x93   :  { %5488 = vmatprep.subr.msk.mxu1 %vm821_vm9, %v6348_v16  ;;  %5425 = vmatpush1.msk.msra.mxu0 %vm308_vm10, %v6348_v16  ;;  %vm757_vm9 = vcmp.eq.s32.totalorder %v6560_v30, %v7140_v11  ;;  %vm244_vm10 = vcmp.eq.s32.totalorder %v6557_v29, %v7151_v43 }
  0x94   :  { %5489 = vmatpush1.msk.msra.mxu1 %vm820_vm11, %v6348_v16  ;;  %5426 = vmatprep.subr.msk.mxu0 %vm293_vm12, %v6348_v16  ;;  %vm756_vm11 = vcmp.eq.s32.totalorder %v6560_v30, %v7151_v43  ;;  %vm229_vm12 = vcmp.eq.s32.totalorder %v6575_v31, %v7140_v11 }
  0x95   :  { %5490 = vmatprep.subr.msk.mxu1 %vm805_vm13, %v6348_v16  ;;  %5427 = vmatpush1.msk.msra.mxu0 %vm292_vm14, %v6348_v16  ;;  %vm741_vm13 = vcmp.eq.s32.totalorder %v6578_v32, %v7140_v11  ;;  %vm228_vm14 = vcmp.eq.s32.totalorder %v6575_v31, %v7151_v43 }
  0x96   :  { %5491 = vmatpush1.msk.msra.mxu1 %vm804_vm15, %v6348_v16  ;;  %5428 = vmatprep.subr.msk.mxu0 %vm277_vm0, %v6348_v16  ;;  %vm740_vm15 = vcmp.eq.s32.totalorder %v6578_v32, %v7151_v43  ;;  %vm213_vm0 = vcmp.eq.s32.totalorder %v6593_v33, %v7140_v11 }
  0x97   :  { %5492 = vmatprep.subr.msk.mxu1 %vm789_vm1, %v6348_v16  ;;  %5429 = vmatpush1.msk.msra.mxu0 %vm276_vm2, %v6348_v16  ;;  %vm725_vm1 = vcmp.eq.s32.totalorder %v6596_v34, %v7140_v11  ;;  %vm212_vm2 = vcmp.eq.s32.totalorder %v6593_v33, %v7151_v43 }
  0x98   :  { %5493 = vmatpush1.msk.msra.mxu1 %vm788_vm3, %v6348_v16  ;;  %5430 = vmatprep.subr.msk.mxu0 %vm261_vm4, %v6348_v16  ;;  %vm724_vm3 = vcmp.eq.s32.totalorder %v6596_v34, %v7151_v43  ;;  %vm197_vm4 = vcmp.eq.s32.totalorder %v6611_v35, %v7140_v11 }
  0x99   :  { %5494 = vmatprep.subr.msk.mxu1 %vm773_vm5, %v6348_v16  ;;  %5431 = vmatpush1.msk.msra.mxu0 %vm260_vm6, %v6348_v16  ;;  %vm709_vm5 = vcmp.eq.s32.totalorder %v6614_v36, %v7140_v11  ;;  %vm196_vm6 = vcmp.eq.s32.totalorder %v6611_v35, %v7151_v43 }
  0x9a   :  { %5495 = vmatpush1.msk.msra.mxu1 %vm772_vm7, %v6348_v16  ;;  %5432 = vmatprep.subr.msk.mxu0 %vm245_vm8, %v6348_v16  ;;  %vm708_vm7 = vcmp.eq.s32.totalorder %v6614_v36, %v7151_v43  ;;  %vm181_vm8 = vcmp.eq.s32.totalorder %v6629_v37, %v7140_v11 }
  0x9b   :  { %5496 = vmatprep.subr.msk.mxu1 %vm757_vm9, %v6348_v16  ;;  %5433 = vmatpush1.msk.msra.mxu0 %vm244_vm10, %v6348_v16  ;;  %vm693_vm9 = vcmp.eq.s32.totalorder %v6632_v38, %v7140_v11  ;;  %vm180_vm10 = vcmp.eq.s32.totalorder %v6629_v37, %v7151_v43 }
  0x9c   :  { %5497 = vmatpush1.msk.msra.mxu1 %vm756_vm11, %v6348_v16  ;;  %5434 = vmatprep.subr.msk.mxu0 %vm229_vm12, %v6348_v16  ;;  %vm692_vm11 = vcmp.eq.s32.totalorder %v6632_v38, %v7151_v43  ;;  %vm165_vm12 = vcmp.eq.s32.totalorder %v6382_v2, %v7140_v11 }
  0x9d   :  { %5498 = vmatprep.subr.msk.mxu1 %vm741_vm13, %v6348_v16  ;;  %5435 = vmatpush1.msk.msra.mxu0 %vm228_vm14, %v6348_v16  ;;  %vm677_vm13 = vcmp.eq.s32.totalorder %v6648_v40, %v7140_v11  ;;  %vm164_vm14 = vcmp.eq.s32.totalorder %v6382_v2, %v7151_v43 }
  0x9e   :  { %5499 = vmatpush1.msk.msra.mxu1 %vm740_vm15, %v6348_v16  ;;  %5436 = vmatprep.subr.msk.mxu0 %vm213_vm0, %v6348_v16  ;;  %vm676_vm15 = vcmp.eq.s32.totalorder %v6648_v40, %v7151_v43  ;;  %vm661_vm0 = vcmp.eq.s32.totalorder %v6666_v42, %v7140_v11 }
  0x9f   :  { %5500 = vmatprep.subr.msk.mxu1 %vm725_vm1, %v6348_v16  ;;  %5437 = vmatpush1.msk.msra.mxu0 %vm212_vm2, %v6348_v16  ;;  %vm407_vm1 = vcmp.eq.s32.totalorder %v6391_v5, %v7347_v10  ;;  %vm660_vm2 = vcmp.eq.s32.totalorder %v6666_v42, %v7151_v43 }
  0xa0   :  { %5501 = vmatpush1.msk.msra.mxu1 %vm724_vm3, %v6348_v16  ;;  %5438 = vmatprep.subr.msk.mxu0 %vm197_vm4, %v6348_v16  ;;  %vm406_vm3 = vcmp.eq.s32.totalorder %v6391_v5, %v7357_v0  ;;  %vm645_vm4 = vcmp.eq.s32.totalorder %v6695_v46, %v7140_v11 }
  0xa1   :  { %5502 = vmatprep.subr.msk.mxu1 %vm709_vm5, %v6348_v16  ;;  %5439 = vmatpush1.msk.msra.mxu0 %vm196_vm6, %v6348_v16  ;;  %vm391_vm5 = vcmp.eq.s32.totalorder %v6399_v8, %v7347_v10  ;;  %vm644_vm6 = vcmp.eq.s32.totalorder %v6695_v46, %v7151_v43 }
  0xa2   :  { %5503 = vmatpush1.msk.msra.mxu1 %vm708_vm7, %v6348_v16  ;;  %5440 = vmatprep.subr.msk.mxu0 %vm181_vm8, %v6348_v16  ;;  %vm390_vm7 = vcmp.eq.s32.totalorder %v6399_v8, %v7357_v0  ;;  %vm629_vm8 = vcmp.eq.s32.totalorder %v6712_v48, %v7140_v11 }
  0xa3   :  { %5504 = vmatprep.subr.msk.mxu1 %vm693_vm9, %v6348_v16  ;;  %5441 = vmatpush1.msk.msra.mxu0 %vm180_vm10, %v6348_v16  ;;  %vm375_vm9 = vcmp.eq.s32.totalorder %v6413_v12, %v7347_v10  ;;  %vm628_vm10 = vcmp.eq.s32.totalorder %v6712_v48, %v7151_v43 }
  0xa4   :  { %5505 = vmatpush1.msk.msra.mxu1 %vm692_vm11, %v6348_v16  ;;  %5442 = vmatprep.subr.msk.mxu0 %vm165_vm12, %v6348_v16  ;;  %vm374_vm11 = vcmp.eq.s32.totalorder %v6413_v12, %v7357_v0  ;;  %vm613_vm12 = vcmp.eq.s32.totalorder %v6727_v49, %v7140_v11 }
  0xa5   :  { %5506 = vmatprep.subr.msk.mxu1 %vm677_vm13, %v6348_v16  ;;  %5443 = vmatpush1.msk.msra.mxu0 %vm164_vm14, %v6348_v16  ;;  %vm359_vm13 = vcmp.eq.s32.totalorder %v6419_v14, %v7347_v10  ;;  %vm612_vm14 = vcmp.eq.s32.totalorder %v6727_v49, %v7151_v43 }
  0xa6   :  { %5507 = vmatpush1.msk.msra.mxu1 %vm676_vm15, %v6348_v16  ;;  %2900 = vmatprep.mubr.f32.mxu1 %v6347_v1  ;;  %vm358_vm15 = vcmp.eq.s32.totalorder %v6419_v14, %v7357_v0 }
  0xa7   :  { %5444 = vmatprep.subr.msk.mxu0 %vm661_vm0, %v6348_v16  ;;  %2901 = vmatmul.mubr.f32.vlgmr.msra.gmra.mxu1 %v6705_v47  ;;  %vm597_vm0 = vcmp.eq.s32.totalorder %v6742_v50, %v7140_v11 }
  0xa8   :  { %5508 = vmatprep.subr.msk.mxu1 %vm407_vm1, %v6348_v16  ;;  %5445 = vmatpush2.msk.msra.mxu0 %vm660_vm2, %v6348_v16  ;;  %vm343_vm1 = vcmp.eq.s32.totalorder %v6441_v17, %v7347_v10  ;;  %vm596_vm2 = vcmp.eq.s32.totalorder %v6742_v50, %v7151_v43 }
  0xa9   :  { %5509 = vmatpush1.msk.msra.mxu1 %vm406_vm3, %v6348_v16  ;;  %5446 = vmatprep.subr.msk.mxu0 %vm645_vm4, %v6348_v16  ;;  %vm342_vm3 = vcmp.eq.s32.totalorder %v6441_v17, %v7357_v0  ;;  %vm581_vm4 = vcmp.eq.s32.totalorder %v6757_v51, %v7140_v11 }
  0xaa   :  { %5510 = vmatprep.subr.msk.mxu1 %vm391_vm5, %v6348_v16  ;;  %5447 = vmatpush2.msk.msra.mxu0 %vm644_vm6, %v6348_v16  ;;  %vm327_vm5 = vcmp.eq.s32.totalorder %v6467_v19, %v7347_v10  ;;  %vm580_vm6 = vcmp.eq.s32.totalorder %v6757_v51, %v7151_v43 }
  0xab   :  { %5511 = vmatpush1.msk.msra.mxu1 %vm390_vm7, %v6348_v16  ;;  %5448 = vmatprep.subr.msk.mxu0 %vm629_vm8, %v6348_v16  ;;  %vm326_vm7 = vcmp.eq.s32.totalorder %v6467_v19, %v7357_v0  ;;  %vm565_vm8 = vcmp.eq.s32.totalorder %v6772_v52, %v7140_v11 }
  0xac   :  { %5512 = vmatprep.subr.msk.mxu1 %vm375_vm9, %v6348_v16  ;;  %5449 = vmatpush2.msk.msra.mxu0 %vm628_vm10, %v6348_v16  ;;  %vm311_vm9 = vcmp.eq.s32.totalorder %v6485_v21, %v7347_v10  ;;  %vm564_vm10 = vcmp.eq.s32.totalorder %v6772_v52, %v7151_v43 }
  0xad   :  { %5513 = vmatpush1.msk.msra.mxu1 %vm374_vm11, %v6348_v16  ;;  %5450 = vmatprep.subr.msk.mxu0 %vm613_vm12, %v6348_v16  ;;  %vm310_vm11 = vcmp.eq.s32.totalorder %v6485_v21, %v7357_v0  ;;  %vm549_vm12 = vcmp.eq.s32.totalorder %v6787_v53, %v7140_v11 }
  0xae   :  { %5514 = vmatprep.subr.msk.mxu1 %vm359_vm13, %v6348_v16  ;;  %5451 = vmatpush2.msk.msra.mxu0 %vm612_vm14, %v6348_v16  ;;  %vm295_vm13 = vcmp.eq.s32.totalorder %v6503_v23, %v7347_v10  ;;  %vm548_vm14 = vcmp.eq.s32.totalorder %v6787_v53, %v7151_v43 }
  0xaf   :  { %5515 = vmatpush1.msk.msra.mxu1 %vm358_vm15, %v6348_v16  ;;  %5452 = vmatprep.subr.msk.mxu0 %vm597_vm0, %v6348_v16  ;;  %vm294_vm15 = vcmp.eq.s32.totalorder %v6503_v23, %v7357_v0  ;;  %vm533_vm0 = vcmp.eq.s32.totalorder %v6802_v54, %v7140_v11 }
  0xb0   :  { %5516 = vmatprep.subr.msk.mxu1 %vm343_vm1, %v6348_v16  ;;  %5453 = vmatpush2.msk.msra.mxu0 %vm596_vm2, %v6348_v16  ;;  %vm279_vm1 = vcmp.eq.s32.totalorder %v6521_v25, %v7347_v10  ;;  %vm532_vm2 = vcmp.eq.s32.totalorder %v6802_v54, %v7151_v43 }
  0xb1   :  { %5517 = vmatpush1.msk.msra.mxu1 %vm342_vm3, %v6348_v16  ;;  %5454 = vmatprep.subr.msk.mxu0 %vm581_vm4, %v6348_v16  ;;  %vm278_vm3 = vcmp.eq.s32.totalorder %v6521_v25, %v7357_v0  ;;  %vm517_vm4 = vcmp.eq.s32.totalorder %v6817_v55, %v7140_v11 }
  0xb2   :  { %5518 = vmatprep.subr.msk.mxu1 %vm327_vm5, %v6348_v16  ;;  %5455 = vmatpush2.msk.msra.mxu0 %vm580_vm6, %v6348_v16  ;;  %vm263_vm5 = vcmp.eq.s32.totalorder %v6539_v27, %v7347_v10  ;;  %vm516_vm6 = vcmp.eq.s32.totalorder %v6817_v55, %v7151_v43 }
  0xb3   :  { %5519 = vmatpush1.msk.msra.mxu1 %vm326_vm7, %v6348_v16  ;;  %5456 = vmatprep.subr.msk.mxu0 %vm565_vm8, %v6348_v16  ;;  %vm262_vm7 = vcmp.eq.s32.totalorder %v6539_v27, %v7357_v0  ;;  %vm501_vm8 = vcmp.eq.s32.totalorder %v6832_v56, %v7140_v11 }
  0xb4   :  { %5520 = vmatprep.subr.msk.mxu1 %vm311_vm9, %v6348_v16  ;;  %5457 = vmatpush2.msk.msra.mxu0 %vm564_vm10, %v6348_v16  ;;  %vm247_vm9 = vcmp.eq.s32.totalorder %v6557_v29, %v7347_v10  ;;  %vm500_vm10 = vcmp.eq.s32.totalorder %v6832_v56, %v7151_v43 }
  0xb5   :  { %5521 = vmatpush1.msk.msra.mxu1 %vm310_vm11, %v6348_v16  ;;  %5458 = vmatprep.subr.msk.mxu0 %vm549_vm12, %v6348_v16  ;;  %vm246_vm11 = vcmp.eq.s32.totalorder %v6557_v29, %v7357_v0  ;;  %vm485_vm12 = vcmp.eq.s32.totalorder %v6847_v57, %v7140_v11 }
  0xb6   :  { %5522 = vmatprep.subr.msk.mxu1 %vm295_vm13, %v6348_v16  ;;  %5459 = vmatpush2.msk.msra.mxu0 %vm548_vm14, %v6348_v16  ;;  %vm231_vm13 = vcmp.eq.s32.totalorder %v6575_v31, %v7347_v10  ;;  %vm484_vm14 = vcmp.eq.s32.totalorder %v6847_v57, %v7151_v43 }
  0xb7   :  { %5523 = vmatpush1.msk.msra.mxu1 %vm294_vm15, %v6348_v16  ;;  %5460 = vmatprep.subr.msk.mxu0 %vm533_vm0, %v6348_v16  ;;  %vm230_vm15 = vcmp.eq.s32.totalorder %v6575_v31, %v7357_v0  ;;  %vm469_vm0 = vcmp.eq.s32.totalorder %v6862_v58, %v7140_v11 }
  0xb8   :  { %5524 = vmatprep.subr.msk.mxu1 %vm279_vm1, %v6348_v16  ;;  %5461 = vmatpush2.msk.msra.mxu0 %vm532_vm2, %v6348_v16  ;;  %vm215_vm1 = vcmp.eq.s32.totalorder %v6593_v33, %v7347_v10  ;;  %vm468_vm2 = vcmp.eq.s32.totalorder %v6862_v58, %v7151_v43 }
  0xb9   :  { %5525 = vmatpush1.msk.msra.mxu1 %vm278_vm3, %v6348_v16  ;;  %5462 = vmatprep.subr.msk.mxu0 %vm517_vm4, %v6348_v16  ;;  %vm214_vm3 = vcmp.eq.s32.totalorder %v6593_v33, %v7357_v0  ;;  %vm453_vm4 = vcmp.eq.s32.totalorder %v6877_v59, %v7140_v11 }
  0xba   :  { %5526 = vmatprep.subr.msk.mxu1 %vm263_vm5, %v6348_v16  ;;  %5463 = vmatpush2.msk.msra.mxu0 %vm516_vm6, %v6348_v16  ;;  %vm199_vm5 = vcmp.eq.s32.totalorder %v6611_v35, %v7347_v10  ;;  %vm452_vm6 = vcmp.eq.s32.totalorder %v6877_v59, %v7151_v43 }
  0xbb   :  { %5527 = vmatpush1.msk.msra.mxu1 %vm262_vm7, %v6348_v16  ;;  %5464 = vmatprep.subr.msk.mxu0 %vm501_vm8, %v6348_v16  ;;  %vm198_vm7 = vcmp.eq.s32.totalorder %v6611_v35, %v7357_v0  ;;  %vm437_vm8 = vcmp.eq.s32.totalorder %v6892_v60, %v7140_v11 }
  0xbc   :  { %5528 = vmatprep.subr.msk.mxu1 %vm247_vm9, %v6348_v16  ;;  %5465 = vmatpush2.msk.msra.mxu0 %vm500_vm10, %v6348_v16  ;;  %vm183_vm9 = vcmp.eq.s32.totalorder %v6629_v37, %v7347_v10  ;;  %vm436_vm10 = vcmp.eq.s32.totalorder %v6892_v60, %v7151_v43 }
  0xbd   :  { %5529 = vmatpush1.msk.msra.mxu1 %vm246_vm11, %v6348_v16  ;;  %5466 = vmatprep.subr.msk.mxu0 %vm485_vm12, %v6348_v16  ;;  %vm182_vm11 = vcmp.eq.s32.totalorder %v6629_v37, %v7357_v0  ;;  %vm421_vm12 = vcmp.eq.s32.totalorder %v6907_v61, %v7140_v11  ;;  %v7717_v11 = vld [vmem:[#allocation3 + $0x8] sm:$0xff] }
  0xbe   :  { %5530 = vmatprep.subr.msk.mxu1 %vm231_vm13, %v6348_v16  ;;  %5467 = vmatpush2.msk.msra.mxu0 %vm484_vm14, %v6348_v16  ;;  %vm167_vm13 = vcmp.eq.s32.totalorder %v6382_v2, %v7347_v10  ;;  %vm420_vm14 = vcmp.eq.s32.totalorder %v6907_v61, %v7151_v43  ;;  %v7745_v43 = vrot.slane %v7717_v11, %v6385_v3 }
  0xbf   :  { %5531 = vmatpush1.msk.msra.mxu1 %vm230_vm15, %v6348_v16  ;;  %5468 = vmatprep.subr.msk.mxu0 %vm469_vm0, %v6348_v16  ;;  %vm166_vm15 = vcmp.eq.s32.totalorder %v6382_v2, %v7357_v0  ;;  %vm663_vm0 = vcmp.eq.s32.totalorder %v6666_v42, %v7347_v10  ;;  %v7755_v45 = vrot.slane %v7717_v11, %v6388_v4 }
  0xc0   :  { %5532 = vmatprep.subr.msk.mxu1 %vm215_vm1, %v6348_v16  ;;  %5469 = vmatpush2.msk.msra.mxu0 %vm468_vm2, %v6348_v16  ;;  %vm919_vm1 = vcmp.eq.s32.totalorder %v6394_v6, %v7347_v10  ;;  %vm662_vm2 = vcmp.eq.s32.totalorder %v6666_v42, %v7357_v0  ;;  %v7950_v3 = vrot.slane %v7717_v11, %v110_v39  ;;  %v9008_v39 = vsub.s32 5, %v6382_v2 }
  0xc1   :  { %5533 = vmatpush1.msk.msra.mxu1 %vm214_vm3, %v6348_v16  ;;  %5470 = vmatprep.subr.msk.mxu0 %vm453_vm4, %v6348_v16  ;;  %vm918_vm3 = vcmp.eq.s32.totalorder %v6394_v6, %v7357_v0  ;;  %vm647_vm4 = vcmp.eq.s32.totalorder %v6695_v46, %v7347_v10  ;;  %v7954_v4 = vrot.slane %v7717_v11, %v6651_v41 }
  0xc2   :  { %5534 = vmatprep.subr.msk.mxu1 %vm199_vm5, %v6348_v16  ;;  %5471 = vmatpush2.msk.msra.mxu0 %vm452_vm6, %v6348_v16  ;;  %vm903_vm5 = vcmp.eq.s32.totalorder %v6402_v9, %v7347_v10  ;;  %vm646_vm6 = vcmp.eq.s32.totalorder %v6695_v46, %v7357_v0  ;;  %v8347_v41 = vrot.slane %v7717_v11, %v9008_v39 }
  0xc3   :  { %5535 = vmatpush1.msk.msra.mxu1 %vm198_vm7, %v6348_v16  ;;  %5472 = vmatprep.subr.msk.mxu0 %vm437_vm8, %v6348_v16  ;;  %vm902_vm7 = vcmp.eq.s32.totalorder %v6402_v9, %v7357_v0  ;;  %vm631_vm8 = vcmp.eq.s32.totalorder %v6712_v48, %v7347_v10 }
  0xc4   :  { %5536 = vmatprep.subr.msk.mxu1 %vm183_vm9, %v6348_v16  ;;  %5473 = vmatpush2.msk.msra.mxu0 %vm436_vm10, %v6348_v16  ;;  %vm887_vm9 = vcmp.eq.s32.totalorder %v6416_v13, %v7347_v10  ;;  %vm630_vm10 = vcmp.eq.s32.totalorder %v6712_v48, %v7357_v0 }
  0xc5   :  { %5537 = vmatpush1.msk.msra.mxu1 %vm182_vm11, %v6348_v16  ;;  %5474 = vmatprep.subr.msk.mxu0 %vm421_vm12, %v6348_v16  ;;  %vm886_vm11 = vcmp.eq.s32.totalorder %v6416_v13, %v7357_v0  ;;  %vm615_vm12 = vcmp.eq.s32.totalorder %v6727_v49, %v7347_v10 }
  0xc6   :  { %5538 = vmatprep.subr.msk.mxu1 %vm167_vm13, %v6348_v16  ;;  %5475 = vmatpush2.msk.msra.mxu0 %vm420_vm14, %v6348_v16  ;;  %vm871_vm13 = vcmp.eq.s32.totalorder %v6422_v15, %v7347_v10  ;;  %vm614_vm14 = vcmp.eq.s32.totalorder %v6727_v49, %v7357_v0 }
  0xc7   :  { %2829 = vmatprep.mubr.f32.mxu0 %v6941_v62  ;;  %5539 = vmatpush1.msk.msra.mxu1 %vm166_vm15, %v6348_v16  ;;  %vm870_vm15 = vcmp.eq.s32.totalorder %v6422_v15, %v7357_v0 }
  0xc8   :  { %2830 = vmatmul.mubr.f32.vlgmr.msra.gmra.mxu0 %v6949_v63  ;;  %5540 = vmatprep.subr.msk.mxu1 %vm663_vm0, %v6348_v16  ;;  %vm599_vm0 = vcmp.eq.s32.totalorder %v6742_v50, %v7347_v10 }
  0xc9   :  { %5572 = vmatprep.subr.msk.mxu0 %vm919_vm1, %v6348_v16  ;;  %5541 = vmatpush2.msk.msra.mxu1 %vm662_vm2, %v6348_v16  ;;  %vm855_vm1 = vcmp.eq.s32.totalorder %v6452_v18, %v7347_v10  ;;  %vm598_vm2 = vcmp.eq.s32.totalorder %v6742_v50, %v7357_v0 }
  0xca   :  { %5573 = vmatpush1.msk.msra.mxu0 %vm918_vm3, %v6348_v16  ;;  %5542 = vmatprep.subr.msk.mxu1 %vm647_vm4, %v6348_v16  ;;  %vm854_vm3 = vcmp.eq.s32.totalorder %v6452_v18, %v7357_v0  ;;  %vm583_vm4 = vcmp.eq.s32.totalorder %v6757_v51, %v7347_v10 }
  0xcb   :  { %5574 = vmatprep.subr.msk.mxu0 %vm903_vm5, %v6348_v16  ;;  %5543 = vmatpush2.msk.msra.mxu1 %vm646_vm6, %v6348_v16  ;;  %vm839_vm5 = vcmp.eq.s32.totalorder %v6470_v20, %v7347_v10  ;;  %vm582_vm6 = vcmp.eq.s32.totalorder %v6757_v51, %v7357_v0 }
  0xcc   :  { %5575 = vmatpush1.msk.msra.mxu0 %vm902_vm7, %v6348_v16  ;;  %5544 = vmatprep.subr.msk.mxu1 %vm631_vm8, %v6348_v16  ;;  %vm838_vm7 = vcmp.eq.s32.totalorder %v6470_v20, %v7357_v0  ;;  %vm567_vm8 = vcmp.eq.s32.totalorder %v6772_v52, %v7347_v10 }
  0xcd   :  { %5576 = vmatprep.subr.msk.mxu0 %vm887_vm9, %v6348_v16  ;;  %5545 = vmatpush2.msk.msra.mxu1 %vm630_vm10, %v6348_v16  ;;  %vm823_vm9 = vcmp.eq.s32.totalorder %v6488_v22, %v7347_v10  ;;  %vm566_vm10 = vcmp.eq.s32.totalorder %v6772_v52, %v7357_v0 }
  0xce   :  { %5577 = vmatpush1.msk.msra.mxu0 %vm886_vm11, %v6348_v16  ;;  %5546 = vmatprep.subr.msk.mxu1 %vm615_vm12, %v6348_v16  ;;  %vm822_vm11 = vcmp.eq.s32.totalorder %v6488_v22, %v7357_v0  ;;  %vm551_vm12 = vcmp.eq.s32.totalorder %v6787_v53, %v7347_v10 }
  0xcf   :  { %5578 = vmatprep.subr.msk.mxu0 %vm871_vm13, %v6348_v16  ;;  %5547 = vmatpush2.msk.msra.mxu1 %vm614_vm14, %v6348_v16  ;;  %vm807_vm13 = vcmp.eq.s32.totalorder %v6506_v24, %v7347_v10  ;;  %vm550_vm14 = vcmp.eq.s32.totalorder %v6787_v53, %v7357_v0 }
  0xd0   :  { %5579 = vmatpush1.msk.msra.mxu0 %vm870_vm15, %v6348_v16  ;;  %5548 = vmatprep.subr.msk.mxu1 %vm599_vm0, %v6348_v16  ;;  %vm806_vm15 = vcmp.eq.s32.totalorder %v6506_v24, %v7357_v0  ;;  %vm535_vm0 = vcmp.eq.s32.totalorder %v6802_v54, %v7347_v10 }
  0xd1   :  { %5580 = vmatprep.subr.msk.mxu0 %vm855_vm1, %v6348_v16  ;;  %5549 = vmatpush2.msk.msra.mxu1 %vm598_vm2, %v6348_v16  ;;  %vm791_vm1 = vcmp.eq.s32.totalorder %v6524_v26, %v7347_v10  ;;  %vm534_vm2 = vcmp.eq.s32.totalorder %v6802_v54, %v7357_v0 }
  0xd2   :  { %5581 = vmatpush1.msk.msra.mxu0 %vm854_vm3, %v6348_v16  ;;  %5550 = vmatprep.subr.msk.mxu1 %vm583_vm4, %v6348_v16  ;;  %vm790_vm3 = vcmp.eq.s32.totalorder %v6524_v26, %v7357_v0  ;;  %vm519_vm4 = vcmp.eq.s32.totalorder %v6817_v55, %v7347_v10 }
  0xd3   :  { %5582 = vmatprep.subr.msk.mxu0 %vm839_vm5, %v6348_v16  ;;  %5551 = vmatpush2.msk.msra.mxu1 %vm582_vm6, %v6348_v16  ;;  %vm775_vm5 = vcmp.eq.s32.totalorder %v6542_v28, %v7347_v10  ;;  %vm518_vm6 = vcmp.eq.s32.totalorder %v6817_v55, %v7357_v0 }
  0xd4   :  { %5583 = vmatpush1.msk.msra.mxu0 %vm838_vm7, %v6348_v16  ;;  %5552 = vmatprep.subr.msk.mxu1 %vm567_vm8, %v6348_v16  ;;  %vm774_vm7 = vcmp.eq.s32.totalorder %v6542_v28, %v7357_v0  ;;  %vm503_vm8 = vcmp.eq.s32.totalorder %v6832_v56, %v7347_v10 }
  0xd5   :  { %5584 = vmatprep.subr.msk.mxu0 %vm823_vm9, %v6348_v16  ;;  %5553 = vmatpush2.msk.msra.mxu1 %vm566_vm10, %v6348_v16  ;;  %vm759_vm9 = vcmp.eq.s32.totalorder %v6560_v30, %v7347_v10  ;;  %vm502_vm10 = vcmp.eq.s32.totalorder %v6832_v56, %v7357_v0 }
  0xd6   :  { %5585 = vmatpush1.msk.msra.mxu0 %vm822_vm11, %v6348_v16  ;;  %5554 = vmatprep.subr.msk.mxu1 %vm551_vm12, %v6348_v16  ;;  %vm758_vm11 = vcmp.eq.s32.totalorder %v6560_v30, %v7357_v0  ;;  %vm487_vm12 = vcmp.eq.s32.totalorder %v6847_v57, %v7347_v10 }
  0xd7   :  { %5586 = vmatprep.subr.msk.mxu0 %vm807_vm13, %v6348_v16  ;;  %5555 = vmatpush2.msk.msra.mxu1 %vm550_vm14, %v6348_v16  ;;  %vm743_vm13 = vcmp.eq.s32.totalorder %v6578_v32, %v7347_v10  ;;  %vm486_vm14 = vcmp.eq.s32.totalorder %v6847_v57, %v7357_v0 }
  0xd8   :  { %5587 = vmatpush1.msk.msra.mxu0 %vm806_vm15, %v6348_v16  ;;  %5556 = vmatprep.subr.msk.mxu1 %vm535_vm0, %v6348_v16  ;;  %vm742_vm15 = vcmp.eq.s32.totalorder %v6578_v32, %v7357_v0  ;;  %vm471_vm0 = vcmp.eq.s32.totalorder %v6862_v58, %v7347_v10 }
  0xd9   :  { %5588 = vmatprep.subr.msk.mxu0 %vm791_vm1, %v6348_v16  ;;  %5557 = vmatpush2.msk.msra.mxu1 %vm534_vm2, %v6348_v16  ;;  %vm727_vm1 = vcmp.eq.s32.totalorder %v6596_v34, %v7347_v10  ;;  %vm470_vm2 = vcmp.eq.s32.totalorder %v6862_v58, %v7357_v0 }
  0xda   :  { %5589 = vmatpush1.msk.msra.mxu0 %vm790_vm3, %v6348_v16  ;;  %5558 = vmatprep.subr.msk.mxu1 %vm519_vm4, %v6348_v16  ;;  %vm726_vm3 = vcmp.eq.s32.totalorder %v6596_v34, %v7357_v0  ;;  %vm455_vm4 = vcmp.eq.s32.totalorder %v6877_v59, %v7347_v10 }
  0xdb   :  { %5590 = vmatprep.subr.msk.mxu0 %vm775_vm5, %v6348_v16  ;;  %5559 = vmatpush2.msk.msra.mxu1 %vm518_vm6, %v6348_v16  ;;  %vm711_vm5 = vcmp.eq.s32.totalorder %v6614_v36, %v7347_v10  ;;  %vm454_vm6 = vcmp.eq.s32.totalorder %v6877_v59, %v7357_v0 }
  0xdc   :  { %5591 = vmatpush1.msk.msra.mxu0 %vm774_vm7, %v6348_v16  ;;  %5560 = vmatprep.subr.msk.mxu1 %vm503_vm8, %v6348_v16  ;;  %vm710_vm7 = vcmp.eq.s32.totalorder %v6614_v36, %v7357_v0  ;;  %vm439_vm8 = vcmp.eq.s32.totalorder %v6892_v60, %v7347_v10 }
  0xdd   :  { %5592 = vmatprep.subr.msk.mxu0 %vm759_vm9, %v6348_v16  ;;  %5561 = vmatpush2.msk.msra.mxu1 %vm502_vm10, %v6348_v16  ;;  %vm695_vm9 = vcmp.eq.s32.totalorder %v6632_v38, %v7347_v10  ;;  %vm438_vm10 = vcmp.eq.s32.totalorder %v6892_v60, %v7357_v0 }
  0xde   :  { %5593 = vmatpush1.msk.msra.mxu0 %vm758_vm11, %v6348_v16  ;;  %5562 = vmatprep.subr.msk.mxu1 %vm487_vm12, %v6348_v16  ;;  %vm694_vm11 = vcmp.eq.s32.totalorder %v6632_v38, %v7357_v0  ;;  %vm423_vm12 = vcmp.eq.s32.totalorder %v6907_v61, %v7347_v10 }
  0xdf   :  { %5594 = vmatprep.subr.msk.mxu0 %vm743_vm13, %v6348_v16  ;;  %5563 = vmatpush2.msk.msra.mxu1 %vm486_vm14, %v6348_v16  ;;  %vm679_vm13 = vcmp.eq.s32.totalorder %v6648_v40, %v7347_v10  ;;  %vm422_vm14 = vcmp.eq.s32.totalorder %v6907_v61, %v7357_v0 }
  0xe0   :  { %5595 = vmatpush1.msk.msra.mxu0 %vm742_vm15, %v6348_v16  ;;  %5564 = vmatprep.subr.msk.mxu1 %vm471_vm0, %v6348_v16  ;;  %vm678_vm15 = vcmp.eq.s32.totalorder %v6648_v40, %v7357_v0  ;;  %vm409_vm0 = vcmp.eq.s32.totalorder %v6391_v5, %v7745_v43  ;;  %v9009_v0 = vsub.s32 4, %v6382_v2 }
  0xe1   :  { %5596 = vmatprep.subr.msk.mxu0 %vm727_vm1, %v6348_v16  ;;  %5565 = vmatpush2.msk.msra.mxu1 %vm470_vm2, %v6348_v16  ;;  %vm921_vm1 = vcmp.eq.s32.totalorder %v6394_v6, %v7745_v43  ;;  %vm408_vm2 = vcmp.eq.s32.totalorder %v6391_v5, %v7755_v45 }
  0xe2   :  { %5597 = vmatpush1.msk.msra.mxu0 %vm726_vm3, %v6348_v16  ;;  %5566 = vmatprep.subr.msk.mxu1 %vm455_vm4, %v6348_v16  ;;  %vm920_vm3 = vcmp.eq.s32.totalorder %v6394_v6, %v7755_v45  ;;  %vm393_vm4 = vcmp.eq.s32.totalorder %v6399_v8, %v7745_v43  ;;  %v8358_v10 = vrot.slane %v7717_v11, %v9009_v0  ;;  %v6276_v11 = vld [vmem:[#allocation3 + $0x8] sm:$0xff]  ;;  %v3653_v0 = vld [vmem:[#allocation6 + $0x120] sm:$0xff] }
  0xe3   :  { %5598 = vmatprep.subr.msk.mxu0 %vm711_vm5, %v6348_v16  ;;  %5567 = vmatpush2.msk.msra.mxu1 %vm454_vm6, %v6348_v16  ;;  %vm905_vm5 = vcmp.eq.s32.totalorder %v6402_v9, %v7745_v43  ;;  %vm392_vm6 = vcmp.eq.s32.totalorder %v6399_v8, %v7755_v45 }
  0xe4   :  { %5599 = vmatpush1.msk.msra.mxu0 %vm710_vm7, %v6348_v16  ;;  %5568 = vmatprep.subr.msk.mxu1 %vm439_vm8, %v6348_v16  ;;  %vm904_vm7 = vcmp.eq.s32.totalorder %v6402_v9, %v7755_v45  ;;  %vm377_vm8 = vcmp.eq.s32.totalorder %v6413_v12, %v7745_v43 }
  0xe5   :  { %5600 = vmatprep.subr.msk.mxu0 %vm695_vm9, %v6348_v16  ;;  %5569 = vmatpush2.msk.msra.mxu1 %vm438_vm10, %v6348_v16  ;;  %vm889_vm9 = vcmp.eq.s32.totalorder %v6416_v13, %v7745_v43  ;;  %vm376_vm10 = vcmp.eq.s32.totalorder %v6413_v12, %v7755_v45 }
  0xe6   :  { %5601 = vmatpush1.msk.msra.mxu0 %vm694_vm11, %v6348_v16  ;;  %5570 = vmatprep.subr.msk.mxu1 %vm423_vm12, %v6348_v16  ;;  %vm888_vm11 = vcmp.eq.s32.totalorder %v6416_v13, %v7755_v45  ;;  %vm361_vm12 = vcmp.eq.s32.totalorder %v6419_v14, %v7745_v43 }
  0xe7   :  { %5602 = vmatprep.subr.msk.mxu0 %vm679_vm13, %v6348_v16  ;;  %5571 = vmatpush2.msk.msra.mxu1 %vm422_vm14, %v6348_v16  ;;  %vm873_vm13 = vcmp.eq.s32.totalorder %v6422_v15, %v7745_v43  ;;  %vm360_vm14 = vcmp.eq.s32.totalorder %v6419_v14, %v7755_v45 }
  0xe8   :  { %2971 = vmatprep.mubr.f32.mxu1 %v6941_v62  ;;  %5603 = vmatpush1.msk.msra.mxu0 %vm678_vm15, %v6348_v16  ;;  %vm872_vm15 = vcmp.eq.s32.totalorder %v6422_v15, %v7755_v45 }
  0xe9   :  { %3042 = vmatprep.mubr.f32.mxu0 %v6347_v1  ;;  %2972 = vmatmul.mubr.f32.vlgmr.msra.gmra.mxu1 %v6949_v63 }
  0xea   :  { %3043 = vmatmul.mubr.f32.vlgmr.msra.gmra.mxu0 %v6705_v47  ;;  %5604 = vmatprep.subr.msk.mxu0 %vm409_vm0, %v6348_v16  ;;  %vm345_vm0 = vcmp.eq.s32.totalorder %v6441_v17, %v7745_v43 }
  0xeb   :  { %5668 = vmatprep.subr.msk.mxu1 %vm921_vm1, %v6348_v16  ;;  %5605 = vmatpush1.msk.msra.mxu0 %vm408_vm2, %v6348_v16  ;;  %vm857_vm1 = vcmp.eq.s32.totalorder %v6452_v18, %v7745_v43  ;;  %vm344_vm2 = vcmp.eq.s32.totalorder %v6441_v17, %v7755_v45 }
  0xec   :  { %5669 = vmatpush1.msk.msra.mxu1 %vm920_vm3, %v6348_v16  ;;  %5606 = vmatprep.subr.msk.mxu0 %vm393_vm4, %v6348_v16  ;;  %vm856_vm3 = vcmp.eq.s32.totalorder %v6452_v18, %v7755_v45  ;;  %vm329_vm4 = vcmp.eq.s32.totalorder %v6467_v19, %v7745_v43 }
  0xed   :  { %5670 = vmatprep.subr.msk.mxu1 %vm905_vm5, %v6348_v16  ;;  %5607 = vmatpush1.msk.msra.mxu0 %vm392_vm6, %v6348_v16  ;;  %vm841_vm5 = vcmp.eq.s32.totalorder %v6470_v20, %v7745_v43  ;;  %vm328_vm6 = vcmp.eq.s32.totalorder %v6467_v19, %v7755_v45 }
  0xee   :  { %5671 = vmatpush1.msk.msra.mxu1 %vm904_vm7, %v6348_v16  ;;  %5608 = vmatprep.subr.msk.mxu0 %vm377_vm8, %v6348_v16  ;;  %vm840_vm7 = vcmp.eq.s32.totalorder %v6470_v20, %v7755_v45  ;;  %vm313_vm8 = vcmp.eq.s32.totalorder %v6485_v21, %v7745_v43 }
  0xef   :  { %5672 = vmatprep.subr.msk.mxu1 %vm889_vm9, %v6348_v16  ;;  %5609 = vmatpush1.msk.msra.mxu0 %vm376_vm10, %v6348_v16  ;;  %vm825_vm9 = vcmp.eq.s32.totalorder %v6488_v22, %v7745_v43  ;;  %vm312_vm10 = vcmp.eq.s32.totalorder %v6485_v21, %v7755_v45 }
  0xf0   :  { %5673 = vmatpush1.msk.msra.mxu1 %vm888_vm11, %v6348_v16  ;;  %5610 = vmatprep.subr.msk.mxu0 %vm361_vm12, %v6348_v16  ;;  %vm824_vm11 = vcmp.eq.s32.totalorder %v6488_v22, %v7755_v45  ;;  %vm297_vm12 = vcmp.eq.s32.totalorder %v6503_v23, %v7745_v43 }
  0xf1   :  { %5674 = vmatprep.subr.msk.mxu1 %vm873_vm13, %v6348_v16  ;;  %5611 = vmatpush1.msk.msra.mxu0 %vm360_vm14, %v6348_v16  ;;  %vm809_vm13 = vcmp.eq.s32.totalorder %v6506_v24, %v7745_v43  ;;  %vm296_vm14 = vcmp.eq.s32.totalorder %v6503_v23, %v7755_v45 }
  0xf2   :  { %5675 = vmatpush1.msk.msra.mxu1 %vm872_vm15, %v6348_v16  ;;  %5612 = vmatprep.subr.msk.mxu0 %vm345_vm0, %v6348_v16  ;;  %vm808_vm15 = vcmp.eq.s32.totalorder %v6506_v24, %v7755_v45  ;;  %vm281_vm0 = vcmp.eq.s32.totalorder %v6521_v25, %v7745_v43 }
  0xf3   :  { %5676 = vmatprep.subr.msk.mxu1 %vm857_vm1, %v6348_v16  ;;  %5613 = vmatpush1.msk.msra.mxu0 %vm344_vm2, %v6348_v16  ;;  %vm793_vm1 = vcmp.eq.s32.totalorder %v6524_v26, %v7745_v43  ;;  %vm280_vm2 = vcmp.eq.s32.totalorder %v6521_v25, %v7755_v45 }
  0xf4   :  { %5677 = vmatpush1.msk.msra.mxu1 %vm856_vm3, %v6348_v16  ;;  %5614 = vmatprep.subr.msk.mxu0 %vm329_vm4, %v6348_v16  ;;  %vm792_vm3 = vcmp.eq.s32.totalorder %v6524_v26, %v7755_v45  ;;  %vm265_vm4 = vcmp.eq.s32.totalorder %v6539_v27, %v7745_v43 }
  0xf5   :  { %5678 = vmatprep.subr.msk.mxu1 %vm841_vm5, %v6348_v16  ;;  %5615 = vmatpush1.msk.msra.mxu0 %vm328_vm6, %v6348_v16  ;;  %vm777_vm5 = vcmp.eq.s32.totalorder %v6542_v28, %v7745_v43  ;;  %vm264_vm6 = vcmp.eq.s32.totalorder %v6539_v27, %v7755_v45 }
  0xf6   :  { %5679 = vmatpush1.msk.msra.mxu1 %vm840_vm7, %v6348_v16  ;;  %5616 = vmatprep.subr.msk.mxu0 %vm313_vm8, %v6348_v16  ;;  %vm776_vm7 = vcmp.eq.s32.totalorder %v6542_v28, %v7755_v45  ;;  %vm249_vm8 = vcmp.eq.s32.totalorder %v6557_v29, %v7745_v43 }
  0xf7   :  { %5680 = vmatprep.subr.msk.mxu1 %vm825_vm9, %v6348_v16  ;;  %5617 = vmatpush1.msk.msra.mxu0 %vm312_vm10, %v6348_v16  ;;  %vm761_vm9 = vcmp.eq.s32.totalorder %v6560_v30, %v7745_v43  ;;  %vm248_vm10 = vcmp.eq.s32.totalorder %v6557_v29, %v7755_v45 }
  0xf8   :  { %5681 = vmatpush1.msk.msra.mxu1 %vm824_vm11, %v6348_v16  ;;  %5618 = vmatprep.subr.msk.mxu0 %vm297_vm12, %v6348_v16  ;;  %vm760_vm11 = vcmp.eq.s32.totalorder %v6560_v30, %v7755_v45  ;;  %vm233_vm12 = vcmp.eq.s32.totalorder %v6575_v31, %v7745_v43 }
  0xf9   :  { %5682 = vmatprep.subr.msk.mxu1 %vm809_vm13, %v6348_v16  ;;  %5619 = vmatpush1.msk.msra.mxu0 %vm296_vm14, %v6348_v16  ;;  %vm745_vm13 = vcmp.eq.s32.totalorder %v6578_v32, %v7745_v43  ;;  %vm232_vm14 = vcmp.eq.s32.totalorder %v6575_v31, %v7755_v45 }
  0xfa   :  { %5683 = vmatpush1.msk.msra.mxu1 %vm808_vm15, %v6348_v16  ;;  %5620 = vmatprep.subr.msk.mxu0 %vm281_vm0, %v6348_v16  ;;  %vm744_vm15 = vcmp.eq.s32.totalorder %v6578_v32, %v7755_v45  ;;  %vm217_vm0 = vcmp.eq.s32.totalorder %v6593_v33, %v7745_v43 }
  0xfb   :  { %5684 = vmatprep.subr.msk.mxu1 %vm793_vm1, %v6348_v16  ;;  %5621 = vmatpush1.msk.msra.mxu0 %vm280_vm2, %v6348_v16  ;;  %vm729_vm1 = vcmp.eq.s32.totalorder %v6596_v34, %v7745_v43  ;;  %vm216_vm2 = vcmp.eq.s32.totalorder %v6593_v33, %v7755_v45 }
  0xfc   :  { %5685 = vmatpush1.msk.msra.mxu1 %vm792_vm3, %v6348_v16  ;;  %5622 = vmatprep.subr.msk.mxu0 %vm265_vm4, %v6348_v16  ;;  %vm728_vm3 = vcmp.eq.s32.totalorder %v6596_v34, %v7755_v45  ;;  %vm201_vm4 = vcmp.eq.s32.totalorder %v6611_v35, %v7745_v43 }
  0xfd   :  { %5686 = vmatprep.subr.msk.mxu1 %vm777_vm5, %v6348_v16  ;;  %5623 = vmatpush1.msk.msra.mxu0 %vm264_vm6, %v6348_v16  ;;  %vm713_vm5 = vcmp.eq.s32.totalorder %v6614_v36, %v7745_v43  ;;  %vm200_vm6 = vcmp.eq.s32.totalorder %v6611_v35, %v7755_v45 }
  0xfe   :  { %5687 = vmatpush1.msk.msra.mxu1 %vm776_vm7, %v6348_v16  ;;  %5624 = vmatprep.subr.msk.mxu0 %vm249_vm8, %v6348_v16  ;;  %vm712_vm7 = vcmp.eq.s32.totalorder %v6614_v36, %v7755_v45  ;;  %vm185_vm8 = vcmp.eq.s32.totalorder %v6629_v37, %v7745_v43 }
  0xff   :  { %5688 = vmatprep.subr.msk.mxu1 %vm761_vm9, %v6348_v16  ;;  %5625 = vmatpush1.msk.msra.mxu0 %vm248_vm10, %v6348_v16  ;;  %vm697_vm9 = vcmp.eq.s32.totalorder %v6632_v38, %v7745_v43  ;;  %vm184_vm10 = vcmp.eq.s32.totalorder %v6629_v37, %v7755_v45 }
 0x100   :  { %5689 = vmatpush1.msk.msra.mxu1 %vm760_vm11, %v6348_v16  ;;  %5626 = vmatprep.subr.msk.mxu0 %vm233_vm12, %v6348_v16  ;;  %vm696_vm11 = vcmp.eq.s32.totalorder %v6632_v38, %v7755_v45  ;;  %vm169_vm12 = vcmp.eq.s32.totalorder %v6382_v2, %v7745_v43 }
 0x101   :  { %5690 = vmatprep.subr.msk.mxu1 %vm745_vm13, %v6348_v16  ;;  %5627 = vmatpush1.msk.msra.mxu0 %vm232_vm14, %v6348_v16  ;;  %vm681_vm13 = vcmp.eq.s32.totalorder %v6648_v40, %v7745_v43  ;;  %vm168_vm14 = vcmp.eq.s32.totalorder %v6382_v2, %v7755_v45 }
 0x102   :  { %5691 = vmatpush1.msk.msra.mxu1 %vm744_vm15, %v6348_v16  ;;  %5628 = vmatprep.subr.msk.mxu0 %vm217_vm0, %v6348_v16  ;;  %vm680_vm15 = vcmp.eq.s32.totalorder %v6648_v40, %v7755_v45  ;;  %vm665_vm0 = vcmp.eq.s32.totalorder %v6666_v42, %v7745_v43 }
 0x103   :  { %5692 = vmatprep.subr.msk.mxu1 %vm729_vm1, %v6348_v16  ;;  %5629 = vmatpush1.msk.msra.mxu0 %vm216_vm2, %v6348_v16  ;;  %vm411_vm1 = vcmp.eq.s32.totalorder %v6391_v5, %v7950_v3  ;;  %vm664_vm2 = vcmp.eq.s32.totalorder %v6666_v42, %v7755_v45 }
 0x104   :  { %5693 = vmatpush1.msk.msra.mxu1 %vm728_vm3, %v6348_v16  ;;  %5630 = vmatprep.subr.msk.mxu0 %vm201_vm4, %v6348_v16  ;;  %vm410_vm3 = vcmp.eq.s32.totalorder %v6391_v5, %v7954_v4  ;;  %vm649_vm4 = vcmp.eq.s32.totalorder %v6695_v46, %v7745_v43 }
 0x105   :  { %5694 = vmatprep.subr.msk.mxu1 %vm713_vm5, %v6348_v16  ;;  %5631 = vmatpush1.msk.msra.mxu0 %vm200_vm6, %v6348_v16  ;;  %vm395_vm5 = vcmp.eq.s32.totalorder %v6399_v8, %v7950_v3  ;;  %vm648_vm6 = vcmp.eq.s32.totalorder %v6695_v46, %v7755_v45 }
 0x106   :  { %5695 = vmatpush1.msk.msra.mxu1 %vm712_vm7, %v6348_v16  ;;  %5632 = vmatprep.subr.msk.mxu0 %vm185_vm8, %v6348_v16  ;;  %vm394_vm7 = vcmp.eq.s32.totalorder %v6399_v8, %v7954_v4  ;;  %vm633_vm8 = vcmp.eq.s32.totalorder %v6712_v48, %v7745_v43 }
 0x107   :  { %5696 = vmatprep.subr.msk.mxu1 %vm697_vm9, %v6348_v16  ;;  %5633 = vmatpush1.msk.msra.mxu0 %vm184_vm10, %v6348_v16  ;;  %vm379_vm9 = vcmp.eq.s32.totalorder %v6413_v12, %v7950_v3  ;;  %vm632_vm10 = vcmp.eq.s32.totalorder %v6712_v48, %v7755_v45 }
 0x108   :  { %5697 = vmatpush1.msk.msra.mxu1 %vm696_vm11, %v6348_v16  ;;  %5634 = vmatprep.subr.msk.mxu0 %vm169_vm12, %v6348_v16  ;;  %vm378_vm11 = vcmp.eq.s32.totalorder %v6413_v12, %v7954_v4  ;;  %vm617_vm12 = vcmp.eq.s32.totalorder %v6727_v49, %v7745_v43 }
 0x109   :  { %5698 = vmatprep.subr.msk.mxu1 %vm681_vm13, %v6348_v16  ;;  %5635 = vmatpush1.msk.msra.mxu0 %vm168_vm14, %v6348_v16  ;;  %vm363_vm13 = vcmp.eq.s32.totalorder %v6419_v14, %v7950_v3  ;;  %vm616_vm14 = vcmp.eq.s32.totalorder %v6727_v49, %v7755_v45 }
 0x10a   :  { %5699 = vmatpush1.msk.msra.mxu1 %vm680_vm15, %v6348_v16  ;;  %3184 = vmatprep.mubr.f32.mxu1 %v6347_v1  ;;  %vm362_vm15 = vcmp.eq.s32.totalorder %v6419_v14, %v7954_v4 }
 0x10b   :  { %5636 = vmatprep.subr.msk.mxu0 %vm665_vm0, %v6348_v16  ;;  %3185 = vmatmul.mubr.f32.vlgmr.msra.gmra.mxu1 %v6705_v47  ;;  %vm601_vm0 = vcmp.eq.s32.totalorder %v6742_v50, %v7745_v43 }
 0x10c   :  { %5700 = vmatprep.subr.msk.mxu1 %vm411_vm1, %v6348_v16  ;;  %5637 = vmatpush2.msk.msra.mxu0 %vm664_vm2, %v6348_v16  ;;  %vm347_vm1 = vcmp.eq.s32.totalorder %v6441_v17, %v7950_v3  ;;  %vm600_vm2 = vcmp.eq.s32.totalorder %v6742_v50, %v7755_v45 }
 0x10d   :  { %5701 = vmatpush1.msk.msra.mxu1 %vm410_vm3, %v6348_v16  ;;  %5638 = vmatprep.subr.msk.mxu0 %vm649_vm4, %v6348_v16  ;;  %vm346_vm3 = vcmp.eq.s32.totalorder %v6441_v17, %v7954_v4  ;;  %vm585_vm4 = vcmp.eq.s32.totalorder %v6757_v51, %v7745_v43 }
 0x10e   :  { %5702 = vmatprep.subr.msk.mxu1 %vm395_vm5, %v6348_v16  ;;  %5639 = vmatpush2.msk.msra.mxu0 %vm648_vm6, %v6348_v16  ;;  %vm331_vm5 = vcmp.eq.s32.totalorder %v6467_v19, %v7950_v3  ;;  %vm584_vm6 = vcmp.eq.s32.totalorder %v6757_v51, %v7755_v45 }
 0x10f   :  { %5703 = vmatpush1.msk.msra.mxu1 %vm394_vm7, %v6348_v16  ;;  %5640 = vmatprep.subr.msk.mxu0 %vm633_vm8, %v6348_v16  ;;  %vm330_vm7 = vcmp.eq.s32.totalorder %v6467_v19, %v7954_v4  ;;  %vm569_vm8 = vcmp.eq.s32.totalorder %v6772_v52, %v7745_v43 }
 0x110   :  { %5704 = vmatprep.subr.msk.mxu1 %vm379_vm9, %v6348_v16  ;;  %5641 = vmatpush2.msk.msra.mxu0 %vm632_vm10, %v6348_v16  ;;  %vm315_vm9 = vcmp.eq.s32.totalorder %v6485_v21, %v7950_v3  ;;  %vm568_vm10 = vcmp.eq.s32.totalorder %v6772_v52, %v7755_v45 }
 0x111   :  { %5705 = vmatpush1.msk.msra.mxu1 %vm378_vm11, %v6348_v16  ;;  %5642 = vmatprep.subr.msk.mxu0 %vm617_vm12, %v6348_v16  ;;  %vm314_vm11 = vcmp.eq.s32.totalorder %v6485_v21, %v7954_v4  ;;  %vm553_vm12 = vcmp.eq.s32.totalorder %v6787_v53, %v7745_v43 }
 0x112   :  { %5706 = vmatprep.subr.msk.mxu1 %vm363_vm13, %v6348_v16  ;;  %5643 = vmatpush2.msk.msra.mxu0 %vm616_vm14, %v6348_v16  ;;  %vm299_vm13 = vcmp.eq.s32.totalorder %v6503_v23, %v7950_v3  ;;  %vm552_vm14 = vcmp.eq.s32.totalorder %v6787_v53, %v7755_v45 }
 0x113   :  { %5707 = vmatpush1.msk.msra.mxu1 %vm362_vm15, %v6348_v16  ;;  %5644 = vmatprep.subr.msk.mxu0 %vm601_vm0, %v6348_v16  ;;  %vm298_vm15 = vcmp.eq.s32.totalorder %v6503_v23, %v7954_v4  ;;  %vm537_vm0 = vcmp.eq.s32.totalorder %v6802_v54, %v7745_v43 }
 0x114   :  { %5708 = vmatprep.subr.msk.mxu1 %vm347_vm1, %v6348_v16  ;;  %5645 = vmatpush2.msk.msra.mxu0 %vm600_vm2, %v6348_v16  ;;  %vm283_vm1 = vcmp.eq.s32.totalorder %v6521_v25, %v7950_v3  ;;  %vm536_vm2 = vcmp.eq.s32.totalorder %v6802_v54, %v7755_v45 }
 0x115   :  { %5709 = vmatpush1.msk.msra.mxu1 %vm346_vm3, %v6348_v16  ;;  %5646 = vmatprep.subr.msk.mxu0 %vm585_vm4, %v6348_v16  ;;  %vm282_vm3 = vcmp.eq.s32.totalorder %v6521_v25, %v7954_v4  ;;  %vm521_vm4 = vcmp.eq.s32.totalorder %v6817_v55, %v7745_v43 }
 0x116   :  { %5710 = vmatprep.subr.msk.mxu1 %vm331_vm5, %v6348_v16  ;;  %5647 = vmatpush2.msk.msra.mxu0 %vm584_vm6, %v6348_v16  ;;  %vm267_vm5 = vcmp.eq.s32.totalorder %v6539_v27, %v7950_v3  ;;  %vm520_vm6 = vcmp.eq.s32.totalorder %v6817_v55, %v7755_v45 }
 0x117   :  { %5711 = vmatpush1.msk.msra.mxu1 %vm330_vm7, %v6348_v16  ;;  %5648 = vmatprep.subr.msk.mxu0 %vm569_vm8, %v6348_v16  ;;  %vm266_vm7 = vcmp.eq.s32.totalorder %v6539_v27, %v7954_v4  ;;  %vm505_vm8 = vcmp.eq.s32.totalorder %v6832_v56, %v7745_v43 }
 0x118   :  { %5712 = vmatprep.subr.msk.mxu1 %vm315_vm9, %v6348_v16  ;;  %5649 = vmatpush2.msk.msra.mxu0 %vm568_vm10, %v6348_v16  ;;  %vm251_vm9 = vcmp.eq.s32.totalorder %v6557_v29, %v7950_v3  ;;  %vm504_vm10 = vcmp.eq.s32.totalorder %v6832_v56, %v7755_v45 }
 0x119   :  { %5713 = vmatpush1.msk.msra.mxu1 %vm314_vm11, %v6348_v16  ;;  %5650 = vmatprep.subr.msk.mxu0 %vm553_vm12, %v6348_v16  ;;  %vm250_vm11 = vcmp.eq.s32.totalorder %v6557_v29, %v7954_v4  ;;  %vm489_vm12 = vcmp.eq.s32.totalorder %v6847_v57, %v7745_v43 }
 0x11a   :  { %5714 = vmatprep.subr.msk.mxu1 %vm299_vm13, %v6348_v16  ;;  %5651 = vmatpush2.msk.msra.mxu0 %vm552_vm14, %v6348_v16  ;;  %vm235_vm13 = vcmp.eq.s32.totalorder %v6575_v31, %v7950_v3  ;;  %vm488_vm14 = vcmp.eq.s32.totalorder %v6847_v57, %v7755_v45 }
 0x11b   :  { %5715 = vmatpush1.msk.msra.mxu1 %vm298_vm15, %v6348_v16  ;;  %5652 = vmatprep.subr.msk.mxu0 %vm537_vm0, %v6348_v16  ;;  %vm234_vm15 = vcmp.eq.s32.totalorder %v6575_v31, %v7954_v4  ;;  %vm473_vm0 = vcmp.eq.s32.totalorder %v6862_v58, %v7745_v43 }
 0x11c   :  { %5716 = vmatprep.subr.msk.mxu1 %vm283_vm1, %v6348_v16  ;;  %5653 = vmatpush2.msk.msra.mxu0 %vm536_vm2, %v6348_v16  ;;  %vm219_vm1 = vcmp.eq.s32.totalorder %v6593_v33, %v7950_v3  ;;  %vm472_vm2 = vcmp.eq.s32.totalorder %v6862_v58, %v7755_v45 }
 0x11d   :  { %5717 = vmatpush1.msk.msra.mxu1 %vm282_vm3, %v6348_v16  ;;  %5654 = vmatprep.subr.msk.mxu0 %vm521_vm4, %v6348_v16  ;;  %vm218_vm3 = vcmp.eq.s32.totalorder %v6593_v33, %v7954_v4  ;;  %vm457_vm4 = vcmp.eq.s32.totalorder %v6877_v59, %v7745_v43 }
 0x11e   :  { %5718 = vmatprep.subr.msk.mxu1 %vm267_vm5, %v6348_v16  ;;  %5655 = vmatpush2.msk.msra.mxu0 %vm520_vm6, %v6348_v16  ;;  %vm203_vm5 = vcmp.eq.s32.totalorder %v6611_v35, %v7950_v3  ;;  %vm456_vm6 = vcmp.eq.s32.totalorder %v6877_v59, %v7755_v45 }
 0x11f   :  { %5719 = vmatpush1.msk.msra.mxu1 %vm266_vm7, %v6348_v16  ;;  %5656 = vmatprep.subr.msk.mxu0 %vm505_vm8, %v6348_v16  ;;  %vm202_vm7 = vcmp.eq.s32.totalorder %v6611_v35, %v7954_v4  ;;  %vm441_vm8 = vcmp.eq.s32.totalorder %v6892_v60, %v7745_v43 }
 0x120   :  { %5720 = vmatprep.subr.msk.mxu1 %vm251_vm9, %v6348_v16  ;;  %5657 = vmatpush2.msk.msra.mxu0 %vm504_vm10, %v6348_v16  ;;  %vm187_vm9 = vcmp.eq.s32.totalorder %v6629_v37, %v7950_v3  ;;  %vm440_vm10 = vcmp.eq.s32.totalorder %v6892_v60, %v7755_v45 }
 0x121   :  { %5721 = vmatpush1.msk.msra.mxu1 %vm250_vm11, %v6348_v16  ;;  %5658 = vmatprep.subr.msk.mxu0 %vm489_vm12, %v6348_v16  ;;  %vm186_vm11 = vcmp.eq.s32.totalorder %v6629_v37, %v7954_v4  ;;  %vm425_vm12 = vcmp.eq.s32.totalorder %v6907_v61, %v7745_v43  ;;  %v8552_v43 = vrot.slane %v6276_v11, %v126_v7  ;;  %v3654_v7 = vld [vmem:[#allocation6 + $0x128] sm:$0xff] }
 0x122   :  { %5722 = vmatprep.subr.msk.mxu1 %vm235_vm13, %v6348_v16  ;;  %5659 = vmatpush2.msk.msra.mxu0 %vm488_vm14, %v6348_v16  ;;  %vm171_vm13 = vcmp.eq.s32.totalorder %v6382_v2, %v7950_v3  ;;  %vm424_vm14 = vcmp.eq.s32.totalorder %v6907_v61, %v7755_v45  ;;  %v8562_v45 = vrot.slane %v6276_v11, %v122_v44  ;;  %v3637_v44 = vld [vmem:[#allocation6 + $0xa0] sm:$0xff]  ;;  %v3668_v11 = vld [vmem:[#allocation6 + $0x198] sm:$0xff] }
 0x123   :  { %5723 = vmatpush1.msk.msra.mxu1 %vm234_vm15, %v6348_v16  ;;  %5660 = vmatprep.subr.msk.mxu0 %vm473_vm0, %v6348_v16  ;;  %vm170_vm15 = vcmp.eq.s32.totalorder %v6382_v2, %v7954_v4  ;;  %vm667_vm0 = vcmp.eq.s32.totalorder %v6666_v42, %v7950_v3 }
 0x124   :  { %5724 = vmatprep.subr.msk.mxu1 %vm219_vm1, %v6348_v16  ;;  %5661 = vmatpush2.msk.msra.mxu0 %vm472_vm2, %v6348_v16  ;;  %vm923_vm1 = vcmp.eq.s32.totalorder %v6394_v6, %v7950_v3  ;;  %vm666_vm2 = vcmp.eq.s32.totalorder %v6666_v42, %v7954_v4 }
 0x125   :  { %5725 = vmatpush1.msk.msra.mxu1 %vm218_vm3, %v6348_v16  ;;  %5662 = vmatprep.subr.msk.mxu0 %vm457_vm4, %v6348_v16  ;;  %vm922_vm3 = vcmp.eq.s32.totalorder %v6394_v6, %v7954_v4  ;;  %vm651_vm4 = vcmp.eq.s32.totalorder %v6695_v46, %v7950_v3 }
 0x126   :  { %5726 = vmatprep.subr.msk.mxu1 %vm203_vm5, %v6348_v16  ;;  %5663 = vmatpush2.msk.msra.mxu0 %vm456_vm6, %v6348_v16  ;;  %vm907_vm5 = vcmp.eq.s32.totalorder %v6402_v9, %v7950_v3  ;;  %vm650_vm6 = vcmp.eq.s32.totalorder %v6695_v46, %v7954_v4 }
 0x127   :  { %5727 = vmatpush1.msk.msra.mxu1 %vm202_vm7, %v6348_v16  ;;  %5664 = vmatprep.subr.msk.mxu0 %vm441_vm8, %v6348_v16  ;;  %vm906_vm7 = vcmp.eq.s32.totalorder %v6402_v9, %v7954_v4  ;;  %vm635_vm8 = vcmp.eq.s32.totalorder %v6712_v48, %v7950_v3 }
 0x128   :  { %5728 = vmatprep.subr.msk.mxu1 %vm187_vm9, %v6348_v16  ;;  %5665 = vmatpush2.msk.msra.mxu0 %vm440_vm10, %v6348_v16  ;;  %vm891_vm9 = vcmp.eq.s32.totalorder %v6416_v13, %v7950_v3  ;;  %vm634_vm10 = vcmp.eq.s32.totalorder %v6712_v48, %v7954_v4 }
 0x129   :  { %5729 = vmatpush1.msk.msra.mxu1 %vm186_vm11, %v6348_v16  ;;  %5666 = vmatprep.subr.msk.mxu0 %vm425_vm12, %v6348_v16  ;;  %vm890_vm11 = vcmp.eq.s32.totalorder %v6416_v13, %v7954_v4  ;;  %vm619_vm12 = vcmp.eq.s32.totalorder %v6727_v49, %v7950_v3 }
 0x12a   :  { %5730 = vmatprep.subr.msk.mxu1 %vm171_vm13, %v6348_v16  ;;  %5667 = vmatpush2.msk.msra.mxu0 %vm424_vm14, %v6348_v16  ;;  %vm875_vm13 = vcmp.eq.s32.totalorder %v6422_v15, %v7950_v3  ;;  %vm618_vm14 = vcmp.eq.s32.totalorder %v6727_v49, %v7954_v4 }
 0x12b   :  { %3113 = vmatprep.mubr.f32.mxu0 %v6941_v62  ;;  %5731 = vmatpush1.msk.msra.mxu1 %vm170_vm15, %v6348_v16  ;;  %vm874_vm15 = vcmp.eq.s32.totalorder %v6422_v15, %v7954_v4 }
 0x12c   :  { %3114 = vmatmul.mubr.f32.vlgmr.msra.gmra.mxu0 %v6949_v63  ;;  %5732 = vmatprep.subr.msk.mxu1 %vm667_vm0, %v6348_v16  ;;  %vm603_vm0 = vcmp.eq.s32.totalorder %v6742_v50, %v7950_v3 }
 0x12d   :  { %5764 = vmatprep.subr.msk.mxu0 %vm923_vm1, %v6348_v16  ;;  %5733 = vmatpush2.msk.msra.mxu1 %vm666_vm2, %v6348_v16  ;;  %vm859_vm1 = vcmp.eq.s32.totalorder %v6452_v18, %v7950_v3  ;;  %vm602_vm2 = vcmp.eq.s32.totalorder %v6742_v50, %v7954_v4 }
 0x12e   :  { %5765 = vmatpush1.msk.msra.mxu0 %vm922_vm3, %v6348_v16  ;;  %5734 = vmatprep.subr.msk.mxu1 %vm651_vm4, %v6348_v16  ;;  %vm858_vm3 = vcmp.eq.s32.totalorder %v6452_v18, %v7954_v4  ;;  %vm587_vm4 = vcmp.eq.s32.totalorder %v6757_v51, %v7950_v3 }
 0x12f   :  { %5766 = vmatprep.subr.msk.mxu0 %vm907_vm5, %v6348_v16  ;;  %5735 = vmatpush2.msk.msra.mxu1 %vm650_vm6, %v6348_v16  ;;  %vm843_vm5 = vcmp.eq.s32.totalorder %v6470_v20, %v7950_v3  ;;  %vm586_vm6 = vcmp.eq.s32.totalorder %v6757_v51, %v7954_v4 }
 0x130   :  { %5767 = vmatpush1.msk.msra.mxu0 %vm906_vm7, %v6348_v16  ;;  %5736 = vmatprep.subr.msk.mxu1 %vm635_vm8, %v6348_v16  ;;  %vm842_vm7 = vcmp.eq.s32.totalorder %v6470_v20, %v7954_v4  ;;  %vm571_vm8 = vcmp.eq.s32.totalorder %v6772_v52, %v7950_v3 }
 0x131   :  { %5768 = vmatprep.subr.msk.mxu0 %vm891_vm9, %v6348_v16  ;;  %5737 = vmatpush2.msk.msra.mxu1 %vm634_vm10, %v6348_v16  ;;  %vm827_vm9 = vcmp.eq.s32.totalorder %v6488_v22, %v7950_v3  ;;  %vm570_vm10 = vcmp.eq.s32.totalorder %v6772_v52, %v7954_v4 }
 0x132   :  { %5769 = vmatpush1.msk.msra.mxu0 %vm890_vm11, %v6348_v16  ;;  %5738 = vmatprep.subr.msk.mxu1 %vm619_vm12, %v6348_v16  ;;  %vm826_vm11 = vcmp.eq.s32.totalorder %v6488_v22, %v7954_v4  ;;  %vm555_vm12 = vcmp.eq.s32.totalorder %v6787_v53, %v7950_v3 }
 0x133   :  { %5770 = vmatprep.subr.msk.mxu0 %vm875_vm13, %v6348_v16  ;;  %5739 = vmatpush2.msk.msra.mxu1 %vm618_vm14, %v6348_v16  ;;  %vm811_vm13 = vcmp.eq.s32.totalorder %v6506_v24, %v7950_v3  ;;  %vm554_vm14 = vcmp.eq.s32.totalorder %v6787_v53, %v7954_v4 }
 0x134   :  { %5771 = vmatpush1.msk.msra.mxu0 %vm874_vm15, %v6348_v16  ;;  %5740 = vmatprep.subr.msk.mxu1 %vm603_vm0, %v6348_v16  ;;  %vm810_vm15 = vcmp.eq.s32.totalorder %v6506_v24, %v7954_v4  ;;  %vm539_vm0 = vcmp.eq.s32.totalorder %v6802_v54, %v7950_v3 }
 0x135   :  { %5772 = vmatprep.subr.msk.mxu0 %vm859_vm1, %v6348_v16  ;;  %5741 = vmatpush2.msk.msra.mxu1 %vm602_vm2, %v6348_v16  ;;  %vm795_vm1 = vcmp.eq.s32.totalorder %v6524_v26, %v7950_v3  ;;  %vm538_vm2 = vcmp.eq.s32.totalorder %v6802_v54, %v7954_v4 }
 0x136   :  { %5773 = vmatpush1.msk.msra.mxu0 %vm858_vm3, %v6348_v16  ;;  %5742 = vmatprep.subr.msk.mxu1 %vm587_vm4, %v6348_v16  ;;  %vm794_vm3 = vcmp.eq.s32.totalorder %v6524_v26, %v7954_v4  ;;  %vm523_vm4 = vcmp.eq.s32.totalorder %v6817_v55, %v7950_v3 }
 0x137   :  { %5774 = vmatprep.subr.msk.mxu0 %vm843_vm5, %v6348_v16  ;;  %5743 = vmatpush2.msk.msra.mxu1 %vm586_vm6, %v6348_v16  ;;  %vm779_vm5 = vcmp.eq.s32.totalorder %v6542_v28, %v7950_v3  ;;  %vm522_vm6 = vcmp.eq.s32.totalorder %v6817_v55, %v7954_v4 }
 0x138   :  { %5775 = vmatpush1.msk.msra.mxu0 %vm842_vm7, %v6348_v16  ;;  %5744 = vmatprep.subr.msk.mxu1 %vm571_vm8, %v6348_v16  ;;  %vm778_vm7 = vcmp.eq.s32.totalorder %v6542_v28, %v7954_v4  ;;  %vm507_vm8 = vcmp.eq.s32.totalorder %v6832_v56, %v7950_v3 }
 0x139   :  { %5776 = vmatprep.subr.msk.mxu0 %vm827_vm9, %v6348_v16  ;;  %5745 = vmatpush2.msk.msra.mxu1 %vm570_vm10, %v6348_v16  ;;  %vm763_vm9 = vcmp.eq.s32.totalorder %v6560_v30, %v7950_v3  ;;  %vm506_vm10 = vcmp.eq.s32.totalorder %v6832_v56, %v7954_v4 }
 0x13a   :  { %5777 = vmatpush1.msk.msra.mxu0 %vm826_vm11, %v6348_v16  ;;  %5746 = vmatprep.subr.msk.mxu1 %vm555_vm12, %v6348_v16  ;;  %vm762_vm11 = vcmp.eq.s32.totalorder %v6560_v30, %v7954_v4  ;;  %vm491_vm12 = vcmp.eq.s32.totalorder %v6847_v57, %v7950_v3 }
 0x13b   :  { %5778 = vmatprep.subr.msk.mxu0 %vm811_vm13, %v6348_v16  ;;  %5747 = vmatpush2.msk.msra.mxu1 %vm554_vm14, %v6348_v16  ;;  %vm747_vm13 = vcmp.eq.s32.totalorder %v6578_v32, %v7950_v3  ;;  %vm490_vm14 = vcmp.eq.s32.totalorder %v6847_v57, %v7954_v4 }
 0x13c   :  { %5779 = vmatpush1.msk.msra.mxu0 %vm810_vm15, %v6348_v16  ;;  %5748 = vmatprep.subr.msk.mxu1 %vm539_vm0, %v6348_v16  ;;  %vm746_vm15 = vcmp.eq.s32.totalorder %v6578_v32, %v7954_v4  ;;  %vm475_vm0 = vcmp.eq.s32.totalorder %v6862_v58, %v7950_v3 }
 0x13d   :  { %5780 = vmatprep.subr.msk.mxu0 %vm795_vm1, %v6348_v16  ;;  %5749 = vmatpush2.msk.msra.mxu1 %vm538_vm2, %v6348_v16  ;;  %vm731_vm1 = vcmp.eq.s32.totalorder %v6596_v34, %v7950_v3  ;;  %vm474_vm2 = vcmp.eq.s32.totalorder %v6862_v58, %v7954_v4 }
 0x13e   :  { %5781 = vmatpush1.msk.msra.mxu0 %vm794_vm3, %v6348_v16  ;;  %5750 = vmatprep.subr.msk.mxu1 %vm523_vm4, %v6348_v16  ;;  %vm730_vm3 = vcmp.eq.s32.totalorder %v6596_v34, %v7954_v4  ;;  %vm459_vm4 = vcmp.eq.s32.totalorder %v6877_v59, %v7950_v3 }
 0x13f   :  { %5782 = vmatprep.subr.msk.mxu0 %vm779_vm5, %v6348_v16  ;;  %5751 = vmatpush2.msk.msra.mxu1 %vm522_vm6, %v6348_v16  ;;  %vm715_vm5 = vcmp.eq.s32.totalorder %v6614_v36, %v7950_v3  ;;  %vm458_vm6 = vcmp.eq.s32.totalorder %v6877_v59, %v7954_v4 }
 0x140   :  { %5783 = vmatpush1.msk.msra.mxu0 %vm778_vm7, %v6348_v16  ;;  %5752 = vmatprep.subr.msk.mxu1 %vm507_vm8, %v6348_v16  ;;  %vm714_vm7 = vcmp.eq.s32.totalorder %v6614_v36, %v7954_v4  ;;  %vm443_vm8 = vcmp.eq.s32.totalorder %v6892_v60, %v7950_v3 }
 0x141   :  { %5784 = vmatprep.subr.msk.mxu0 %vm763_vm9, %v6348_v16  ;;  %5753 = vmatpush2.msk.msra.mxu1 %vm506_vm10, %v6348_v16  ;;  %vm699_vm9 = vcmp.eq.s32.totalorder %v6632_v38, %v7950_v3  ;;  %vm442_vm10 = vcmp.eq.s32.totalorder %v6892_v60, %v7954_v4 }
 0x142   :  { %5785 = vmatpush1.msk.msra.mxu0 %vm762_vm11, %v6348_v16  ;;  %5754 = vmatprep.subr.msk.mxu1 %vm491_vm12, %v6348_v16  ;;  %vm698_vm11 = vcmp.eq.s32.totalorder %v6632_v38, %v7954_v4  ;;  %vm427_vm12 = vcmp.eq.s32.totalorder %v6907_v61, %v7950_v3 }
 0x143   :  { %5786 = vmatprep.subr.msk.mxu0 %vm747_vm13, %v6348_v16  ;;  %5755 = vmatpush2.msk.msra.mxu1 %vm490_vm14, %v6348_v16  ;;  %vm683_vm13 = vcmp.eq.s32.totalorder %v6648_v40, %v7950_v3  ;;  %vm426_vm14 = vcmp.eq.s32.totalorder %v6907_v61, %v7954_v4  ;;  %v3669_v3 = vld [vmem:[#allocation6 + $0x1a0] sm:$0xff] }
 0x144   :  { %5787 = vmatpush1.msk.msra.mxu0 %vm746_vm15, %v6348_v16  ;;  %5756 = vmatprep.subr.msk.mxu1 %vm475_vm0, %v6348_v16  ;;  %vm682_vm15 = vcmp.eq.s32.totalorder %v6648_v40, %v7954_v4  ;;  %vm413_vm0 = vcmp.eq.s32.totalorder %v6391_v5, %v8347_v41  ;;  %v3621_v4 = vld [vmem:[#allocation6 + $0x20] sm:$0xff] }
 0x145   :  { %5788 = vmatprep.subr.msk.mxu0 %vm731_vm1, %v6348_v16  ;;  %5757 = vmatpush2.msk.msra.mxu1 %vm474_vm2, %v6348_v16  ;;  %vm925_vm1 = vcmp.eq.s32.totalorder %v6394_v6, %v8347_v41  ;;  %vm412_vm2 = vcmp.eq.s32.totalorder %v6391_v5, %v8358_v10 }
 0x146   :  { %5789 = vmatpush1.msk.msra.mxu0 %vm730_vm3, %v6348_v16  ;;  %5758 = vmatprep.subr.msk.mxu1 %vm459_vm4, %v6348_v16  ;;  %vm924_vm3 = vcmp.eq.s32.totalorder %v6394_v6, %v8358_v10  ;;  %vm397_vm4 = vcmp.eq.s32.totalorder %v6399_v8, %v8347_v41 }
 0x147   :  { %5790 = vmatprep.subr.msk.mxu0 %vm715_vm5, %v6348_v16  ;;  %5759 = vmatpush2.msk.msra.mxu1 %vm458_vm6, %v6348_v16  ;;  %vm909_vm5 = vcmp.eq.s32.totalorder %v6402_v9, %v8347_v41  ;;  %vm396_vm6 = vcmp.eq.s32.totalorder %v6399_v8, %v8358_v10 }
 0x148   :  { %5791 = vmatpush1.msk.msra.mxu0 %vm714_vm7, %v6348_v16  ;;  %5760 = vmatprep.subr.msk.mxu1 %vm443_vm8, %v6348_v16  ;;  %vm908_vm7 = vcmp.eq.s32.totalorder %v6402_v9, %v8358_v10  ;;  %vm381_vm8 = vcmp.eq.s32.totalorder %v6413_v12, %v8347_v41 }
 0x149   :  { %5792 = vmatprep.subr.msk.mxu0 %vm699_vm9, %v6348_v16  ;;  %5761 = vmatpush2.msk.msra.mxu1 %vm442_vm10, %v6348_v16  ;;  %vm893_vm9 = vcmp.eq.s32.totalorder %v6416_v13, %v8347_v41  ;;  %vm380_vm10 = vcmp.eq.s32.totalorder %v6413_v12, %v8358_v10 }
 0x14a   :  { %5793 = vmatpush1.msk.msra.mxu0 %vm698_vm11, %v6348_v16  ;;  %5762 = vmatprep.subr.msk.mxu1 %vm427_vm12, %v6348_v16  ;;  %vm892_vm11 = vcmp.eq.s32.totalorder %v6416_v13, %v8358_v10  ;;  %vm365_vm12 = vcmp.eq.s32.totalorder %v6419_v14, %v8347_v41 }
 0x14b   :  { %5794 = vmatprep.subr.msk.mxu0 %vm683_vm13, %v6348_v16  ;;  %5763 = vmatpush2.msk.msra.mxu1 %vm426_vm14, %v6348_v16  ;;  %vm877_vm13 = vcmp.eq.s32.totalorder %v6422_v15, %v8347_v41  ;;  %vm364_vm14 = vcmp.eq.s32.totalorder %v6419_v14, %v8358_v10 }
 0x14c   :  { %3255 = vmatprep.mubr.f32.mxu1 %v6941_v62  ;;  %5795 = vmatpush1.msk.msra.mxu0 %vm682_vm15, %v6348_v16  ;;  %vm876_vm15 = vcmp.eq.s32.totalorder %v6422_v15, %v8358_v10 }
 0x14d   :  { %3326 = vmatprep.mubr.f32.mxu0 %v6347_v1  ;;  %3256 = vmatmul.mubr.f32.vlgmr.msra.gmra.mxu1 %v6949_v63 }
 0x14e   :  { %3327 = vmatmul.mubr.f32.vlgmr.msra.gmra.mxu0 %v6705_v47  ;;  %5796 = vmatprep.subr.msk.mxu0 %vm413_vm0, %v6348_v16  ;;  %vm349_vm0 = vcmp.eq.s32.totalorder %v6441_v17, %v8347_v41 }
 0x14f   :  { %5860 = vmatprep.subr.msk.mxu1 %vm925_vm1, %v6348_v16  ;;  %5797 = vmatpush1.msk.msra.mxu0 %vm412_vm2, %v6348_v16  ;;  %vm861_vm1 = vcmp.eq.s32.totalorder %v6452_v18, %v8347_v41  ;;  %vm348_vm2 = vcmp.eq.s32.totalorder %v6441_v17, %v8358_v10 }
 0x150   :  { %5861 = vmatpush1.msk.msra.mxu1 %vm924_vm3, %v6348_v16  ;;  %5798 = vmatprep.subr.msk.mxu0 %vm397_vm4, %v6348_v16  ;;  %vm860_vm3 = vcmp.eq.s32.totalorder %v6452_v18, %v8358_v10  ;;  %vm333_vm4 = vcmp.eq.s32.totalorder %v6467_v19, %v8347_v41 }
 0x151   :  { %5862 = vmatprep.subr.msk.mxu1 %vm909_vm5, %v6348_v16  ;;  %5799 = vmatpush1.msk.msra.mxu0 %vm396_vm6, %v6348_v16  ;;  %vm845_vm5 = vcmp.eq.s32.totalorder %v6470_v20, %v8347_v41  ;;  %vm332_vm6 = vcmp.eq.s32.totalorder %v6467_v19, %v8358_v10 }
 0x152   :  { %5863 = vmatpush1.msk.msra.mxu1 %vm908_vm7, %v6348_v16  ;;  %5800 = vmatprep.subr.msk.mxu0 %vm381_vm8, %v6348_v16  ;;  %vm844_vm7 = vcmp.eq.s32.totalorder %v6470_v20, %v8358_v10  ;;  %vm317_vm8 = vcmp.eq.s32.totalorder %v6485_v21, %v8347_v41 }
 0x153   :  { %5864 = vmatprep.subr.msk.mxu1 %vm893_vm9, %v6348_v16  ;;  %5801 = vmatpush1.msk.msra.mxu0 %vm380_vm10, %v6348_v16  ;;  %vm829_vm9 = vcmp.eq.s32.totalorder %v6488_v22, %v8347_v41  ;;  %vm316_vm10 = vcmp.eq.s32.totalorder %v6485_v21, %v8358_v10 }
 0x154   :  { %5865 = vmatpush1.msk.msra.mxu1 %vm892_vm11, %v6348_v16  ;;  %5802 = vmatprep.subr.msk.mxu0 %vm365_vm12, %v6348_v16  ;;  %vm828_vm11 = vcmp.eq.s32.totalorder %v6488_v22, %v8358_v10  ;;  %vm301_vm12 = vcmp.eq.s32.totalorder %v6503_v23, %v8347_v41 }
 0x155   :  { %5866 = vmatprep.subr.msk.mxu1 %vm877_vm13, %v6348_v16  ;;  %5803 = vmatpush1.msk.msra.mxu0 %vm364_vm14, %v6348_v16  ;;  %vm813_vm13 = vcmp.eq.s32.totalorder %v6506_v24, %v8347_v41  ;;  %vm300_vm14 = vcmp.eq.s32.totalorder %v6503_v23, %v8358_v10 }
 0x156   :  { %5867 = vmatpush1.msk.msra.mxu1 %vm876_vm15, %v6348_v16  ;;  %5804 = vmatprep.subr.msk.mxu0 %vm349_vm0, %v6348_v16  ;;  %vm812_vm15 = vcmp.eq.s32.totalorder %v6506_v24, %v8358_v10  ;;  %vm285_vm0 = vcmp.eq.s32.totalorder %v6521_v25, %v8347_v41 }
 0x157   :  { %5868 = vmatprep.subr.msk.mxu1 %vm861_vm1, %v6348_v16  ;;  %5805 = vmatpush1.msk.msra.mxu0 %vm348_vm2, %v6348_v16  ;;  %vm797_vm1 = vcmp.eq.s32.totalorder %v6524_v26, %v8347_v41  ;;  %vm284_vm2 = vcmp.eq.s32.totalorder %v6521_v25, %v8358_v10 }
 0x158   :  { %5869 = vmatpush1.msk.msra.mxu1 %vm860_vm3, %v6348_v16  ;;  %5806 = vmatprep.subr.msk.mxu0 %vm333_vm4, %v6348_v16  ;;  %vm796_vm3 = vcmp.eq.s32.totalorder %v6524_v26, %v8358_v10  ;;  %vm269_vm4 = vcmp.eq.s32.totalorder %v6539_v27, %v8347_v41 }
 0x159   :  { %5870 = vmatprep.subr.msk.mxu1 %vm845_vm5, %v6348_v16  ;;  %5807 = vmatpush1.msk.msra.mxu0 %vm332_vm6, %v6348_v16  ;;  %vm781_vm5 = vcmp.eq.s32.totalorder %v6542_v28, %v8347_v41  ;;  %vm268_vm6 = vcmp.eq.s32.totalorder %v6539_v27, %v8358_v10 }
 0x15a   :  { %5871 = vmatpush1.msk.msra.mxu1 %vm844_vm7, %v6348_v16  ;;  %5808 = vmatprep.subr.msk.mxu0 %vm317_vm8, %v6348_v16  ;;  %vm780_vm7 = vcmp.eq.s32.totalorder %v6542_v28, %v8358_v10  ;;  %vm253_vm8 = vcmp.eq.s32.totalorder %v6557_v29, %v8347_v41 }
 0x15b   :  { %5872 = vmatprep.subr.msk.mxu1 %vm829_vm9, %v6348_v16  ;;  %5809 = vmatpush1.msk.msra.mxu0 %vm316_vm10, %v6348_v16  ;;  %vm765_vm9 = vcmp.eq.s32.totalorder %v6560_v30, %v8347_v41  ;;  %vm252_vm10 = vcmp.eq.s32.totalorder %v6557_v29, %v8358_v10 }
 0x15c   :  { %5873 = vmatpush1.msk.msra.mxu1 %vm828_vm11, %v6348_v16  ;;  %5810 = vmatprep.subr.msk.mxu0 %vm301_vm12, %v6348_v16  ;;  %vm764_vm11 = vcmp.eq.s32.totalorder %v6560_v30, %v8358_v10  ;;  %vm237_vm12 = vcmp.eq.s32.totalorder %v6575_v31, %v8347_v41 }
 0x15d   :  { %5874 = vmatprep.subr.msk.mxu1 %vm813_vm13, %v6348_v16  ;;  %5811 = vmatpush1.msk.msra.mxu0 %vm300_vm14, %v6348_v16  ;;  %vm749_vm13 = vcmp.eq.s32.totalorder %v6578_v32, %v8347_v41  ;;  %vm236_vm14 = vcmp.eq.s32.totalorder %v6575_v31, %v8358_v10 }
 0x15e   :  { %5875 = vmatpush1.msk.msra.mxu1 %vm812_vm15, %v6348_v16  ;;  %5812 = vmatprep.subr.msk.mxu0 %vm285_vm0, %v6348_v16  ;;  %vm748_vm15 = vcmp.eq.s32.totalorder %v6578_v32, %v8358_v10  ;;  %vm221_vm0 = vcmp.eq.s32.totalorder %v6593_v33, %v8347_v41 }
 0x15f   :  { %5876 = vmatprep.subr.msk.mxu1 %vm797_vm1, %v6348_v16  ;;  %5813 = vmatpush1.msk.msra.mxu0 %vm284_vm2, %v6348_v16  ;;  %vm733_vm1 = vcmp.eq.s32.totalorder %v6596_v34, %v8347_v41  ;;  %vm220_vm2 = vcmp.eq.s32.totalorder %v6593_v33, %v8358_v10 }
 0x160   :  { %5877 = vmatpush1.msk.msra.mxu1 %vm796_vm3, %v6348_v16  ;;  %5814 = vmatprep.subr.msk.mxu0 %vm269_vm4, %v6348_v16  ;;  %vm732_vm3 = vcmp.eq.s32.totalorder %v6596_v34, %v8358_v10  ;;  %vm205_vm4 = vcmp.eq.s32.totalorder %v6611_v35, %v8347_v41 }
 0x161   :  { %5878 = vmatprep.subr.msk.mxu1 %vm781_vm5, %v6348_v16  ;;  %5815 = vmatpush1.msk.msra.mxu0 %vm268_vm6, %v6348_v16  ;;  %vm717_vm5 = vcmp.eq.s32.totalorder %v6614_v36, %v8347_v41  ;;  %vm204_vm6 = vcmp.eq.s32.totalorder %v6611_v35, %v8358_v10 }
 0x162   :  { %5879 = vmatpush1.msk.msra.mxu1 %vm780_vm7, %v6348_v16  ;;  %5816 = vmatprep.subr.msk.mxu0 %vm253_vm8, %v6348_v16  ;;  %vm716_vm7 = vcmp.eq.s32.totalorder %v6614_v36, %v8358_v10  ;;  %vm189_vm8 = vcmp.eq.s32.totalorder %v6629_v37, %v8347_v41 }
 0x163   :  { %5880 = vmatprep.subr.msk.mxu1 %vm765_vm9, %v6348_v16  ;;  %5817 = vmatpush1.msk.msra.mxu0 %vm252_vm10, %v6348_v16  ;;  %vm701_vm9 = vcmp.eq.s32.totalorder %v6632_v38, %v8347_v41  ;;  %vm188_vm10 = vcmp.eq.s32.totalorder %v6629_v37, %v8358_v10 }
 0x164   :  { %5881 = vmatpush1.msk.msra.mxu1 %vm764_vm11, %v6348_v16  ;;  %5818 = vmatprep.subr.msk.mxu0 %vm237_vm12, %v6348_v16  ;;  %vm700_vm11 = vcmp.eq.s32.totalorder %v6632_v38, %v8358_v10  ;;  %vm173_vm12 = vcmp.eq.s32.totalorder %v6382_v2, %v8347_v41 }
 0x165   :  { %5882 = vmatprep.subr.msk.mxu1 %vm749_vm13, %v6348_v16  ;;  %5819 = vmatpush1.msk.msra.mxu0 %vm236_vm14, %v6348_v16  ;;  %vm685_vm13 = vcmp.eq.s32.totalorder %v6648_v40, %v8347_v41  ;;  %vm172_vm14 = vcmp.eq.s32.totalorder %v6382_v2, %v8358_v10 }
 0x166   :  { %5883 = vmatpush1.msk.msra.mxu1 %vm748_vm15, %v6348_v16  ;;  %5820 = vmatprep.subr.msk.mxu0 %vm221_vm0, %v6348_v16  ;;  %vm684_vm15 = vcmp.eq.s32.totalorder %v6648_v40, %v8358_v10  ;;  %vm669_vm0 = vcmp.eq.s32.totalorder %v6666_v42, %v8347_v41 }
 0x167   :  { %5884 = vmatprep.subr.msk.mxu1 %vm733_vm1, %v6348_v16  ;;  %5821 = vmatpush1.msk.msra.mxu0 %vm220_vm2, %v6348_v16  ;;  %vm415_vm1 = vcmp.eq.s32.totalorder %v6391_v5, %v8552_v43  ;;  %vm668_vm2 = vcmp.eq.s32.totalorder %v6666_v42, %v8358_v10 }
 0x168   :  { %5885 = vmatpush1.msk.msra.mxu1 %vm732_vm3, %v6348_v16  ;;  %5822 = vmatprep.subr.msk.mxu0 %vm205_vm4, %v6348_v16  ;;  %vm414_vm3 = vcmp.eq.s32.totalorder %v6391_v5, %v8562_v45  ;;  %vm653_vm4 = vcmp.eq.s32.totalorder %v6695_v46, %v8347_v41  ;;  %v8912_v5 = vpop.f32.mrf.mxu0 }
 0x169   :  { %5886 = vmatprep.subr.msk.mxu1 %vm717_vm5, %v6348_v16  ;;  %5823 = vmatpush1.msk.msra.mxu0 %vm204_vm6, %v6348_v16  ;;  %vm399_vm5 = vcmp.eq.s32.totalorder %v6399_v8, %v8552_v43  ;;  %vm652_vm6 = vcmp.eq.s32.totalorder %v6695_v46, %v8358_v10 }
 0x16a   :  { %5887 = vmatpush1.msk.msra.mxu1 %vm716_vm7, %v6348_v16  ;;  %5824 = vmatprep.subr.msk.mxu0 %vm189_vm8, %v6348_v16  ;;  %vm398_vm7 = vcmp.eq.s32.totalorder %v6399_v8, %v8562_v45  ;;  %vm637_vm8 = vcmp.eq.s32.totalorder %v6712_v48, %v8347_v41  ;;  %v2549_v8 = vpop.f32.mrf.mxu0 }
 0x16b   :  { %5888 = vmatprep.subr.msk.mxu1 %vm701_vm9, %v6348_v16  ;;  %5825 = vmatpush1.msk.msra.mxu0 %vm188_vm10, %v6348_v16  ;;  %vm383_vm9 = vcmp.eq.s32.totalorder %v6413_v12, %v8552_v43  ;;  %vm636_vm10 = vcmp.eq.s32.totalorder %v6712_v48, %v8358_v10 }
 0x16c   :  { %5889 = vmatpush1.msk.msra.mxu1 %vm700_vm11, %v6348_v16  ;;  %5826 = vmatprep.subr.msk.mxu0 %vm173_vm12, %v6348_v16  ;;  %vm382_vm11 = vcmp.eq.s32.totalorder %v6413_v12, %v8562_v45  ;;  %vm621_vm12 = vcmp.eq.s32.totalorder %v6727_v49, %v8347_v41  ;;  %v8952_v12 = vpop.f32.mrf.mxu0 }
 0x16d   :  { %5890 = vmatprep.subr.msk.mxu1 %vm685_vm13, %v6348_v16  ;;  %5827 = vmatpush1.msk.msra.mxu0 %vm172_vm14, %v6348_v16  ;;  %vm367_vm13 = vcmp.eq.s32.totalorder %v6419_v14, %v8552_v43  ;;  %vm620_vm14 = vcmp.eq.s32.totalorder %v6727_v49, %v8358_v10 }
 0x16e   :  { %5891 = vmatpush1.msk.msra.mxu1 %vm684_vm15, %v6348_v16  ;;  %3468 = vmatprep.mubr.f32.mxu1 %v6347_v1  ;;  %vm366_vm15 = vcmp.eq.s32.totalorder %v6419_v14, %v8562_v45 }
 0x16f   :  { %5828 = vmatprep.subr.msk.mxu0 %vm669_vm0, %v6348_v16  ;;  %3469 = vmatmul.mubr.f32.vlgmr.msra.gmra.mxu1 %v6705_v47  ;;  %vm605_vm0 = vcmp.eq.s32.totalorder %v6742_v50, %v8347_v41 }
 0x170   :  { %5892 = vmatprep.subr.msk.mxu1 %vm415_vm1, %v6348_v16  ;;  %5829 = vmatpush2.msk.msra.mxu0 %vm668_vm2, %v6348_v16  ;;  %vm351_vm1 = vcmp.eq.s32.totalorder %v6441_v17, %v8552_v43  ;;  %vm604_vm2 = vcmp.eq.s32.totalorder %v6742_v50, %v8358_v10 }
 0x171   :  { %5893 = vmatpush1.msk.msra.mxu1 %vm414_vm3, %v6348_v16  ;;  %5830 = vmatprep.subr.msk.mxu0 %vm653_vm4, %v6348_v16  ;;  %vm350_vm3 = vcmp.eq.s32.totalorder %v6441_v17, %v8562_v45  ;;  %vm589_vm4 = vcmp.eq.s32.totalorder %v6757_v51, %v8347_v41  ;;  %v3680_v17 = vld [vmem:[#allocation6 + $0x1f8] sm:$0xff] }
 0x172   :  { %5894 = vmatprep.subr.msk.mxu1 %vm399_vm5, %v6348_v16  ;;  %5831 = vmatpush2.msk.msra.mxu0 %vm652_vm6, %v6348_v16  ;;  %vm335_vm5 = vcmp.eq.s32.totalorder %v6467_v19, %v8552_v43  ;;  %vm588_vm6 = vcmp.eq.s32.totalorder %v6757_v51, %v8358_v10 }
 0x173   :  { %5895 = vmatpush1.msk.msra.mxu1 %vm398_vm7, %v6348_v16  ;;  %5832 = vmatprep.subr.msk.mxu0 %vm637_vm8, %v6348_v16  ;;  %vm334_vm7 = vcmp.eq.s32.totalorder %v6467_v19, %v8562_v45  ;;  %vm573_vm8 = vcmp.eq.s32.totalorder %v6772_v52, %v8347_v41  ;;  %v3664_v19 = vld [vmem:[#allocation6 + $0x178] sm:$0xff] }
 0x174   :  { %5896 = vmatprep.subr.msk.mxu1 %vm383_vm9, %v6348_v16  ;;  %5833 = vmatpush2.msk.msra.mxu0 %vm636_vm10, %v6348_v16  ;;  %vm319_vm9 = vcmp.eq.s32.totalorder %v6485_v21, %v8552_v43  ;;  %vm572_vm10 = vcmp.eq.s32.totalorder %v6772_v52, %v8358_v10 }
 0x175   :  { %5897 = vmatpush1.msk.msra.mxu1 %vm382_vm11, %v6348_v16  ;;  %5834 = vmatprep.subr.msk.mxu0 %vm621_vm12, %v6348_v16  ;;  %vm318_vm11 = vcmp.eq.s32.totalorder %v6485_v21, %v8562_v45  ;;  %vm557_vm12 = vcmp.eq.s32.totalorder %v6787_v53, %v8347_v41  ;;  %v3647_v21 = vld [vmem:[#allocation6 + $0xf0] sm:$0xff] }
 0x176   :  { %5898 = vmatprep.subr.msk.mxu1 %vm367_vm13, %v6348_v16  ;;  %5835 = vmatpush2.msk.msra.mxu0 %vm620_vm14, %v6348_v16  ;;  %vm303_vm13 = vcmp.eq.s32.totalorder %v6503_v23, %v8552_v43  ;;  %vm556_vm14 = vcmp.eq.s32.totalorder %v6787_v53, %v8358_v10 }
 0x177   :  { %5899 = vmatpush1.msk.msra.mxu1 %vm366_vm15, %v6348_v16  ;;  %5836 = vmatprep.subr.msk.mxu0 %vm605_vm0, %v6348_v16  ;;  %vm302_vm15 = vcmp.eq.s32.totalorder %v6503_v23, %v8562_v45  ;;  %vm541_vm0 = vcmp.eq.s32.totalorder %v6802_v54, %v8347_v41  ;;  %v3679_v23 = vld [vmem:[#allocation6 + $0x1f0] sm:$0xff] }
 0x178   :  { %5900 = vmatprep.subr.msk.mxu1 %vm351_vm1, %v6348_v16  ;;  %5837 = vmatpush2.msk.msra.mxu0 %vm604_vm2, %v6348_v16  ;;  %vm287_vm1 = vcmp.eq.s32.totalorder %v6521_v25, %v8552_v43  ;;  %vm540_vm2 = vcmp.eq.s32.totalorder %v6802_v54, %v8358_v10 }
 0x179   :  { %5901 = vmatpush1.msk.msra.mxu1 %vm350_vm3, %v6348_v16  ;;  %5838 = vmatprep.subr.msk.mxu0 %vm589_vm4, %v6348_v16  ;;  %vm286_vm3 = vcmp.eq.s32.totalorder %v6521_v25, %v8562_v45  ;;  %vm525_vm4 = vcmp.eq.s32.totalorder %v6817_v55, %v8347_v41  ;;  %v3646_v25 = vld [vmem:[#allocation6 + $0xe8] sm:$0xff] }
 0x17a   :  { %5902 = vmatprep.subr.msk.mxu1 %vm335_vm5, %v6348_v16  ;;  %5839 = vmatpush2.msk.msra.mxu0 %vm588_vm6, %v6348_v16  ;;  %vm271_vm5 = vcmp.eq.s32.totalorder %v6539_v27, %v8552_v43  ;;  %vm524_vm6 = vcmp.eq.s32.totalorder %v6817_v55, %v8358_v10 }
 0x17b   :  { %5903 = vmatpush1.msk.msra.mxu1 %vm334_vm7, %v6348_v16  ;;  %5840 = vmatprep.subr.msk.mxu0 %vm573_vm8, %v6348_v16  ;;  %vm270_vm7 = vcmp.eq.s32.totalorder %v6539_v27, %v8562_v45  ;;  %vm509_vm8 = vcmp.eq.s32.totalorder %v6832_v56, %v8347_v41  ;;  %v3662_v27 = vld [vmem:[#allocation6 + $0x168] sm:$0xff] }
 0x17c   :  { %5904 = vmatprep.subr.msk.mxu1 %vm319_vm9, %v6348_v16  ;;  %5841 = vmatpush2.msk.msra.mxu0 %vm572_vm10, %v6348_v16  ;;  %vm255_vm9 = vcmp.eq.s32.totalorder %v6557_v29, %v8552_v43  ;;  %vm508_vm10 = vcmp.eq.s32.totalorder %v6832_v56, %v8358_v10 }
 0x17d   :  { %5905 = vmatpush1.msk.msra.mxu1 %vm318_vm11, %v6348_v16  ;;  %5842 = vmatprep.subr.msk.mxu0 %vm557_vm12, %v6348_v16  ;;  %vm254_vm11 = vcmp.eq.s32.totalorder %v6557_v29, %v8562_v45  ;;  %vm493_vm12 = vcmp.eq.s32.totalorder %v6847_v57, %v8347_v41  ;;  %v3677_v29 = vld [vmem:[#allocation6 + $0x1e0] sm:$0xff] }
 0x17e   :  { %5906 = vmatprep.subr.msk.mxu1 %vm303_vm13, %v6348_v16  ;;  %5843 = vmatpush2.msk.msra.mxu0 %vm556_vm14, %v6348_v16  ;;  %vm239_vm13 = vcmp.eq.s32.totalorder %v6575_v31, %v8552_v43  ;;  %vm492_vm14 = vcmp.eq.s32.totalorder %v6847_v57, %v8358_v10 }
 0x17f   :  { %5907 = vmatpush1.msk.msra.mxu1 %vm302_vm15, %v6348_v16  ;;  %5844 = vmatprep.subr.msk.mxu0 %vm541_vm0, %v6348_v16  ;;  %vm238_vm15 = vcmp.eq.s32.totalorder %v6575_v31, %v8562_v45  ;;  %vm477_vm0 = vcmp.eq.s32.totalorder %v6862_v58, %v8347_v41  ;;  %v3661_v31 = vld [vmem:[#allocation6 + $0x160] sm:$0xff] }
 0x180   :  { %5908 = vmatprep.subr.msk.mxu1 %vm287_vm1, %v6348_v16  ;;  %5845 = vmatpush2.msk.msra.mxu0 %vm540_vm2, %v6348_v16  ;;  %vm223_vm1 = vcmp.eq.s32.totalorder %v6593_v33, %v8552_v43  ;;  %vm476_vm2 = vcmp.eq.s32.totalorder %v6862_v58, %v8358_v10 }
 0x181   :  { %5909 = vmatpush1.msk.msra.mxu1 %vm286_vm3, %v6348_v16  ;;  %5846 = vmatprep.subr.msk.mxu0 %vm525_vm4, %v6348_v16  ;;  %vm222_vm3 = vcmp.eq.s32.totalorder %v6593_v33, %v8562_v45  ;;  %vm461_vm4 = vcmp.eq.s32.totalorder %v6877_v59, %v8347_v41  ;;  %v3676_v33 = vld [vmem:[#allocation6 + $0x1d8] sm:$0xff] }
 0x182   :  { %5910 = vmatprep.subr.msk.mxu1 %vm271_vm5, %v6348_v16  ;;  %5847 = vmatpush2.msk.msra.mxu0 %vm524_vm6, %v6348_v16  ;;  %vm207_vm5 = vcmp.eq.s32.totalorder %v6611_v35, %v8552_v43  ;;  %vm460_vm6 = vcmp.eq.s32.totalorder %v6877_v59, %v8358_v10 }
 0x183   :  { %5911 = vmatpush1.msk.msra.mxu1 %vm270_vm7, %v6348_v16  ;;  %5848 = vmatprep.subr.msk.mxu0 %vm509_vm8, %v6348_v16  ;;  %vm206_vm7 = vcmp.eq.s32.totalorder %v6611_v35, %v8562_v45  ;;  %vm445_vm8 = vcmp.eq.s32.totalorder %v6892_v60, %v8347_v41  ;;  %v3660_v35 = vld [vmem:[#allocation6 + $0x158] sm:$0xff] }
 0x184   :  { %5912 = vmatprep.subr.msk.mxu1 %vm255_vm9, %v6348_v16  ;;  %5849 = vmatpush2.msk.msra.mxu0 %vm508_vm10, %v6348_v16  ;;  %vm191_vm9 = vcmp.eq.s32.totalorder %v6629_v37, %v8552_v43  ;;  %vm444_vm10 = vcmp.eq.s32.totalorder %v6892_v60, %v8358_v10 }
 0x185   :  { %5913 = vmatpush1.msk.msra.mxu1 %vm254_vm11, %v6348_v16  ;;  %5850 = vmatprep.subr.msk.mxu0 %vm493_vm12, %v6348_v16  ;;  %vm190_vm11 = vcmp.eq.s32.totalorder %v6629_v37, %v8562_v45  ;;  %vm429_vm12 = vcmp.eq.s32.totalorder %v6907_v61, %v8347_v41  ;;  %v3675_v37 = vld [vmem:[#allocation6 + $0x1d0] sm:$0xff] }
 0x186   :  { %5914 = vmatprep.subr.msk.mxu1 %vm239_vm13, %v6348_v16  ;;  %5851 = vmatpush2.msk.msra.mxu0 %vm492_vm14, %v6348_v16  ;;  %vm175_vm13 = vcmp.eq.s32.totalorder %v6382_v2, %v8552_v43  ;;  %vm428_vm14 = vcmp.eq.s32.totalorder %v6907_v61, %v8358_v10  ;;  %v3636_v10 = vld [vmem:[#allocation6 + $0x98] sm:$0xff] }
 0x187   :  { %5915 = vmatpush1.msk.msra.mxu1 %vm238_vm15, %v6348_v16  ;;  %5852 = vmatprep.subr.msk.mxu0 %vm477_vm0, %v6348_v16  ;;  %vm174_vm15 = vcmp.eq.s32.totalorder %v6382_v2, %v8562_v45  ;;  %vm671_vm0 = vcmp.eq.s32.totalorder %v6666_v42, %v8552_v43  ;;  %v8910_v2 = vpop.f32.mrf.mxu1 }
 0x188   :  { %5916 = vmatprep.subr.msk.mxu1 %vm223_vm1, %v6348_v16  ;;  %5853 = vmatpush2.msk.msra.mxu0 %vm476_vm2, %v6348_v16  ;;  %vm927_vm1 = vcmp.eq.s32.totalorder %v6394_v6, %v8552_v43  ;;  %vm670_vm2 = vcmp.eq.s32.totalorder %v6666_v42, %v8562_v45  ;;  %v3642_v42 = vld [vmem:[#allocation6 + $0xc8] sm:$0xff] }
 0x189   :  { %5917 = vmatpush1.msk.msra.mxu1 %vm222_vm3, %v6348_v16  ;;  %5854 = vmatprep.subr.msk.mxu0 %vm461_vm4, %v6348_v16  ;;  %vm926_vm3 = vcmp.eq.s32.totalorder %v6394_v6, %v8562_v45  ;;  %vm655_vm4 = vcmp.eq.s32.totalorder %v6695_v46, %v8552_v43  ;;  %v2620_v6 = vpop.f32.mrf.mxu1 }
 0x18a   :  { %5918 = vmatprep.subr.msk.mxu1 %vm207_vm5, %v6348_v16  ;;  %5855 = vmatpush2.msk.msra.mxu0 %vm460_vm6, %v6348_v16  ;;  %vm911_vm5 = vcmp.eq.s32.totalorder %v6402_v9, %v8552_v43  ;;  %vm654_vm6 = vcmp.eq.s32.totalorder %v6695_v46, %v8562_v45  ;;  %v3674_v46 = vld [vmem:[#allocation6 + $0x1c8] sm:$0xff] }
 0x18b   :  { %5919 = vmatpush1.msk.msra.mxu1 %vm206_vm7, %v6348_v16  ;;  %5856 = vmatprep.subr.msk.mxu0 %vm445_vm8, %v6348_v16  ;;  %vm910_vm7 = vcmp.eq.s32.totalorder %v6402_v9, %v8562_v45  ;;  %vm639_vm8 = vcmp.eq.s32.totalorder %v6712_v48, %v8552_v43  ;;  %v8950_v9 = vpop.f32.mrf.mxu1 }
 0x18c   :  { %5920 = vmatprep.subr.msk.mxu1 %vm191_vm9, %v6348_v16  ;;  %5857 = vmatpush2.msk.msra.mxu0 %vm444_vm10, %v6348_v16  ;;  %vm895_vm9 = vcmp.eq.s32.totalorder %v6416_v13, %v8552_v43  ;;  %vm638_vm10 = vcmp.eq.s32.totalorder %v6712_v48, %v8562_v45  ;;  %v3658_v48 = vld [vmem:[#allocation6 + $0x148] sm:$0xff] }
 0x18d   :  { %5921 = vmatpush1.msk.msra.mxu1 %vm190_vm11, %v6348_v16  ;;  %5858 = vmatprep.subr.msk.mxu0 %vm429_vm12, %v6348_v16  ;;  %vm894_vm11 = vcmp.eq.s32.totalorder %v6416_v13, %v8562_v45  ;;  %vm623_vm12 = vcmp.eq.s32.totalorder %v6727_v49, %v8552_v43  ;;  %v3648_v13 = vld [vmem:[#allocation6 + $0xf8] sm:$0xff]  ;;  %v2691_v14 = vpop.f32.mrf.mxu1 }
 0x18e   :  { %5922 = vmatprep.subr.msk.mxu1 %vm175_vm13, %v6348_v16  ;;  %5859 = vmatpush2.msk.msra.mxu0 %vm428_vm14, %v6348_v16  ;;  %vm879_vm13 = vcmp.eq.s32.totalorder %v6422_v15, %v8552_v43  ;;  %vm622_vm14 = vcmp.eq.s32.totalorder %v6727_v49, %v8562_v45  ;;  %v3641_v49 = vld [vmem:[#allocation6 + $0xc0] sm:$0xff] }
 0x18f   :  { %3397 = vmatprep.mubr.f32.mxu0 %v6941_v62  ;;  %5923 = vmatpush1.msk.msra.mxu1 %vm174_vm15, %v6348_v16  ;;  %vm878_vm15 = vcmp.eq.s32.totalorder %v6422_v15, %v8562_v45  ;;  %v2762_v15 = vpop.f32.mrf.mxu0  ;;  %v8973_v39 = vpop.f32.mrf.mxu1 }
 0x190   :  { %3398 = vmatmul.mubr.f32.vlgmr.msra.gmra.mxu0 %v6949_v63  ;;  %5924 = vmatprep.subr.msk.mxu1 %vm671_vm0, %v6348_v16  ;;  %vm607_vm0 = vcmp.eq.s32.totalorder %v6742_v50, %v8552_v43 }
 0x191   :  { %5956 = vmatprep.subr.msk.mxu0 %vm927_vm1, %v6348_v16  ;;  %5925 = vmatpush2.msk.msra.mxu1 %vm670_vm2, %v6348_v16  ;;  %vm863_vm1 = vcmp.eq.s32.totalorder %v6452_v18, %v8552_v43  ;;  %vm606_vm2 = vcmp.eq.s32.totalorder %v6742_v50, %v8562_v45  ;;  %v3673_v50 = vld [vmem:[#allocation6 + $0x1c0] sm:$0xff]  ;;  %v8975_v41 = vpop.f32.mrf.mxu0 }
 0x192   :  { %5957 = vmatpush1.msk.msra.mxu0 %vm926_vm3, %v6348_v16  ;;  %5926 = vmatprep.subr.msk.mxu1 %vm655_vm4, %v6348_v16  ;;  %vm862_vm3 = vcmp.eq.s32.totalorder %v6452_v18, %v8562_v45  ;;  %vm591_vm4 = vcmp.eq.s32.totalorder %v6757_v51, %v8552_v43  ;;  %v3632_v18 = vld [vmem:[#allocation6 + $0x78] sm:$0xff] }
 0x193   :  { %5958 = vmatprep.subr.msk.mxu0 %vm911_vm5, %v6348_v16  ;;  %5927 = vmatpush2.msk.msra.mxu1 %vm654_vm6, %v6348_v16  ;;  %vm847_vm5 = vcmp.eq.s32.totalorder %v6470_v20, %v8552_v43  ;;  %vm590_vm6 = vcmp.eq.s32.totalorder %v6757_v51, %v8562_v45  ;;  %v3625_v51 = vld [vmem:[#allocation6 + $0x40] sm:$0xff] }
 0x194   :  { %5959 = vmatpush1.msk.msra.mxu0 %vm910_vm7, %v6348_v16  ;;  %5928 = vmatprep.subr.msk.mxu1 %vm639_vm8, %v6348_v16  ;;  %vm846_vm7 = vcmp.eq.s32.totalorder %v6470_v20, %v8562_v45  ;;  %vm575_vm8 = vcmp.eq.s32.totalorder %v6772_v52, %v8552_v43  ;;  %v2621_v20 = vadd.f32 %v2620_v6, %v2549_v8  ;;  %v3635_v6 = vld [vmem:[#allocation6 + $0x90] sm:$0xff] }
 0x195   :  { %5960 = vmatprep.subr.msk.mxu0 %vm895_vm9, %v6348_v16  ;;  %5929 = vmatpush2.msk.msra.mxu1 %vm638_vm10, %v6348_v16  ;;  %vm831_vm9 = vcmp.eq.s32.totalorder %v6488_v22, %v8552_v43  ;;  %vm574_vm10 = vcmp.eq.s32.totalorder %v6772_v52, %v8562_v45  ;;  %v3657_v52 = vld [vmem:[#allocation6 + $0x140] sm:$0xff]  ;;  %v3667_v8 = vld [vmem:[#allocation6 + $0x190] sm:$0xff] }
 0x196   :  { %5961 = vmatpush1.msk.msra.mxu0 %vm894_vm11, %v6348_v16  ;;  %5930 = vmatprep.subr.msk.mxu1 %vm623_vm12, %v6348_v16  ;;  %vm830_vm11 = vcmp.eq.s32.totalorder %v6488_v22, %v8562_v45  ;;  %vm559_vm12 = vcmp.eq.s32.totalorder %v6787_v53, %v8552_v43  ;;  %v2763_v22 = vadd.f32 %v2762_v15, %v2691_v14  ;;  %v2904_v14 = vpop.f32.mrf.mxu1  ;;  %v2833_v15 = vpop.f32.mrf.mxu0 }
 0x197   :  { %5962 = vmatprep.subr.msk.mxu0 %vm879_vm13, %v6348_v16  ;;  %5931 = vmatpush2.msk.msra.mxu1 %vm622_vm14, %v6348_v16  ;;  %vm815_vm13 = vcmp.eq.s32.totalorder %v6506_v24, %v8552_v43  ;;  %vm558_vm14 = vcmp.eq.s32.totalorder %v6787_v53, %v8562_v45  ;;  %v3640_v53 = vld [vmem:[#allocation6 + $0xb8] sm:$0xff] }
 0x198   :  { %5963 = vmatpush1.msk.msra.mxu0 %vm878_vm15, %v6348_v16  ;;  %5932 = vmatprep.subr.msk.mxu1 %vm607_vm0, %v6348_v16  ;;  %vm814_vm15 = vcmp.eq.s32.totalorder %v6506_v24, %v8562_v45  ;;  %vm543_vm0 = vcmp.eq.s32.totalorder %v6802_v54, %v8552_v43  ;;  %v3631_v24 = vld [vmem:[#allocation6 + $0x70] sm:$0xff] }
 0x199   :  { %5964 = vmatprep.subr.msk.mxu0 %vm863_vm1, %v6348_v16  ;;  %5933 = vmatpush2.msk.msra.mxu1 %vm606_vm2, %v6348_v16  ;;  %vm799_vm1 = vcmp.eq.s32.totalorder %v6524_v26, %v8552_v43  ;;  %vm542_vm2 = vcmp.eq.s32.totalorder %v6802_v54, %v8562_v45  ;;  %v3672_v54 = vld [vmem:[#allocation6 + $0x1b8] sm:$0xff] }
 0x19a   :  { %5965 = vmatpush1.msk.msra.mxu0 %vm862_vm3, %v6348_v16  ;;  %5934 = vmatprep.subr.msk.mxu1 %vm591_vm4, %v6348_v16  ;;  %vm798_vm3 = vcmp.eq.s32.totalorder %v6524_v26, %v8562_v45  ;;  %vm527_vm4 = vcmp.eq.s32.totalorder %v6817_v55, %v8552_v43  ;;  %v3630_v26 = vld [vmem:[#allocation6 + $0x68] sm:$0xff] }
 0x19b   :  { %5966 = vmatprep.subr.msk.mxu0 %vm847_vm5, %v6348_v16  ;;  %5935 = vmatpush2.msk.msra.mxu1 %vm590_vm6, %v6348_v16  ;;  %vm783_vm5 = vcmp.eq.s32.totalorder %v6542_v28, %v8552_v43  ;;  %vm526_vm6 = vcmp.eq.s32.totalorder %v6817_v55, %v8562_v45  ;;  %v3624_v55 = vld [vmem:[#allocation6 + $0x38] sm:$0xff] }
 0x19c   :  { %5967 = vmatpush1.msk.msra.mxu0 %vm846_vm7, %v6348_v16  ;;  %5936 = vmatprep.subr.msk.mxu1 %vm575_vm8, %v6348_v16  ;;  %vm782_vm7 = vcmp.eq.s32.totalorder %v6542_v28, %v8562_v45  ;;  %vm511_vm8 = vcmp.eq.s32.totalorder %v6832_v56, %v8552_v43  ;;  %v3645_v28 = vld [vmem:[#allocation6 + $0xe0] sm:$0xff] }
 0x19d   :  { %5968 = vmatprep.subr.msk.mxu0 %vm831_vm9, %v6348_v16  ;;  %5937 = vmatpush2.msk.msra.mxu1 %vm574_vm10, %v6348_v16  ;;  %vm767_vm9 = vcmp.eq.s32.totalorder %v6560_v30, %v8552_v43  ;;  %vm510_vm10 = vcmp.eq.s32.totalorder %v6832_v56, %v8562_v45  ;;  %v3656_v56 = vld [vmem:[#allocation6 + $0x138] sm:$0xff] }
 0x19e   :  { %5969 = vmatpush1.msk.msra.mxu0 %vm830_vm11, %v6348_v16  ;;  %5938 = vmatprep.subr.msk.mxu1 %vm559_vm12, %v6348_v16  ;;  %vm766_vm11 = vcmp.eq.s32.totalorder %v6560_v30, %v8562_v45  ;;  %vm495_vm12 = vcmp.eq.s32.totalorder %v6847_v57, %v8552_v43  ;;  %v3629_v30 = vld [vmem:[#allocation6 + $0x60] sm:$0xff] }
 0x19f   :  { %5970 = vmatprep.subr.msk.mxu0 %vm815_vm13, %v6348_v16  ;;  %5939 = vmatpush2.msk.msra.mxu1 %vm558_vm14, %v6348_v16  ;;  %vm751_vm13 = vcmp.eq.s32.totalorder %v6578_v32, %v8552_v43  ;;  %vm494_vm14 = vcmp.eq.s32.totalorder %v6847_v57, %v8562_v45  ;;  %v3639_v57 = vld [vmem:[#allocation6 + $0xb0] sm:$0xff] }
 0x1a0   :  { %5971 = vmatpush1.msk.msra.mxu0 %vm814_vm15, %v6348_v16  ;;  %5940 = vmatprep.subr.msk.mxu1 %vm543_vm0, %v6348_v16  ;;  %vm750_vm15 = vcmp.eq.s32.totalorder %v6578_v32, %v8562_v45  ;;  %vm479_vm0 = vcmp.eq.s32.totalorder %v6862_v58, %v8552_v43  ;;  %v3644_v32 = vld [vmem:[#allocation6 + $0xd8] sm:$0xff] }
 0x1a1   :  { %5972 = vmatprep.subr.msk.mxu0 %vm799_vm1, %v6348_v16  ;;  %5941 = vmatpush2.msk.msra.mxu1 %vm542_vm2, %v6348_v16  ;;  %vm735_vm1 = vcmp.eq.s32.totalorder %v6596_v34, %v8552_v43  ;;  %vm478_vm2 = vcmp.eq.s32.totalorder %v6862_v58, %v8562_v45  ;;  %v3671_v58 = vld [vmem:[#allocation6 + $0x1b0] sm:$0xff] }
 0x1a2   :  { %5973 = vmatpush1.msk.msra.mxu0 %vm798_vm3, %v6348_v16  ;;  %5942 = vmatprep.subr.msk.mxu1 %vm527_vm4, %v6348_v16  ;;  %vm734_vm3 = vcmp.eq.s32.totalorder %v6596_v34, %v8562_v45  ;;  %vm463_vm4 = vcmp.eq.s32.totalorder %v6877_v59, %v8552_v43  ;;  %v3628_v34 = vld [vmem:[#allocation6 + $0x58] sm:$0xff] }
 0x1a3   :  { %5974 = vmatprep.subr.msk.mxu0 %vm783_vm5, %v6348_v16  ;;  %5943 = vmatpush2.msk.msra.mxu1 %vm526_vm6, %v6348_v16  ;;  %vm719_vm5 = vcmp.eq.s32.totalorder %v6614_v36, %v8552_v43  ;;  %vm462_vm6 = vcmp.eq.s32.totalorder %v6877_v59, %v8562_v45  ;;  %v3623_v59 = vld [vmem:[#allocation6 + $0x30] sm:$0xff] }
 0x1a4   :  { %5975 = vmatpush1.msk.msra.mxu0 %vm782_vm7, %v6348_v16  ;;  %5944 = vmatprep.subr.msk.mxu1 %vm511_vm8, %v6348_v16  ;;  %vm718_vm7 = vcmp.eq.s32.totalorder %v6614_v36, %v8562_v45  ;;  %vm447_vm8 = vcmp.eq.s32.totalorder %v6892_v60, %v8552_v43  ;;  %v3643_v36 = vld [vmem:[#allocation6 + $0xd0] sm:$0xff] }
 0x1a5   :  { %5976 = vmatprep.subr.msk.mxu0 %vm767_vm9, %v6348_v16  ;;  %5945 = vmatpush2.msk.msra.mxu1 %vm510_vm10, %v6348_v16  ;;  %vm703_vm9 = vcmp.eq.s32.totalorder %v6632_v38, %v8552_v43  ;;  %vm446_vm10 = vcmp.eq.s32.totalorder %v6892_v60, %v8562_v45  ;;  %v3655_v60 = vld [vmem:[#allocation6 + $0x130] sm:$0xff] }
 0x1a6   :  { %5977 = vmatpush1.msk.msra.mxu0 %vm766_vm11, %v6348_v16  ;;  %5946 = vmatprep.subr.msk.mxu1 %vm495_vm12, %v6348_v16  ;;  %vm702_vm11 = vcmp.eq.s32.totalorder %v6632_v38, %v8562_v45  ;;  %vm431_vm12 = vcmp.eq.s32.totalorder %v6907_v61, %v8552_v43  ;;  %v3627_v38 = vld [vmem:[#allocation6 + $0x50] sm:$0xff] }
 0x1a7   :  { %5978 = vmatprep.subr.msk.mxu0 %vm751_vm13, %v6348_v16  ;;  %5947 = vmatpush2.msk.msra.mxu1 %vm494_vm14, %v6348_v16  ;;  %vm687_vm13 = vcmp.eq.s32.totalorder %v6648_v40, %v8552_v43  ;;  %vm430_vm14 = vcmp.eq.s32.totalorder %v6907_v61, %v8562_v45  ;;  %v3638_v61 = vld [vmem:[#allocation6 + $0xa8] sm:$0xff]  ;;  %v3620_v43 = vld [vmem:[#allocation6 + $0x18] sm:$0xff] }
 0x1a8   :  { %5979 = vmatpush1.msk.msra.mxu0 %vm750_vm15, %v6348_v16  ;;  %5948 = vmatprep.subr.msk.mxu1 %vm479_vm0, %v6348_v16  ;;  %vm686_vm15 = vcmp.eq.s32.totalorder %v6648_v40, %v8562_v45  ;;  %v3659_v40 = vld [vmem:[#allocation6 + $0x150] sm:$0xff]  ;;  %v3652_v45 = vld [vmem:[#allocation6 + $0x118] sm:$0xff] }
 0x1a9   :  { %5980 = vmatprep.subr.msk.mxu0 %vm735_vm1, %v6348_v16  ;;  %5949 = vmatpush2.msk.msra.mxu1 %vm478_vm2, %v6348_v16 }
 0x1aa   :  { %5981 = vmatpush1.msk.msra.mxu0 %vm734_vm3, %v6348_v16  ;;  %5950 = vmatprep.subr.msk.mxu1 %vm463_vm4, %v6348_v16 }
 0x1ab   :  { %5982 = vmatprep.subr.msk.mxu0 %vm719_vm5, %v6348_v16  ;;  %5951 = vmatpush2.msk.msra.mxu1 %vm462_vm6, %v6348_v16 }
 0x1ac   :  { %5983 = vmatpush1.msk.msra.mxu0 %vm718_vm7, %v6348_v16  ;;  %5952 = vmatprep.subr.msk.mxu1 %vm447_vm8, %v6348_v16 }
 0x1ad   :  { %5984 = vmatprep.subr.msk.mxu0 %vm703_vm9, %v6348_v16  ;;  %5953 = vmatpush2.msk.msra.mxu1 %vm446_vm10, %v6348_v16 }
 0x1ae   :  { %5985 = vmatpush1.msk.msra.mxu0 %vm702_vm11, %v6348_v16  ;;  %5954 = vmatprep.subr.msk.mxu1 %vm431_vm12, %v6348_v16 }
 0x1af   :  { %5986 = vmatprep.subr.msk.mxu0 %vm687_vm13, %v6348_v16  ;;  %5955 = vmatpush2.msk.msra.mxu1 %vm430_vm14, %v6348_v16 }
 0x1b0   :  { %3539 = vmatprep.mubr.f32.mxu1 %v6941_v62  ;;  %5987 = vmatpush1.msk.msra.mxu0 %vm686_vm15, %v6348_v16  ;;  %v3663_v16 = vld [vmem:[#allocation6 + $0x170] sm:$0xff]  ;;  %v3670_v62 = vld [vmem:[#allocation6 + $0x1a8] sm:$0xff] }
 0x1b1   :  { %3610 = vmatprep.mubr.f32.mxu0 %v6347_v1  ;;  %3540 = vmatmul.mubr.f32.vlgmr.msra.gmra.mxu1 %v6949_v63  ;;  %v3678_v1 = vld [vmem:[#allocation6 + $0x1e8] sm:$0xff] }
 0x1b2   :  { %3611 = vmatmul.mubr.f32.vlgmr.msra.gmra.mxu0 %v6705_v47  ;;  %5988 = vmatprep.subr.mxu0 %v3648_v13  ;;  %v3626_v47 = vld [vmem:[#allocation6 + $0x48] sm:$0xff]  ;;  %v3619_v13 = vld [vmem:[#allocation6 + $0x10] sm:$0xff] }
 0x1b3   :  { %6023 = vmatprep.subr.mxu1 %v3680_v17  ;;  %5989 = vmatpush3.msra.mxu0 %v3632_v18  ;;  %v3622_v63 = vld [vmem:[#allocation6 + $0x28] sm:$0xff]  ;;  %v3651_v17 = vld [vmem:[#allocation6 + $0x110] sm:$0xff] }
 0x1b4   :  { %3939 = vmatprep.mubr.f32.mxu0 %v2621_v20  ;;  %6024 = vmatpush3.msra.mxu1 %v3664_v19  ;;  %v3634_v18 = vld [vmem:[#allocation6 + $0x88] sm:$0xff] }
 0x1b5   :  { %4009 = vmatprep.mubr.f32.mxu1 %v2763_v22  ;;  %5990 = vmatprep.subr.mxu0 %v3647_v21  ;;  %v3666_v19 = vld [vmem:[#allocation6 + $0x188] sm:$0xff]  ;;  %v8977_v21 = vpop.f32.mrf.mxu1  ;;  %v8979_v22 = vpop.f32.mrf.mxu0 }
 0x1b6   :  { %6025 = vmatprep.subr.mxu1 %v3679_v23  ;;  %5991 = vmatpush3.msra.mxu0 %v3631_v24  ;;  %v3618_v20 = vld [vmem:[#allocation6 + $0x8] sm:$0xff]  ;;  %v3633_v24 = vld [vmem:[#allocation6 + $0x80] sm:$0xff] }
 0x1b7   :  { %6026 = vmatpush3.msra.mxu1 %v3663_v16  ;;  %5992 = vmatprep.subr.mxu0 %v3646_v25  ;;  %v3650_v23 = vld [vmem:[#allocation6 + $0x108] sm:$0xff]  ;;  %v3665_v16 = vld [vmem:[#allocation6 + $0x180] sm:$0xff] }
 0x1b8   :  { %6027 = vmatprep.subr.mxu1 %v3678_v1  ;;  %5993 = vmatpush3.msra.mxu0 %v3630_v26  ;;  %v3617_v25 = vld [vmem:[#allocation6] sm:$0xff]  ;;  %v2619_v26 = vadd.f32 %v8910_v2, %v8912_v5  ;;  %v3743_v5 = vld [vmem:[#allocation6 + $0x3f0] sm:$0xff] }
 0x1b9   :  { %6028 = vmatpush3.msra.mxu1 %v3662_v27  ;;  %5994 = vmatprep.subr.mxu0 %v3645_v28  ;;  %v3649_v1 = vld [vmem:[#allocation6 + $0x100] sm:$0xff]  ;;  %v3712_v27 = vld [vmem:[#allocation6 + $0x2f8] sm:$0xff]  ;;  %v2761_v28 = vadd.f32 %v8952_v12, %v8950_v9  ;;  %v3727_v9 = vld [vmem:[#allocation6 + $0x370] sm:$0xff] }
 0x1ba   :  { %6029 = vmatprep.subr.mxu1 %v3677_v29  ;;  %5995 = vmatpush3.msra.mxu0 %v3629_v30  ;;  %v2975_v29 = vpop.f32.mrf.mxu1  ;;  %v3046_v30 = vpop.f32.mrf.mxu0  ;;  %v3710_v12 = vld [vmem:[#allocation6 + $0x2e8] sm:$0xff] }
 0x1bb   :  { %6030 = vmatpush3.msra.mxu1 %v3661_v31  ;;  %5996 = vmatprep.subr.mxu0 %v3644_v32  ;;  %v3744_v31 = vld [vmem:[#allocation6 + $0x3f8] sm:$0xff]  ;;  %v3047_v2 = vadd.f32 %v3046_v30, %v2975_v29  ;;  %v3715_v29 = vld [vmem:[#allocation6 + $0x310] sm:$0xff]  ;;  %v3698_v30 = vld [vmem:[#allocation6 + $0x288] sm:$0xff] }
 0x1bc   :  { %6031 = vmatprep.subr.mxu1 %v3676_v33  ;;  %5997 = vmatpush3.msra.mxu0 %v3628_v34  ;;  %v3696_v32 = vld [vmem:[#allocation6 + $0x278] sm:$0xff]  ;;  %v2905_v34 = vadd.f32 %v2904_v14, %v2833_v15  ;;  %v3718_v14 = vld [vmem:[#allocation6 + $0x328] sm:$0xff]  ;;  %v3701_v15 = vld [vmem:[#allocation6 + $0x2a0] sm:$0xff] }
 0x1bd   :  { %6032 = vmatpush3.msra.mxu1 %v3660_v35  ;;  %5998 = vmatprep.subr.mxu0 %v3643_v36  ;;  %v3728_v33 = vld [vmem:[#allocation6 + $0x378] sm:$0xff]  ;;  %v3711_v35 = vld [vmem:[#allocation6 + $0x2f0] sm:$0xff] }
 0x1be   :  { %6033 = vmatprep.subr.mxu1 %v3675_v37  ;;  %5999 = vmatpush3.msra.mxu0 %v3627_v38  ;;  %v3695_v36 = vld [vmem:[#allocation6 + $0x270] sm:$0xff]  ;;  %v3742_v37 = vld [vmem:[#allocation6 + $0x3e8] sm:$0xff] }
 0x1bf   :  { %6034 = vmatpush3.msra.mxu1 %v3659_v40  ;;  %6000 = vmatprep.subr.mxu0 %v3642_v42  ;;  %v3694_v38 = vld [vmem:[#allocation6 + $0x268] sm:$0xff]  ;;  %v3709_v42 = vld [vmem:[#allocation6 + $0x2e0] sm:$0xff] }
 0x1c0   :  { %6035 = vmatprep.subr.mxu1 %v3674_v46  ;;  %6001 = vmatpush3.msra.mxu0 %v3626_v47  ;;  %v3726_v40 = vld [vmem:[#allocation6 + $0x368] sm:$0xff]  ;;  %v3741_v46 = vld [vmem:[#allocation6 + $0x3e0] sm:$0xff] }
 0x1c1   :  { %6036 = vmatpush3.msra.mxu1 %v3658_v48  ;;  %6002 = vmatprep.subr.mxu0 %v3641_v49  ;;  %v3693_v47 = vld [vmem:[#allocation6 + $0x260] sm:$0xff]  ;;  %v3708_v49 = vld [vmem:[#allocation6 + $0x2d8] sm:$0xff] }
 0x1c2   :  { %6037 = vmatprep.subr.mxu1 %v3673_v50  ;;  %6003 = vmatpush3.msra.mxu0 %v3625_v51  ;;  %v3725_v48 = vld [vmem:[#allocation6 + $0x360] sm:$0xff]  ;;  %v3740_v50 = vld [vmem:[#allocation6 + $0x3d8] sm:$0xff] }
 0x1c3   :  { %6038 = vmatpush3.msra.mxu1 %v3657_v52  ;;  %6004 = vmatprep.subr.mxu0 %v3640_v53  ;;  %v3692_v51 = vld [vmem:[#allocation6 + $0x258] sm:$0xff]  ;;  %v3707_v53 = vld [vmem:[#allocation6 + $0x2d0] sm:$0xff] }
 0x1c4   :  { %6039 = vmatprep.subr.mxu1 %v3672_v54  ;;  %6005 = vmatpush3.msra.mxu0 %v3624_v55  ;;  %v3724_v52 = vld [vmem:[#allocation6 + $0x358] sm:$0xff]  ;;  %v3739_v54 = vld [vmem:[#allocation6 + $0x3d0] sm:$0xff] }
 0x1c5   :  { %6040 = vmatpush3.msra.mxu1 %v3656_v56  ;;  %6006 = vmatprep.subr.mxu0 %v3639_v57  ;;  %v3691_v55 = vld [vmem:[#allocation6 + $0x250] sm:$0xff]  ;;  %v3706_v57 = vld [vmem:[#allocation6 + $0x2c8] sm:$0xff] }
 0x1c6   :  { %6041 = vmatprep.subr.mxu1 %v3671_v58  ;;  %6007 = vmatpush3.msra.mxu0 %v3623_v59  ;;  %v3723_v56 = vld [vmem:[#allocation6 + $0x350] sm:$0xff]  ;;  %v3738_v58 = vld [vmem:[#allocation6 + $0x3c8] sm:$0xff] }
 0x1c7   :  { %6042 = vmatpush3.msra.mxu1 %v3655_v60  ;;  %6008 = vmatprep.subr.mxu0 %v3638_v61  ;;  %v3690_v59 = vld [vmem:[#allocation6 + $0x248] sm:$0xff]  ;;  %v3705_v61 = vld [vmem:[#allocation6 + $0x2c0] sm:$0xff] }
 0x1c8   :  { %6043 = vmatprep.subr.mxu1 %v3670_v62  ;;  %6009 = vmatpush3.msra.mxu0 %v3622_v63  ;;  %v3722_v60 = vld [vmem:[#allocation6 + $0x348] sm:$0xff]  ;;  %v3737_v62 = vld [vmem:[#allocation6 + $0x3c0] sm:$0xff] }
 0x1c9   :  { %6044 = vmatpush3.msra.mxu1 %v3654_v7  ;;  %6010 = vmatprep.subr.mxu0 %v3637_v44  ;;  %v3689_v63 = vld [vmem:[#allocation6 + $0x240] sm:$0xff]  ;;  %v3704_v44 = vld [vmem:[#allocation6 + $0x2b8] sm:$0xff] }
 0x1ca   :  { %6045 = vmatprep.subr.mxu1 %v3669_v3  ;;  %6011 = vmatpush3.msra.mxu0 %v3621_v4  ;;  %v3721_v7 = vld [vmem:[#allocation6 + $0x340] sm:$0xff]  ;;  %v3736_v3 = vld [vmem:[#allocation6 + $0x3b8] sm:$0xff] }
 0x1cb   :  { %6046 = vmatpush3.msra.mxu1 %v3653_v0  ;;  %6012 = vmatprep.subr.mxu0 %v3636_v10  ;;  %v3688_v4 = vld [vmem:[#allocation6 + $0x238] sm:$0xff]  ;;  %v3703_v10 = vld [vmem:[#allocation6 + $0x2b0] sm:$0xff] }
 0x1cc   :  { %6047 = vmatprep.subr.mxu1 %v3668_v11  ;;  %6013 = vmatpush3.msra.mxu0 %v3620_v43  ;;  %v3720_v0 = vld [vmem:[#allocation6 + $0x338] sm:$0xff]  ;;  %v3735_v11 = vld [vmem:[#allocation6 + $0x3b0] sm:$0xff] }
 0x1cd   :  { %6048 = vmatpush3.msra.mxu1 %v3652_v45  ;;  %6014 = vmatprep.subr.mxu0 %v3635_v6  ;;  %v3687_v43 = vld [vmem:[#allocation6 + $0x230] sm:$0xff]  ;;  %v3702_v6 = vld [vmem:[#allocation6 + $0x2a8] sm:$0xff] }
 0x1ce   :  { %6049 = vmatprep.subr.mxu1 %v3667_v8  ;;  %6015 = vmatpush3.msra.mxu0 %v3619_v13  ;;  %v3719_v45 = vld [vmem:[#allocation6 + $0x330] sm:$0xff]  ;;  %v3734_v8 = vld [vmem:[#allocation6 + $0x3a8] sm:$0xff] }
 0x1cf   :  { %6050 = vmatpush3.msra.mxu1 %v3651_v17  ;;  %6016 = vmatprep.subr.mxu0 %v3634_v18  ;;  %v3686_v13 = vld [vmem:[#allocation6 + $0x228] sm:$0xff]  ;;  %v3733_v17 = vld [vmem:[#allocation6 + $0x3a0] sm:$0xff] }
 0x1d0   :  { %6051 = vmatprep.subr.mxu1 %v3666_v19  ;;  %6017 = vmatpush3.msra.mxu0 %v3618_v20  ;;  %v3685_v18 = vld [vmem:[#allocation6 + $0x220] sm:$0xff]  ;;  %v3700_v20 = vld [vmem:[#allocation6 + $0x298] sm:$0xff] }
 0x1d1   :  { %6052 = vmatpush3.msra.mxu1 %v3650_v23  ;;  %6018 = vmatprep.subr.mxu0 %v3633_v24  ;;  %v3717_v19 = vld [vmem:[#allocation6 + $0x320] sm:$0xff]  ;;  %v3732_v23 = vld [vmem:[#allocation6 + $0x398] sm:$0xff] }
 0x1d2   :  { %6053 = vmatprep.subr.mxu1 %v3665_v16  ;;  %6019 = vmatpush3.msra.mxu0 %v3617_v25  ;;  %v3684_v24 = vld [vmem:[#allocation6 + $0x218] sm:$0xff]  ;;  %v3699_v25 = vld [vmem:[#allocation6 + $0x290] sm:$0xff] }
 0x1d3   :  { %6054 = vmatpush3.msra.mxu1 %v3649_v1  ;;  %3940 = vmatmul.mubr.f32.vlgmr.msra.gmra.mxu0 %v2619_v26  ;;  %v3716_v16 = vld [vmem:[#allocation6 + $0x318] sm:$0xff]  ;;  %v3731_v26 = vld [vmem:[#allocation6 + $0x390] sm:$0xff] }
 0x1d4   :  { %4010 = vmatmul.mubr.f32.vlgmr.msra.gmra.mxu1 %v2761_v28  ;;  %6058 = vmatprep.subr.mxu0 %v3712_v27  ;;  %v3683_v27 = vld [vmem:[#allocation6 + $0x210] sm:$0xff]  ;;  %v8987_v28 = vpop.f32.mrf.mxu1 }
 0x1d5   :  { %6093 = vmatprep.subr.mxu1 %v3744_v31  ;;  %6059 = vmatpush3.msra.mxu0 %v3696_v32  ;;  %v3730_v31 = vld [vmem:[#allocation6 + $0x388] sm:$0xff] }
 0x1d6   :  { %4079 = vmatprep.mubr.f32.mxu0 %v2905_v34  ;;  %6094 = vmatpush3.msra.mxu1 %v3728_v33  ;;  %v3682_v32 = vld [vmem:[#allocation6 + $0x208] sm:$0xff]  ;;  %v3697_v34 = vld [vmem:[#allocation6 + $0x280] sm:$0xff] }
 0x1d7   :  { %4149 = vmatprep.mubr.f32.mxu1 %v3047_v2  ;;  %6060 = vmatprep.subr.mxu0 %v3711_v35  ;;  %v3714_v33 = vld [vmem:[#allocation6 + $0x308] sm:$0xff]  ;;  %v3729_v2 = vld [vmem:[#allocation6 + $0x380] sm:$0xff] }
 0x1d8   :  { %6095 = vmatprep.subr.mxu1 %v3743_v5  ;;  %6061 = vmatpush3.msra.mxu0 %v3695_v36  ;;  %v3681_v5 = vld [vmem:[#allocation6 + $0x200] sm:$0xff]  ;;  %v3188_v36 = vpop.f32.mrf.mxu1 }
 0x1d9   :  { %6096 = vmatpush3.msra.mxu1 %v3727_v9  ;;  %6062 = vmatprep.subr.mxu0 %v3710_v12  ;;  %v3713_v9 = vld [vmem:[#allocation6 + $0x300] sm:$0xff]  ;;  %v2903_v12 = vadd.f32 %v8973_v39, %v8975_v41  ;;  %v3774_v39 = vld [vmem:[#allocation6 + $0x4e8] sm:$0xff]  ;;  %v3807_v41 = vld [vmem:[#allocation6 + $0x5f0] sm:$0xff] }
 0x1da   :  { %6097 = vmatprep.subr.mxu1 %v3742_v37  ;;  %6063 = vmatpush3.msra.mxu0 %v3694_v38  ;;  %v3776_v37 = vld [vmem:[#allocation6 + $0x4f8] sm:$0xff] }
 0x1db   :  { %6098 = vmatpush3.msra.mxu1 %v3726_v40  ;;  %6064 = vmatprep.subr.mxu0 %v3709_v42  ;;  %v3045_v40 = vadd.f32 %v8979_v22, %v8977_v21  ;;  %v3760_v42 = vld [vmem:[#allocation6 + $0x478] sm:$0xff]  ;;  %v3773_v21 = vld [vmem:[#allocation6 + $0x4e0] sm:$0xff]  ;;  %v3806_v22 = vld [vmem:[#allocation6 + $0x5e8] sm:$0xff] }
 0x1dc   :  { %6099 = vmatprep.subr.mxu1 %v3741_v46  ;;  %6065 = vmatpush3.msra.mxu0 %v3693_v47  ;;  %v3775_v46 = vld [vmem:[#allocation6 + $0x4f0] sm:$0xff]  ;;  %v3808_v47 = vld [vmem:[#allocation6 + $0x5f8] sm:$0xff] }
 0x1dd   :  { %6100 = vmatpush3.msra.mxu1 %v3725_v48  ;;  %6066 = vmatprep.subr.mxu0 %v3708_v49  ;;  %v3759_v48 = vld [vmem:[#allocation6 + $0x470] sm:$0xff]  ;;  %v3792_v49 = vld [vmem:[#allocation6 + $0x578] sm:$0xff] }
 0x1de   :  { %6101 = vmatprep.subr.mxu1 %v3740_v50  ;;  %6067 = vmatpush3.msra.mxu0 %v3692_v51  ;;  %v3758_v50 = vld [vmem:[#allocation6 + $0x468] sm:$0xff]  ;;  %v3791_v51 = vld [vmem:[#allocation6 + $0x570] sm:$0xff] }
 0x1df   :  { %6102 = vmatpush3.msra.mxu1 %v3724_v52  ;;  %6068 = vmatprep.subr.mxu0 %v3707_v53  ;;  %v3757_v52 = vld [vmem:[#allocation6 + $0x460] sm:$0xff]  ;;  %v3790_v53 = vld [vmem:[#allocation6 + $0x568] sm:$0xff] }
 0x1e0   :  { %6103 = vmatprep.subr.mxu1 %v3739_v54  ;;  %6069 = vmatpush3.msra.mxu0 %v3691_v55  ;;  %v3772_v54 = vld [vmem:[#allocation6 + $0x4d8] sm:$0xff]  ;;  %v3805_v55 = vld [vmem:[#allocation6 + $0x5e0] sm:$0xff] }
 0x1e1   :  { %6104 = vmatpush3.msra.mxu1 %v3723_v56  ;;  %6070 = vmatprep.subr.mxu0 %v3706_v57  ;;  %v3756_v56 = vld [vmem:[#allocation6 + $0x458] sm:$0xff]  ;;  %v3789_v57 = vld [vmem:[#allocation6 + $0x560] sm:$0xff] }
 0x1e2   :  { %6105 = vmatprep.subr.mxu1 %v3738_v58  ;;  %6071 = vmatpush3.msra.mxu0 %v3690_v59  ;;  %v3771_v58 = vld [vmem:[#allocation6 + $0x4d0] sm:$0xff]  ;;  %v3804_v59 = vld [vmem:[#allocation6 + $0x5d8] sm:$0xff] }
 0x1e3   :  { %6106 = vmatpush3.msra.mxu1 %v3722_v60  ;;  %6072 = vmatprep.subr.mxu0 %v3705_v61  ;;  %v3755_v60 = vld [vmem:[#allocation6 + $0x450] sm:$0xff]  ;;  %v3788_v61 = vld [vmem:[#allocation6 + $0x558] sm:$0xff] }
 0x1e4   :  { %6107 = vmatprep.subr.mxu1 %v3737_v62  ;;  %6073 = vmatpush3.msra.mxu0 %v3689_v63  ;;  %v3770_v62 = vld [vmem:[#allocation6 + $0x4c8] sm:$0xff]  ;;  %v3803_v63 = vld [vmem:[#allocation6 + $0x5d0] sm:$0xff] }
 0x1e5   :  { %6108 = vmatpush3.msra.mxu1 %v3721_v7  ;;  %6074 = vmatprep.subr.mxu0 %v3704_v44  ;;  %v3754_v7 = vld [vmem:[#allocation6 + $0x448] sm:$0xff]  ;;  %v3787_v44 = vld [vmem:[#allocation6 + $0x550] sm:$0xff] }
 0x1e6   :  { %6109 = vmatprep.subr.mxu1 %v3736_v3  ;;  %6075 = vmatpush3.msra.mxu0 %v3688_v4  ;;  %v3769_v3 = vld [vmem:[#allocation6 + $0x4c0] sm:$0xff]  ;;  %v3802_v4 = vld [vmem:[#allocation6 + $0x5c8] sm:$0xff] }
 0x1e7   :  { %6110 = vmatpush3.msra.mxu1 %v3720_v0  ;;  %6076 = vmatprep.subr.mxu0 %v3703_v10  ;;  %v3753_v0 = vld [vmem:[#allocation6 + $0x440] sm:$0xff]  ;;  %v3786_v10 = vld [vmem:[#allocation6 + $0x548] sm:$0xff] }
 0x1e8   :  { %6111 = vmatprep.subr.mxu1 %v3735_v11  ;;  %6077 = vmatpush3.msra.mxu0 %v3687_v43  ;;  %v3768_v11 = vld [vmem:[#allocation6 + $0x4b8] sm:$0xff]  ;;  %v3801_v43 = vld [vmem:[#allocation6 + $0x5c0] sm:$0xff] }
 0x1e9   :  { %6112 = vmatpush3.msra.mxu1 %v3719_v45  ;;  %6078 = vmatprep.subr.mxu0 %v3702_v6  ;;  %v3752_v45 = vld [vmem:[#allocation6 + $0x438] sm:$0xff]  ;;  %v3785_v6 = vld [vmem:[#allocation6 + $0x540] sm:$0xff] }
 0x1ea   :  { %6113 = vmatprep.subr.mxu1 %v3734_v8  ;;  %6079 = vmatpush3.msra.mxu0 %v3686_v13  ;;  %v3767_v8 = vld [vmem:[#allocation6 + $0x4b0] sm:$0xff]  ;;  %v3800_v13 = vld [vmem:[#allocation6 + $0x5b8] sm:$0xff] }
 0x1eb   :  { %6114 = vmatpush3.msra.mxu1 %v3718_v14  ;;  %6080 = vmatprep.subr.mxu0 %v3701_v15  ;;  %v3751_v14 = vld [vmem:[#allocation6 + $0x430] sm:$0xff]  ;;  %v3784_v15 = vld [vmem:[#allocation6 + $0x538] sm:$0xff] }
 0x1ec   :  { %6115 = vmatprep.subr.mxu1 %v3733_v17  ;;  %6081 = vmatpush3.msra.mxu0 %v3685_v18  ;;  %v8985_v1 = vpop.f32.mrf.mxu0  ;;  %v3766_v17 = vld [vmem:[#allocation6 + $0x4a8] sm:$0xff]  ;;  %v3799_v18 = vld [vmem:[#allocation6 + $0x5b0] sm:$0xff] }
 0x1ed   :  { %6116 = vmatpush3.msra.mxu1 %v3717_v19  ;;  %6082 = vmatprep.subr.mxu0 %v3700_v20  ;;  %v3750_v19 = vld [vmem:[#allocation6 + $0x428] sm:$0xff]  ;;  %v3783_v20 = vld [vmem:[#allocation6 + $0x530] sm:$0xff] }
 0x1ee   :  { %6117 = vmatprep.subr.mxu1 %v3732_v23  ;;  %6083 = vmatpush3.msra.mxu0 %v3684_v24  ;;  %v3117_v35 = vpop.f32.mrf.mxu0  ;;  %v3765_v23 = vld [vmem:[#allocation6 + $0x4a0] sm:$0xff]  ;;  %v3798_v24 = vld [vmem:[#allocation6 + $0x5a8] sm:$0xff] }
 0x1ef   :  { %6118 = vmatpush3.msra.mxu1 %v3716_v16  ;;  %6084 = vmatprep.subr.mxu0 %v3699_v25  ;;  %v3189_v38 = vadd.f32 %v3188_v36, %v3117_v35  ;;  %v3749_v16 = vld [vmem:[#allocation6 + $0x420] sm:$0xff]  ;;  %v3782_v25 = vld [vmem:[#allocation6 + $0x528] sm:$0xff]  ;;  %v3780_v35 = vld [vmem:[#allocation6 + $0x518] sm:$0xff] }
 0x1f0   :  { %6119 = vmatprep.subr.mxu1 %v3731_v26  ;;  %6085 = vmatpush3.msra.mxu0 %v3683_v27  ;;  %v3764_v26 = vld [vmem:[#allocation6 + $0x498] sm:$0xff]  ;;  %v3797_v27 = vld [vmem:[#allocation6 + $0x5a0] sm:$0xff]  ;;  %v3795_v36 = vld [vmem:[#allocation6 + $0x590] sm:$0xff] }
 0x1f1   :  { %6120 = vmatpush3.msra.mxu1 %v3715_v29  ;;  %6086 = vmatprep.subr.mxu0 %v3698_v30  ;;  %v3748_v29 = vld [vmem:[#allocation6 + $0x418] sm:$0xff]  ;;  %v3781_v30 = vld [vmem:[#allocation6 + $0x520] sm:$0xff] }
 0x1f2   :  { %6121 = vmatprep.subr.mxu1 %v3730_v31  ;;  %6087 = vmatpush3.msra.mxu0 %v3682_v32  ;;  %v3763_v31 = vld [vmem:[#allocation6 + $0x490] sm:$0xff]  ;;  %v3796_v32 = vld [vmem:[#allocation6 + $0x598] sm:$0xff] }
 0x1f3   :  { %6122 = vmatpush3.msra.mxu1 %v3714_v33  ;;  %6088 = vmatprep.subr.mxu0 %v3697_v34  ;;  %v3747_v34 = vld [vmem:[#allocation6 + $0x410] sm:$0xff] }
 0x1f4   :  { %6123 = vmatprep.subr.mxu1 %v3729_v2  ;;  %6089 = vmatpush3.msra.mxu0 %v3681_v5  ;;  %v3762_v5 = vld [vmem:[#allocation6 + $0x488] sm:$0xff] }
 0x1f5   :  { %6124 = vmatpush3.msra.mxu1 %v3713_v9  ;;  %4080 = vmatmul.mubr.f32.vlgmr.msra.gmra.mxu0 %v2903_v12  ;;  %v3746_v9 = vld [vmem:[#allocation6 + $0x408] sm:$0xff]  ;;  %v3779_v12 = vld [vmem:[#allocation6 + $0x510] sm:$0xff] }
 0x1f6   :  { %4150 = vmatmul.mubr.f32.vlgmr.msra.gmra.mxu1 %v3045_v40  ;;  %6128 = vmatprep.subr.mxu0 %v3776_v37  ;;  %v3761_v40 = vld [vmem:[#allocation6 + $0x480] sm:$0xff] }
 0x1f7   :  { %6129 = vmatpush3.msra.mxu0 %v3760_v42  ;;  %4219 = vmatprep.mubr.f32.mxu0 %v3189_v38  ;;  %v3794_v42 = vld [vmem:[#allocation6 + $0x588] sm:$0xff] }
 0x1f8   :  { %6130 = vmatprep.subr.mxu0 %v3775_v46  ;;  %6163 = vmatprep.subr.mxu1 %v3808_v47  ;;  %v3745_v46 = vld [vmem:[#allocation6 + $0x400] sm:$0xff]  ;;  %v3778_v47 = vld [vmem:[#allocation6 + $0x508] sm:$0xff] }
 0x1f9   :  { %6131 = vmatpush3.msra.mxu0 %v3759_v48  ;;  %6164 = vmatpush3.msra.mxu1 %v3792_v49  ;;  %v3793_v49 = vld [vmem:[#allocation6 + $0x580] sm:$0xff] }
 0x1fa   :  { %6132 = vmatprep.subr.mxu0 %v3774_v39  ;;  %6165 = vmatprep.subr.mxu1 %v3807_v41  ;;  %v3187_v39 = vadd.f32 %v8987_v28, %v8985_v1  ;;  %v3777_v41 = vld [vmem:[#allocation6 + $0x500] sm:$0xff]  ;;  %v3838_v1 = vld [vmem:[#allocation6 + $0x6e8] sm:$0xff]  ;;  %v3855_v28 = vld [vmem:[#allocation6 + $0x770] sm:$0xff] }
 0x1fb   :  { %6133 = vmatpush3.msra.mxu0 %v3758_v50  ;;  %6166 = vmatpush3.msra.mxu1 %v3791_v51  ;;  %v3840_v50 = vld [vmem:[#allocation6 + $0x6f8] sm:$0xff] }
 0x1fc   :  { %6134 = vmatprep.subr.mxu0 %v3773_v21  ;;  %6167 = vmatprep.subr.mxu1 %v3806_v22  ;;  %v3824_v21 = vld [vmem:[#allocation6 + $0x678] sm:$0xff] }
 0x1fd   :  { %6135 = vmatpush3.msra.mxu0 %v3757_v52  ;;  %6168 = vmatpush3.msra.mxu1 %v3790_v53  ;;  %v3872_v22 = vld [vmem:[#allocation6 + $0x7f8] sm:$0xff]  ;;  %v3839_v52 = vld [vmem:[#allocation6 + $0x6f0] sm:$0xff] }
 0x1fe   :  { %6136 = vmatprep.subr.mxu0 %v3772_v54  ;;  %6169 = vmatprep.subr.mxu1 %v3805_v55  ;;  %v3856_v53 = vld [vmem:[#allocation6 + $0x778] sm:$0xff]  ;;  %v3823_v54 = vld [vmem:[#allocation6 + $0x670] sm:$0xff] }
 0x1ff   :  { %6137 = vmatpush3.msra.mxu0 %v3756_v56  ;;  %6170 = vmatpush3.msra.mxu1 %v3789_v57  ;;  %v3871_v55 = vld [vmem:[#allocation6 + $0x7f0] sm:$0xff]  ;;  %v3822_v56 = vld [vmem:[#allocation6 + $0x668] sm:$0xff] }
 0x200   :  { %6138 = vmatprep.subr.mxu0 %v3771_v58  ;;  %6171 = vmatprep.subr.mxu1 %v3804_v59  ;;  %v3870_v57 = vld [vmem:[#allocation6 + $0x7e8] sm:$0xff]  ;;  %v3837_v58 = vld [vmem:[#allocation6 + $0x6e0] sm:$0xff] }
 0x201   :  { %6139 = vmatpush3.msra.mxu0 %v3755_v60  ;;  %6172 = vmatpush3.msra.mxu1 %v3788_v61  ;;  %v3854_v59 = vld [vmem:[#allocation6 + $0x768] sm:$0xff]  ;;  %v3821_v60 = vld [vmem:[#allocation6 + $0x660] sm:$0xff] }
 0x202   :  { %6140 = vmatprep.subr.mxu0 %v3770_v62  ;;  %6173 = vmatprep.subr.mxu1 %v3803_v63  ;;  %v3869_v61 = vld [vmem:[#allocation6 + $0x7e0] sm:$0xff]  ;;  %v3836_v62 = vld [vmem:[#allocation6 + $0x6d8] sm:$0xff] }
 0x203   :  { %6141 = vmatpush3.msra.mxu0 %v3754_v7  ;;  %6174 = vmatpush3.msra.mxu1 %v3787_v44  ;;  %v3853_v63 = vld [vmem:[#allocation6 + $0x760] sm:$0xff]  ;;  %v3820_v7 = vld [vmem:[#allocation6 + $0x658] sm:$0xff] }
 0x204   :  { %6142 = vmatprep.subr.mxu0 %v3769_v3  ;;  %6175 = vmatprep.subr.mxu1 %v3802_v4  ;;  %v3868_v44 = vld [vmem:[#allocation6 + $0x7d8] sm:$0xff]  ;;  %v3835_v3 = vld [vmem:[#allocation6 + $0x6d0] sm:$0xff] }
 0x205   :  { %6143 = vmatpush3.msra.mxu0 %v3753_v0  ;;  %6176 = vmatpush3.msra.mxu1 %v3786_v10  ;;  %v3852_v4 = vld [vmem:[#allocation6 + $0x758] sm:$0xff]  ;;  %v3819_v0 = vld [vmem:[#allocation6 + $0x650] sm:$0xff] }
 0x206   :  { %6144 = vmatprep.subr.mxu0 %v3768_v11  ;;  %6177 = vmatprep.subr.mxu1 %v3801_v43  ;;  %v3867_v10 = vld [vmem:[#allocation6 + $0x7d0] sm:$0xff]  ;;  %v3834_v11 = vld [vmem:[#allocation6 + $0x6c8] sm:$0xff] }
 0x207   :  { %6145 = vmatpush3.msra.mxu0 %v3752_v45  ;;  %6178 = vmatpush3.msra.mxu1 %v3785_v6  ;;  %v3851_v43 = vld [vmem:[#allocation6 + $0x750] sm:$0xff]  ;;  %v3818_v45 = vld [vmem:[#allocation6 + $0x648] sm:$0xff] }
 0x208   :  { %6146 = vmatprep.subr.mxu0 %v3767_v8  ;;  %6179 = vmatprep.subr.mxu1 %v3800_v13  ;;  %v3866_v6 = vld [vmem:[#allocation6 + $0x7c8] sm:$0xff]  ;;  %v3833_v8 = vld [vmem:[#allocation6 + $0x6c0] sm:$0xff] }
 0x209   :  { %6147 = vmatpush3.msra.mxu0 %v3751_v14  ;;  %6180 = vmatpush3.msra.mxu1 %v3784_v15  ;;  %v3850_v13 = vld [vmem:[#allocation6 + $0x748] sm:$0xff]  ;;  %v3817_v14 = vld [vmem:[#allocation6 + $0x640] sm:$0xff] }
 0x20a   :  { %6148 = vmatprep.subr.mxu0 %v3766_v17  ;;  %6181 = vmatprep.subr.mxu1 %v3799_v18  ;;  %v3865_v15 = vld [vmem:[#allocation6 + $0x7c0] sm:$0xff]  ;;  %v3832_v17 = vld [vmem:[#allocation6 + $0x6b8] sm:$0xff] }
 0x20b   :  { %6149 = vmatpush3.msra.mxu0 %v3750_v19  ;;  %6182 = vmatpush3.msra.mxu1 %v3783_v20  ;;  %v3849_v18 = vld [vmem:[#allocation6 + $0x740] sm:$0xff]  ;;  %v3816_v19 = vld [vmem:[#allocation6 + $0x638] sm:$0xff] }
 0x20c   :  { %6150 = vmatprep.subr.mxu0 %v3765_v23  ;;  %6183 = vmatprep.subr.mxu1 %v3798_v24  ;;  %v3864_v20 = vld [vmem:[#allocation6 + $0x7b8] sm:$0xff]  ;;  %v3831_v23 = vld [vmem:[#allocation6 + $0x6b0] sm:$0xff] }
 0x20d   :  { %6151 = vmatpush3.msra.mxu0 %v3749_v16  ;;  %6184 = vmatpush3.msra.mxu1 %v3782_v25  ;;  %v3257_v33 = vpop.f32.mrf.mxu1  ;;  %v3848_v24 = vld [vmem:[#allocation6 + $0x738] sm:$0xff]  ;;  %v3815_v16 = vld [vmem:[#allocation6 + $0x630] sm:$0xff] }
 0x20e   :  { %6152 = vmatprep.subr.mxu0 %v3764_v26  ;;  %6185 = vmatprep.subr.mxu1 %v3797_v27  ;;  %v3328_v2 = vpop.f32.mrf.mxu0  ;;  %v3863_v25 = vld [vmem:[#allocation6 + $0x7b0] sm:$0xff]  ;;  %v3830_v26 = vld [vmem:[#allocation6 + $0x6a8] sm:$0xff] }
 0x20f   :  { %6153 = vmatpush3.msra.mxu0 %v3748_v29  ;;  %6186 = vmatpush3.msra.mxu1 %v3781_v30  ;;  %v3259_v37 = vpop.f32.mrf.mxu1  ;;  %v3329_v51 = vadd.f32 %v3328_v2, %v3257_v33  ;;  %v3847_v27 = vld [vmem:[#allocation6 + $0x730] sm:$0xff]  ;;  %v3814_v29 = vld [vmem:[#allocation6 + $0x628] sm:$0xff]  ;;  %v3813_v33 = vld [vmem:[#allocation6 + $0x620] sm:$0xff] }
 0x210   :  { %6154 = vmatprep.subr.mxu0 %v3763_v31  ;;  %6187 = vmatprep.subr.mxu1 %v3796_v32  ;;  %v3330_v38 = vpop.f32.mrf.mxu0  ;;  %v3862_v30 = vld [vmem:[#allocation6 + $0x7a8] sm:$0xff]  ;;  %v3829_v31 = vld [vmem:[#allocation6 + $0x6a0] sm:$0xff] }
 0x211   :  { %6155 = vmatpush3.msra.mxu0 %v3747_v34  ;;  %6188 = vmatpush3.msra.mxu1 %v3780_v35  ;;  %v3331_v48 = vadd.f32 %v3330_v38, %v3259_v37  ;;  %v3846_v32 = vld [vmem:[#allocation6 + $0x728] sm:$0xff]  ;;  %v3861_v34 = vld [vmem:[#allocation6 + $0x7a0] sm:$0xff]  ;;  %v3828_v35 = vld [vmem:[#allocation6 + $0x698] sm:$0xff] }
 0x212   :  { %6156 = vmatprep.subr.mxu0 %v3762_v5  ;;  %6189 = vmatprep.subr.mxu1 %v3795_v36  ;;  %v3845_v2 = vld [vmem:[#allocation6 + $0x720] sm:$0xff]  ;;  %v3812_v5 = vld [vmem:[#allocation6 + $0x618] sm:$0xff]  ;;  %v3811_v37 = vld [vmem:[#allocation6 + $0x610] sm:$0xff] }
 0x213   :  { %6157 = vmatpush3.msra.mxu0 %v3746_v9  ;;  %6190 = vmatpush3.msra.mxu1 %v3779_v12  ;;  %v3860_v36 = vld [vmem:[#allocation6 + $0x798] sm:$0xff]  ;;  %v3827_v9 = vld [vmem:[#allocation6 + $0x690] sm:$0xff] }
 0x214   :  { %6158 = vmatprep.subr.mxu0 %v3761_v40  ;;  %6191 = vmatprep.subr.mxu1 %v3794_v42  ;;  %v3844_v12 = vld [vmem:[#allocation6 + $0x718] sm:$0xff]  ;;  %v3859_v38 = vld [vmem:[#allocation6 + $0x790] sm:$0xff]  ;;  %v3826_v40 = vld [vmem:[#allocation6 + $0x688] sm:$0xff] }
 0x215   :  { %6159 = vmatpush3.msra.mxu0 %v3745_v46  ;;  %6192 = vmatpush3.msra.mxu1 %v3778_v47  ;;  %v3843_v42 = vld [vmem:[#allocation6 + $0x710] sm:$0xff]  ;;  %v3810_v46 = vld [vmem:[#allocation6 + $0x608] sm:$0xff] }
 0x216   :  { %4220 = vmatmul.mubr.f32.vlgmr.msra.gmra.mxu0 %v3187_v39  ;;  %6193 = vmatprep.subr.mxu1 %v3793_v49  ;;  %v3858_v47 = vld [vmem:[#allocation6 + $0x788] sm:$0xff]  ;;  %v3809_v39 = vld [vmem:[#allocation6 + $0x600] sm:$0xff] }
 0x217   :  { %6194 = vmatpush3.msra.mxu1 %v3777_v41  ;;  %4289 = vmatprep.mubr.f32.mxu1 %v3331_v48  ;;  %v3825_v48 = vld [vmem:[#allocation6 + $0x680] sm:$0xff]  ;;  %v3842_v49 = vld [vmem:[#allocation6 + $0x708] sm:$0xff] }
 0x218   :  { %4290 = vmatmul.mubr.f32.vlgmr.msra.gmra.mxu1 %v3329_v51  ;;  %6198 = vmatprep.subr.mxu0 %v3840_v50  ;;  %v3857_v41 = vld [vmem:[#allocation6 + $0x780] sm:$0xff] }
 0x219   :  { %6199 = vmatpush3.msra.mxu0 %v3824_v21  ;;  %6233 = vmatprep.subr.mxu1 %v3872_v22  ;;  %v3841_v50 = vld [vmem:[#allocation6 + $0x700] sm:$0xff] }
 0x21a   :  { %6200 = vmatprep.subr.mxu0 %v3839_v52  ;;  %6234 = vmatpush3.msra.mxu1 %v3856_v53 }
 0x21b   :  { %6201 = vmatpush3.msra.mxu0 %v3823_v54  ;;  %6235 = vmatprep.subr.mxu1 %v3871_v55 }
 0x21c   :  { %6202 = vmatprep.subr.mxu0 %v3838_v1  ;;  %6236 = vmatpush3.msra.mxu1 %v3855_v28 }
 0x21d   :  { %6203 = vmatpush3.msra.mxu0 %v3822_v56  ;;  %6237 = vmatprep.subr.mxu1 %v3870_v57 }
 0x21e   :  { %6204 = vmatprep.subr.mxu0 %v3837_v58  ;;  %6238 = vmatpush3.msra.mxu1 %v3854_v59 }
 0x21f   :  { %6205 = vmatpush3.msra.mxu0 %v3821_v60  ;;  %6239 = vmatprep.subr.mxu1 %v3869_v61 }
 0x220   :  { %6206 = vmatprep.subr.mxu0 %v3836_v62  ;;  %6240 = vmatpush3.msra.mxu1 %v3853_v63 }
 0x221   :  { %6207 = vmatpush3.msra.mxu0 %v3820_v7  ;;  %6241 = vmatprep.subr.mxu1 %v3868_v44  ;;  %v3874_v44 = vstv %s9004_s3  ;;  %s6349_s3 = smov [#allocation8]  }
 0x222   :  { %6208 = vmatprep.subr.mxu0 %v3835_v3  ;;  %6242 = vmatpush3.msra.mxu1 %v3852_v4  ;;  %s4442_s28 = sshll.u32 %s6349_s3, 4  ;;  %s4443_s28 = int_to_ptr.vmem [resolvable:$true] %s4442_s28 }
 0x223   :  { %6209 = vmatpush3.msra.mxu0 %v3819_v0  ;;  %6243 = vmatprep.subr.mxu1 %v3867_v10  ;;  %s6317_s29 = scalar_lea.vmem %s4443_s28, 16  ;;  %s6321_s30 = scalar_lea.vmem %s4443_s28, 32 }
 0x224   :  { %6210 = vmatprep.subr.mxu0 %v3834_v11  ;;  %6244 = vmatpush3.msra.mxu1 %v3851_v43  ;;  %p6318_p10 = scmp.ne.s32.totalorder %s4443_s28, %s6317_s29  ;;  %p6322_p11 = scmp.lt.s32.totalorder %s4443_s28, %s4443_s28 }
 0x225   :  { %6211 = vmatpush3.msra.mxu0 %v3818_v45  ;;  %6245 = vmatprep.subr.mxu1 %v3866_v6  ;;  %p6323_p12 = scmp.lt.s32.totalorder %s6321_s30, %s6317_s29 }
 0x226   :  { %6212 = vmatprep.subr.mxu0 %v3833_v8  ;;  %6246 = vmatpush3.msra.mxu1 %v3850_v13 }
 0x227   :  { %6213 = vmatpush3.msra.mxu0 %v3817_v14  ;;  %6247 = vmatprep.subr.mxu1 %v3865_v15  ;;  %p6324_p13 = por %p6323_p12, %p6322_p11 }
 0x228   :  { %6214 = vmatprep.subr.mxu0 %v3832_v17  ;;  %6248 = vmatpush3.msra.mxu1 %v3849_v18 }
 0x229   :  { %6215 = vmatpush3.msra.mxu0 %v3816_v19  ;;  %6249 = vmatprep.subr.mxu1 %v3864_v20  ;;  %p6325_p0 = pnand %p6324_p13, %p6318_p10 }
 0x22a   :  { %6216 = vmatprep.subr.mxu0 %v3831_v23  ;;  %6250 = vmatpush3.msra.mxu1 %v3848_v24 }
 0x22b   :  { %6217 = vmatpush3.msra.mxu0 %v3815_v16  ;;  %6251 = vmatprep.subr.mxu1 %v3863_v25 }
 0x22c   :  { %6218 = vmatprep.subr.mxu0 %v3830_v26  ;;  %6252 = vmatpush3.msra.mxu1 %v3847_v27 }
 0x22d   :  { %6219 = vmatpush3.msra.mxu0 %v3814_v29  ;;  %6253 = vmatprep.subr.mxu1 %v3862_v30 }
 0x22e   :  { %6220 = vmatprep.subr.mxu0 %v3829_v31  ;;  %6254 = vmatpush3.msra.mxu1 %v3846_v32 }
 0x22f   :  { %6221 = vmatpush3.msra.mxu0 %v3813_v33  ;;  %6255 = vmatprep.subr.mxu1 %v3861_v34  ;;  %v3470_v51 = vpop.f32.mrf.mxu1 }
 0x230   :  { %6222 = vmatprep.subr.mxu0 %v3828_v35  ;;  %6256 = vmatpush3.msra.mxu1 %v3845_v2 }
 0x231   :  { %6223 = vmatpush3.msra.mxu0 %v3812_v5  ;;  %6257 = vmatprep.subr.mxu1 %v3860_v36  ;;  %v3472_v22 = vpop.f32.mrf.mxu1 }
 0x232   :  { %6224 = vmatprep.subr.mxu0 %v3827_v9  ;;  %6258 = vmatpush3.msra.mxu1 %v3844_v12 }
 0x233   :  { %6225 = vmatpush3.msra.mxu0 %v3811_v37  ;;  %6259 = vmatprep.subr.mxu1 %v3859_v38 }
 0x234   :  { %6226 = vmatprep.subr.mxu0 %v3826_v40  ;;  %6260 = vmatpush3.msra.mxu1 %v3843_v42 }
 0x235   :  { %6227 = vmatpush3.msra.mxu0 %v3810_v46  ;;  %6261 = vmatprep.subr.mxu1 %v3858_v47 }
 0x236   :  { %6228 = vmatprep.subr.mxu0 %v3825_v48  ;;  %6262 = vmatpush3.msra.mxu1 %v3842_v49 }
 0x237   :  { %6229 = vmatpush3.msra.mxu0 %v3809_v39  ;;  %6263 = vmatprep.subr.mxu1 %v3857_v41 }
 0x238   :  { %6264 = vmatpush3.msra.mxu1 %v3841_v50 }
 0x250   :  { %v3399_v21 = vpop.f32.mrf.mxu0 }
 0x251   :  { %v3471_v54 = vadd.f32 %v3470_v51, %v3399_v21 }
 0x252   :  { %v3401_v52 = vpop.f32.mrf.mxu0 }
 0x253   :  { %v3473_v53 = vadd.f32 %v3472_v22, %v3401_v52 }
 0x255   :  { %4359 = vmatprep.mubr.f32.mxu0 %v3473_v53 }
 0x256   :  { %4360 = vmatmul.mubr.f32.vlgmr.msra.gmra.mxu0 %v3471_v54 }
 0x271   :  { %v3541_v55 = vpop.f32.mrf.mxu1 }
 0x272   :  { %v3612_v1 = vpop.f32.mrf.mxu0 }
 0x273   :  { %v3543_v28 = vpop.f32.mrf.mxu1  ;;  %v3613_v58 = vadd.f32 %v3612_v1, %v3541_v55 }
 0x274   :  { %v3614_v56 = vpop.f32.mrf.mxu0 }
 0x275   :  { %v3615_v57 = vadd.f32 %v3614_v56, %v3543_v28 }
 0x277   :  { %4429 = vmatprep.mubr.f32.mxu1 %v3615_v57 }
 0x278   :  { %4430 = vmatmul.mubr.f32.vlgmr.msra.gmra.mxu1 %v3613_v58 }
 0x293   :  { %v6020_v59 = vpop.f32.mrf.mxu0 }
 0x294   :  { %v6055_v60 = vpop.f32.mrf.mxu1 }
 0x295   :  { %v6021_v61 = vpop.f32.mrf.mxu0 }
 0x296   :  { %v6056_v63 = vpop.f32.mrf.mxu1  ;;  %v6022_v7 = vadd.f32 %v6021_v61, %v6020_v59 }
 0x297   :  { %v6057_v43 = vadd.f32 %v6056_v63, %v6055_v60 }
 0x298   :  { %v3942_v10 = vadd.f32 %v6022_v7, %v3874_v44 }
 0x29a   :  { %v4012_v13 = vadd.f32 %v6057_v43, %v3942_v10 }
 0x2b5   :  { %v6090_v62 = vpop.f32.mrf.mxu0 }
 0x2b6   :  { %v6125_v3 = vpop.f32.mrf.mxu1 }
 0x2b7   :  { %v6091_v4 = vpop.f32.mrf.mxu0 }
 0x2b8   :  { %v6126_v11 = vpop.f32.mrf.mxu1  ;;  %v6092_v45 = vadd.f32 %v6091_v4, %v6090_v62 }
 0x2b9   :  { %v6127_v18 = vadd.f32 %v6126_v11, %v6125_v3 }
 0x2ba   :  { %v4082_v15 = vadd.f32 %v6092_v45, %v4012_v13 }
 0x2bc   :  { %v4152_v23 = vadd.f32 %v6127_v18, %v4082_v15 }
 0x2d6   :  { %v6160_v0 = vpop.f32.mrf.mxu0 }
 0x2d8   :  { %v6161_v6 = vpop.f32.mrf.mxu0  ;;  %v6195_v8 = vpop.f32.mrf.mxu1 }
 0x2d9   :  { %v6162_v19 = vadd.f32 %v6161_v6, %v6160_v0 }
 0x2da   :  { %v6196_v17 = vpop.f32.mrf.mxu1 }
 0x2db   :  { %v6197_v24 = vadd.f32 %v6196_v17, %v6195_v8  ;;  %v4222_v16 = vadd.f32 %v6162_v19, %v4152_v23 }
 0x2dd   :  { %v4292_v27 = vadd.f32 %v6197_v24, %v4222_v16 }
 0x316   :  { %v6230_v14 = vpop.f32.mrf.mxu0 }
 0x318   :  { %v6231_v20 = vpop.f32.mrf.mxu0 }
 0x319   :  { %v6232_v25 = vadd.f32 %v6231_v20, %v6230_v14 }
 0x31b   :  { %v4362_v30 = vadd.f32 %v6232_v25, %v4292_v27 }
 0x338   :  { %v6265_v26 = vpop.f32.mrf.mxu1 }
 0x33a   :  { %v6266_v29 = vpop.f32.mrf.mxu1 }
 0x33b   :  { %v6267_v31 = vadd.f32 %v6266_v29, %v6265_v26 }
 0x33d   :  { %v4432_v32 = vadd.f32 %v6267_v31, %v4362_v30 }
 0x33f   :  { %4435 = vst [vmem:[#allocation8] sm:$0x1] %v4432_v32 }
 0x340   :  { %6328 = shalt.err (!%p6325_p0)
}
 0x341   :  { %4445 = dma.vmem_to_hbm [thread:$0]  %s4443_s28, 16, %s9005_s4, [#allocation5]  }
 0x342   :  { %6341 = dma.done.wait [#allocation5], 16  }
 0x343   :  { %6342 = vsyncadd [#allocation5], 4294967280 }
 0x344   :  { %4449 = vsyncpa [#allocation4], 1 }
 0x345   :  { %4450 = vsyncpa [#allocation7], 1 }
 0x346   :  { %4451 = vsyncpa [#allocation5], 1 }

</bundles_post_ra>
